<compile_context>
chip_gen: v7x
topology: tpu7x:2x2x1
jax: 0.10.0
libtpu: 0.0.40
codegen_flags: <defaults>
</compile_context>

<pallas_src>
import math

import numpy as np
import jax
import jax.numpy as jnp
from jax import lax
from jax.experimental import pallas as pl
from jax.experimental.pallas import tpu as pltpu

# ---- model hyper-parameters (module spec) -----------------------------------
EMBED = 20           # embedding_size
HIDDEN1 = 20         # fc1 out / attention embed_dim
HIDDEN2 = 60
HIDDEN3 = 20
NUM_CLASSES = 1
HEADS = 4
HEAD_DIM = HIDDEN1 // HEADS          # 5
TOKENS = 8           # num_tokens (small)

# ---- kernel tiling -----------------------------------------------------------
LANES = 128
B_BLK = 16                           # samples per grid step
BT = TOKENS * B_BLK                  # 128 rows per step, ordered (t, b) == key columns
ROWS = HEADS * BT                    # 512 head-stacked query rows, ordered (h, t, b)
NEG = -1e30                          # finite "-inf": exact 0 after softmax, no NaN risk

# ---- packed constant-slab layout (all row offsets 8-aligned, col offset 0) ---
R_W1 = 0             # (20, 20)
R_WQ = 24            # (20, 20)  pre-scaled by 1/sqrt(head_dim)
R_WK = 48            # (20, 20)
R_WV = 72            # (20, 20)
R_W3 = 96            # (60, 20)
R_W4 = 160           # (20, 128) only col 0 is real (lane-dense fc4)
R_B1 = 184
R_BQ = 192
R_BK = 200
R_BV = 208
R_B2 = 216           # fused b2 + bo @ sum_t W2_t   (1, 60)
R_B3 = 224
R_B4 = 232           # (1, 128) only col 0 is real
R_PE = 240           # (BT, 20)  positional encoding replicated per sample
R_HM = R_PE + BT     # (ROWS, 20) 0/1 per-row head-column mask
R_BD = R_HM + ROWS   # (ROWS, BT) additive batch block-diagonal mask (0 / NEG)
SLAB_ROWS = R_BD + ROWS              # 1392


def _head_mask():
    hm = np.zeros((ROWS, HIDDEN1), np.float32)
    for h in range(HEADS):
        hm[h * BT:(h + 1) * BT, h * HEAD_DIM:(h + 1) * HEAD_DIM] = 1.0
    return hm


def _block_diag_mask():
    r = np.arange(ROWS)[:, None] % B_BLK      # batch index of query row (h, t, b)
    c = np.arange(BT)[None, :] % B_BLK        # batch index of key column (t, b)
    return np.where(r == c, 0.0, NEG).astype(np.float32)


_HEAD_MASK = _head_mask()
_BLOCK_DIAG = _block_diag_mask()


def attention_net_kernel(x_ref, kadd_ref, slab_ref, wc_ref, out_ref):
    f32 = jnp.float32

    # static, aligned views into the packed constant slab (free)
    w1 = slab_ref[R_W1:R_W1 + EMBED, 0:HIDDEN1]
    wq = slab_ref[R_WQ:R_WQ + HIDDEN1, 0:HIDDEN1]     # already scaled by 1/sqrt(Dh)
    wk = slab_ref[R_WK:R_WK + HIDDEN1, 0:HIDDEN1]
    wv = slab_ref[R_WV:R_WV + HIDDEN1, 0:HIDDEN1]
    w3 = slab_ref[R_W3:R_W3 + HIDDEN2, 0:HIDDEN3]
    w4 = slab_ref[R_W4:R_W4 + HIDDEN3, 0:LANES]       # (20, 128) zero-padded
    b1 = slab_ref[R_B1:R_B1 + 1, 0:HIDDEN1]
    bq = slab_ref[R_BQ:R_BQ + 1, 0:HIDDEN1]
    bk = slab_ref[R_BK:R_BK + 1, 0:HIDDEN1]
    bv = slab_ref[R_BV:R_BV + 1, 0:HIDDEN1]
    b2 = slab_ref[R_B2:R_B2 + 1, 0:HIDDEN2]
    b3 = slab_ref[R_B3:R_B3 + 1, 0:HIDDEN3]
    b4 = slab_ref[R_B4:R_B4 + 1, 0:LANES]
    pe = slab_ref[R_PE:R_PE + BT, 0:EMBED]
    hmask = slab_ref[R_HM:R_HM + ROWS, 0:HIDDEN1]
    bdiag = slab_ref[R_BD:R_BD + ROWS, 0:BT]

    # positional encoding + fc1 on all (t, b) rows of this batch block
    h1 = jnp.dot(x_ref[...] + pe, w1, preferred_element_type=f32) + b1        # (BT, H1)

    # q / k / v projections (q scaling folded into wq / bq host-side)
    q = jnp.dot(h1, wq, preferred_element_type=f32) + bq
    k = jnp.dot(h1, wk, preferred_element_type=f32) + bk
    v = jnp.dot(h1, wv, preferred_element_type=f32) + bv

    # head-stacked queries, rows ordered (head, t, b); 0/1 head-column mask keeps
    # only the row's head's Dh columns so one matmul yields per-head scores.
    q_all = jnp.concatenate([q, q, q, q], axis=0) * hmask                     # (ROWS, H1)
    scores = lax.dot_general(q_all, k, (((1,), (1,)), ((), ())),
                             preferred_element_type=f32)                      # (ROWS, BT)
    scores = scores + bdiag + kadd_ref[0:1, :]       # batch block-diag + key padding

    m = jnp.max(scores, axis=-1, keepdims=True)
    p = jnp.exp(scores - m)
    attn = p * pl.reciprocal(jnp.sum(p, axis=-1, keepdims=True), approx=True)
    # TODO(synk): attention dropout (p=0.2) is identity in eval mode.

    # PV, then fold the 4 head row-blocks back into the concatenated-head layout
    o = jnp.dot(attn, v, preferred_element_type=f32) * hmask                  # (ROWS, H1)
    hc = o[0:BT] + o[BT:2 * BT] + o[2 * BT:3 * BT] + o[3 * BT:4 * BT]         # (BT, H1)

    # out-projection and flatten+fc2 fused into one token-widened matmul:
    #   Wc_t = Wo @ W2_t lives at lane offset t*128 -> all fold slices aligned.
    f2w = jnp.dot(hc, wc_ref[...], preferred_element_type=f32)                # (BT, T*128)
    acc = f2w[0:B_BLK, 0:HIDDEN2]
    for t in range(1, TOKENS):
        acc = acc + f2w[t * B_BLK:(t + 1) * B_BLK,
                        t * LANES:t * LANES + HIDDEN2]
    f2 = jnp.maximum(acc + b2, 0.0)                  # relu (dropout = identity)

    f3 = jnp.maximum(jnp.dot(f2, w3, preferred_element_type=f32) + b3, 0.0)   # (B_BLK, H3)

    # lane-dense (B_BLK, 128) store; only column 0 is the real logit
    out_ref[...] = jnp.dot(f3, w4, preferred_element_type=f32) + b4


def _pack_constants(params):
    f32 = jnp.float32
    scale = 1.0 / math.sqrt(HEAD_DIM)

    slab = jnp.zeros((SLAB_ROWS, LANES), f32)
    slab = slab.at[R_W1:R_W1 + EMBED, 0:HIDDEN1].set(params["w1"])
    slab = slab.at[R_WQ:R_WQ + HIDDEN1, 0:HIDDEN1].set(params["wq"] * scale)
    slab = slab.at[R_WK:R_WK + HIDDEN1, 0:HIDDEN1].set(params["wk"])
    slab = slab.at[R_WV:R_WV + HIDDEN1, 0:HIDDEN1].set(params["wv"])
    slab = slab.at[R_W3:R_W3 + HIDDEN2, 0:HIDDEN3].set(params["w3"])
    slab = slab.at[R_W4:R_W4 + HIDDEN3, 0:NUM_CLASSES].set(params["w4"])
    slab = slab.at[R_B1, 0:HIDDEN1].set(params["b1"][0])
    slab = slab.at[R_BQ, 0:HIDDEN1].set(params["bq"][0] * scale)
    slab = slab.at[R_BK, 0:HIDDEN1].set(params["bk"][0])
    slab = slab.at[R_BV, 0:HIDDEN1].set(params["bv"][0])

    # fc2 bias with the attention out-projection bias folded in
    w2_t = params["w2"].reshape(TOKENS, HIDDEN1, HIDDEN2)        # W2_t = W2[t*H1:(t+1)*H1]
    b2p = params["b2"][0] + params["bo"][0] @ w2_t.sum(axis=0)
    slab = slab.at[R_B2, 0:HIDDEN2].set(b2p)
    slab = slab.at[R_B3, 0:HIDDEN3].set(params["b3"][0])
    slab = slab.at[R_B4, 0:NUM_CLASSES].set(params["b4"][0])

    pe_rows = jnp.repeat(params["pe"][0], B_BLK, axis=0)          # (BT, E), rows (t, b)
    slab = slab.at[R_PE:R_PE + BT, 0:EMBED].set(pe_rows)
    slab = slab.at[R_HM:R_HM + ROWS, 0:HIDDEN1].set(jnp.asarray(_HEAD_MASK))
    slab = slab.at[R_BD:R_BD + ROWS, 0:BT].set(jnp.asarray(_BLOCK_DIAG))

    # Wo folded into a token-widened fc2 weight: Wc_t = Wo @ W2_t at lane t*128
    wc = jnp.einsum("de,teo->tdo", params["wo"], w2_t)            # (T, H1, H2)
    wc = jnp.pad(wc, ((0, 0), (0, 0), (0, LANES - HIDDEN2)))       # (T, H1, 128)
    wc_wide = jnp.transpose(wc, (1, 0, 2)).reshape(HIDDEN1, TOKENS * LANES)
    return slab, wc_wide


@jax.jit
def attention_network_forward(x, mask, params):
    """x: (B, T, E) float32; mask: (B, T) float32 (1.0 = padded key)."""
    batch = x.shape[0]
    assert batch % B_BLK == 0 and x.shape[1] == TOKENS and x.shape[2] == EMBED
    nb = batch // B_BLK

    slab, wc_wide = _pack_constants(params)

    # activation rows ordered (block, t, b): row = blk*BT + t*B_BLK + b
    x_rows = (x.reshape(nb, B_BLK, TOKENS, EMBED)
                .transpose(0, 2, 1, 3)
                .reshape(nb * BT, EMBED))
    # additive key-padding mask per key column (t, b); replicated to 8 rows/block
    kadd = (mask.reshape(nb, B_BLK, TOKENS).transpose(0, 2, 1)
                .reshape(nb, 1, BT) * NEG)
    kadd = jnp.broadcast_to(kadd, (nb, 8, BT)).reshape(nb * 8, BT)

    out = pl.pallas_call(
        attention_net_kernel,
        out_shape=jax.ShapeDtypeStruct((batch, LANES), jnp.float32),
        grid_spec=pltpu.PrefetchScalarGridSpec(
            num_scalar_prefetch=0,
            grid=(nb,),
            in_specs=[
                pl.BlockSpec((BT, EMBED), lambda i: (i, 0)),
                pl.BlockSpec((8, BT), lambda i: (i, 0)),
                pl.BlockSpec((SLAB_ROWS, LANES), lambda i: (0, 0)),
                pl.BlockSpec((HIDDEN1, TOKENS * LANES), lambda i: (0, 0)),
            ],
            out_specs=pl.BlockSpec((B_BLK, LANES), lambda i: (i, 0)),
        ),
        compiler_params=pltpu.CompilerParams(
            dimension_semantics=("parallel",)),
    )(x_rows, kadd, slab, wc_wide)
    return out[:, :NUM_CLASSES]


def make_positional_encoding(length, d_model):
    position = jnp.arange(length, dtype=jnp.float32)[:, None]
    div_term = jnp.exp(jnp.arange(0, d_model, 2, dtype=jnp.float32)
                       * (-math.log(10000.0) / d_model))
    pe = jnp.zeros((length, d_model), dtype=jnp.float32)
    pe = pe.at[:, 0::2].set(jnp.sin(position * div_term))
    pe = pe.at[:, 1::2].set(jnp.cos(position * div_term))
    return pe[None]  # (1, T, E)


def init_params(key):
    def linear(k, fan_in, fan_out):
        bound = 1.0 / math.sqrt(fan_in)
        kw, kb = jax.random.split(k)
        w = jax.random.uniform(kw, (fan_in, fan_out), jnp.float32, -bound, bound)
        b = jax.random.uniform(kb, (1, fan_out), jnp.float32, -bound, bound)
        return w, b

    ks = jax.random.split(key, 8)
    w1, b1 = linear(ks[0], EMBED, HIDDEN1)
    wq, bq = linear(ks[1], HIDDEN1, HIDDEN1)
    wk, bk = linear(ks[2], HIDDEN1, HIDDEN1)
    wv, bv = linear(ks[3], HIDDEN1, HIDDEN1)
    wo, bo = linear(ks[4], HIDDEN1, HIDDEN1)
    w2, b2 = linear(ks[5], HIDDEN1 * TOKENS, HIDDEN2)
    w3, b3 = linear(ks[6], HIDDEN2, HIDDEN3)
    w4, b4 = linear(ks[7], HIDDEN3, NUM_CLASSES)
    return dict(
        pe=make_positional_encoding(TOKENS, EMBED),
        w1=w1, b1=b1, wq=wq, bq=bq, wk=wk, bk=bk, wv=wv, bv=bv,
        wo=wo, bo=bo, w2=w2, b2=b2, w3=w3, b3=b3, w4=w4, b4=b4,
    )


def reference_forward(x, mask, params):
    """Straightforward jnp implementation of AttentionNetwork.forward (eval mode)."""
    h = x + params["pe"]
    h = h @ params["w1"] + params["b1"]
    q = h @ params["wq"] + params["bq"]
    k = h @ params["wk"] + params["bk"]
    v = h @ params["wv"] + params["bv"]
    B, T, _ = h.shape

    def split(z):
        return z.reshape(B, T, HEADS, HEAD_DIM).transpose(0, 2, 1, 3)

    qh, kh, vh = split(q), split(k), split(v)
    scores = jnp.einsum("bhqd,bhkd->bhqk", qh, kh) / math.sqrt(HEAD_DIM)
    scores = scores + jnp.where(mask > 0.5, NEG, 0.0)[:, None, None, :]
    attn = jax.nn.softmax(scores, axis=-1)
    o = jnp.einsum("bhqk,bhkd->bhqd", attn, vh)
    o = o.transpose(0, 2, 1, 3).reshape(B, T, HIDDEN1)
    o = o @ params["wo"] + params["bo"]
    f2 = jax.nn.relu(o.reshape(B, T * HIDDEN1) @ params["w2"] + params["b2"])
    f3 = jax.nn.relu(f2 @ params["w3"] + params["b3"])
    return f3 @ params["w4"] + params["b4"]


if __name__ == "__main__":
    BATCH = 128   # module default batch size; amortizes launch cost over the grid
    key = jax.random.PRNGKey(0)
    kx, kp = jax.random.split(key)

    x = jax.random.normal(kx, (BATCH, TOKENS, EMBED), dtype=jnp.float32)
    # key_padding_mask: variable amount of trailing padding per sequence
    lengths = 4 + (jnp.arange(BATCH) % 5)                          # in [4, 8]
    mask = (jnp.arange(TOKENS)[None, :] >= lengths[:, None]).astype(jnp.float32)

    params = init_params(kp)
    out = jax.block_until_ready(attention_network_forward(x, mask, params))
    ref = jax.block_until_ready(reference_forward(x, mask, params))

    assert out.shape == (BATCH, NUM_CLASSES), out.shape
    assert bool(jnp.all(jnp.isfinite(out)))
    err = float(jnp.max(jnp.abs(out - ref)))
    assert err < 3e-2, f"kernel vs reference max|diff| = {err}"
    print("KERNEL_OK")
</pallas_src>

<mosaic_0001>
module attributes {stable_mosaic.version = 11 : i64} {
  func.func @attention_net_kernel(%arg0: i32, %arg1: memref<128x20xf32, #tpu.memory_space<vmem>>, %arg2: memref<8x128xf32, #tpu.memory_space<vmem>>, %arg3: memref<1392x128xf32, #tpu.memory_space<vmem>>, %arg4: memref<20x1024xf32, #tpu.memory_space<vmem>>, %arg5: memref<16x128xf32, #tpu.memory_space<vmem>>) attributes {dimension_semantics = [#tpu.dimension_semantics<parallel>], iteration_bounds = array<i64: 8>, scalar_prefetch = 0 : i64, scratch_operands = 0 : i64, tpu.core_type = #tpu.core_type<tc>, window_params = [{transform_indices = @transform_0, window_bounds = array<i64: 128, 20>}, {transform_indices = @transform_1, window_bounds = array<i64: 8, 128>}, {pipeline_mode = #tpu.pipeline_mode<synchronous>, transform_indices = @transform_2, window_bounds = array<i64: 1392, 128>}, {pipeline_mode = #tpu.pipeline_mode<synchronous>, transform_indices = @transform_3, window_bounds = array<i64: 20, 1024>}, {transform_indices = @transform_4, window_bounds = array<i64: 16, 128>}]} {
    %c0 = arith.constant 0 : index
    %c0_0 = arith.constant 0 : index
    %0 = vector.load %arg3[%c0, %c0_0] : memref<1392x128xf32, #tpu.memory_space<vmem>>, vector<20x20xf32>
    %c24 = arith.constant 24 : index
    %c0_1 = arith.constant 0 : index
    %1 = vector.load %arg3[%c24, %c0_1] : memref<1392x128xf32, #tpu.memory_space<vmem>>, vector<20x20xf32>
    %c48 = arith.constant 48 : index
    %c0_2 = arith.constant 0 : index
    %2 = vector.load %arg3[%c48, %c0_2] : memref<1392x128xf32, #tpu.memory_space<vmem>>, vector<20x20xf32>
    %c72 = arith.constant 72 : index
    %c0_3 = arith.constant 0 : index
    %3 = vector.load %arg3[%c72, %c0_3] : memref<1392x128xf32, #tpu.memory_space<vmem>>, vector<20x20xf32>
    %c96 = arith.constant 96 : index
    %c0_4 = arith.constant 0 : index
    %4 = vector.load %arg3[%c96, %c0_4] : memref<1392x128xf32, #tpu.memory_space<vmem>>, vector<60x20xf32>
    %c160 = arith.constant 160 : index
    %c0_5 = arith.constant 0 : index
    %5 = vector.load %arg3[%c160, %c0_5] : memref<1392x128xf32, #tpu.memory_space<vmem>>, vector<20x128xf32>
    %c184 = arith.constant 184 : index
    %c0_6 = arith.constant 0 : index
    %6 = vector.load %arg3[%c184, %c0_6] : memref<1392x128xf32, #tpu.memory_space<vmem>>, vector<1x20xf32>
    %c192 = arith.constant 192 : index
    %c0_7 = arith.constant 0 : index
    %7 = vector.load %arg3[%c192, %c0_7] : memref<1392x128xf32, #tpu.memory_space<vmem>>, vector<1x20xf32>
    %c200 = arith.constant 200 : index
    %c0_8 = arith.constant 0 : index
    %8 = vector.load %arg3[%c200, %c0_8] : memref<1392x128xf32, #tpu.memory_space<vmem>>, vector<1x20xf32>
    %c208 = arith.constant 208 : index
    %c0_9 = arith.constant 0 : index
    %9 = vector.load %arg3[%c208, %c0_9] : memref<1392x128xf32, #tpu.memory_space<vmem>>, vector<1x20xf32>
    %c216 = arith.constant 216 : index
    %c0_10 = arith.constant 0 : index
    %10 = vector.load %arg3[%c216, %c0_10] : memref<1392x128xf32, #tpu.memory_space<vmem>>, vector<1x60xf32>
    %c224 = arith.constant 224 : index
    %c0_11 = arith.constant 0 : index
    %11 = vector.load %arg3[%c224, %c0_11] : memref<1392x128xf32, #tpu.memory_space<vmem>>, vector<1x20xf32>
    %c232 = arith.constant 232 : index
    %c0_12 = arith.constant 0 : index
    %12 = vector.load %arg3[%c232, %c0_12] : memref<1392x128xf32, #tpu.memory_space<vmem>>, vector<1x128xf32>
    %c240 = arith.constant 240 : index
    %c0_13 = arith.constant 0 : index
    %13 = vector.load %arg3[%c240, %c0_13] : memref<1392x128xf32, #tpu.memory_space<vmem>>, vector<128x20xf32>
    %c368 = arith.constant 368 : index
    %c0_14 = arith.constant 0 : index
    %14 = vector.load %arg3[%c368, %c0_14] : memref<1392x128xf32, #tpu.memory_space<vmem>>, vector<512x20xf32>
    %c880 = arith.constant 880 : index
    %c0_15 = arith.constant 0 : index
    %15 = vector.load %arg3[%c880, %c0_15] : memref<1392x128xf32, #tpu.memory_space<vmem>>, vector<512x128xf32>
    %c0_16 = arith.constant 0 : index
    %c0_17 = arith.constant 0 : index
    %16 = vector.load %arg1[%c0_16, %c0_17] : memref<128x20xf32, #tpu.memory_space<vmem>>, vector<128x20xf32>
    %17 = arith.addf %16, %13 : vector<128x20xf32>
    %cst = arith.constant dense<0.000000e+00> : vector<128x20xf32>
    %18 = tpu.matmul %17, %0, %cst {dimension_numbers = #tpu.dot_dimension_numbers<[1], [0], [0], [1], [0, 0, 1, 1], [], []>} : vector<128x20xf32>, vector<20x20xf32>, vector<128x20xf32> -> vector<128x20xf32>
    %19 = vector.broadcast %6 : vector<1x20xf32> to vector<128x20xf32>
    %20 = arith.addf %18, %19 : vector<128x20xf32>
    %cst_18 = arith.constant dense<0.000000e+00> : vector<128x20xf32>
    %21 = tpu.matmul %20, %1, %cst_18 {dimension_numbers = #tpu.dot_dimension_numbers<[1], [0], [0], [1], [0, 0, 1, 1], [], []>} : vector<128x20xf32>, vector<20x20xf32>, vector<128x20xf32> -> vector<128x20xf32>
    %22 = vector.broadcast %7 : vector<1x20xf32> to vector<128x20xf32>
    %23 = arith.addf %21, %22 : vector<128x20xf32>
    %cst_19 = arith.constant dense<0.000000e+00> : vector<128x20xf32>
    %24 = tpu.matmul %20, %2, %cst_19 {dimension_numbers = #tpu.dot_dimension_numbers<[1], [0], [0], [1], [0, 0, 1, 1], [], []>} : vector<128x20xf32>, vector<20x20xf32>, vector<128x20xf32> -> vector<128x20xf32>
    %25 = vector.broadcast %8 : vector<1x20xf32> to vector<128x20xf32>
    %26 = arith.addf %24, %25 : vector<128x20xf32>
    %cst_20 = arith.constant dense<0.000000e+00> : vector<128x20xf32>
    %27 = tpu.matmul %20, %3, %cst_20 {dimension_numbers = #tpu.dot_dimension_numbers<[1], [0], [0], [1], [0, 0, 1, 1], [], []>} : vector<128x20xf32>, vector<20x20xf32>, vector<128x20xf32> -> vector<128x20xf32>
    %28 = vector.broadcast %9 : vector<1x20xf32> to vector<128x20xf32>
    %29 = arith.addf %27, %28 : vector<128x20xf32>
    %30 = tpu.concatenate %23, %23, %23, %23 in 0 : vector<128x20xf32>, vector<128x20xf32>, vector<128x20xf32>, vector<128x20xf32> -> vector<512x20xf32>
    %31 = arith.mulf %30, %14 : vector<512x20xf32>
    %cst_21 = arith.constant dense<0.000000e+00> : vector<512x128xf32>
    %32 = tpu.matmul %31, %26, %cst_21 {dimension_numbers = #tpu.dot_dimension_numbers<[1], [1], [0], [0], [0, 0, 1, 0], [], []>} : vector<512x20xf32>, vector<128x20xf32>, vector<512x128xf32> -> vector<512x128xf32>
    %33 = arith.addf %32, %15 : vector<512x128xf32>
    %c0_22 = arith.constant 0 : index
    %c0_23 = arith.constant 0 : index
    %34 = vector.load %arg2[%c0_22, %c0_23] : memref<8x128xf32, #tpu.memory_space<vmem>>, vector<1x128xf32>
    %35 = vector.broadcast %34 : vector<1x128xf32> to vector<512x128xf32>
    %36 = arith.addf %33, %35 : vector<512x128xf32>
    %cst_24 = arith.constant dense<0xFF800000> : vector<512xf32>
    %37 = vector.multi_reduction <maximumf>, %36, %cst_24 [1] : vector<512x128xf32> to vector<512xf32>
    %38 = vector.shape_cast %37 : vector<512xf32> to vector<512x1xf32>
    %39 = vector.broadcast %38 : vector<512x1xf32> to vector<512x128xf32>
    %40 = arith.subf %36, %39 : vector<512x128xf32>
    %41 = math.exp %40 : vector<512x128xf32>
    %cst_25 = arith.constant dense<0.000000e+00> : vector<512xf32>
    %42 = vector.multi_reduction <add>, %41, %cst_25 [1] : vector<512x128xf32> to vector<512xf32>
    %43 = vector.shape_cast %42 : vector<512xf32> to vector<512x1xf32>
    %44 = tpu.reciprocal %43 {approx = true} : vector<512x1xf32> -> vector<512x1xf32>
    %45 = vector.broadcast %44 : vector<512x1xf32> to vector<512x128xf32>
    %46 = arith.mulf %41, %45 : vector<512x128xf32>
    %cst_26 = arith.constant dense<0.000000e+00> : vector<512x20xf32>
    %47 = tpu.matmul %46, %29, %cst_26 {dimension_numbers = #tpu.dot_dimension_numbers<[1], [0], [0], [1], [0, 0, 1, 1], [], []>} : vector<512x128xf32>, vector<128x20xf32>, vector<512x20xf32> -> vector<512x20xf32>
    %48 = arith.mulf %47, %14 : vector<512x20xf32>
    %49 = vector.extract_strided_slice %48 {offsets = [0, 0], sizes = [128, 20], strides = [1, 1]} : vector<512x20xf32> to vector<128x20xf32>
    %50 = vector.extract_strided_slice %48 {offsets = [128, 0], sizes = [128, 20], strides = [1, 1]} : vector<512x20xf32> to vector<128x20xf32>
    %51 = arith.addf %49, %50 : vector<128x20xf32>
    %52 = vector.extract_strided_slice %48 {offsets = [256, 0], sizes = [128, 20], strides = [1, 1]} : vector<512x20xf32> to vector<128x20xf32>
    %53 = arith.addf %51, %52 : vector<128x20xf32>
    %54 = vector.extract_strided_slice %48 {offsets = [384, 0], sizes = [128, 20], strides = [1, 1]} : vector<512x20xf32> to vector<128x20xf32>
    %55 = arith.addf %53, %54 : vector<128x20xf32>
    %c0_27 = arith.constant 0 : index
    %c0_28 = arith.constant 0 : index
    %56 = vector.load %arg4[%c0_27, %c0_28] : memref<20x1024xf32, #tpu.memory_space<vmem>>, vector<20x1024xf32>
    %cst_29 = arith.constant dense<0.000000e+00> : vector<128x1024xf32>
    %57 = tpu.matmul %55, %56, %cst_29 {dimension_numbers = #tpu.dot_dimension_numbers<[1], [0], [0], [1], [0, 0, 1, 1], [], []>} : vector<128x20xf32>, vector<20x1024xf32>, vector<128x1024xf32> -> vector<128x1024xf32>
    %58 = vector.extract_strided_slice %57 {offsets = [0, 0], sizes = [16, 60], strides = [1, 1]} : vector<128x1024xf32> to vector<16x60xf32>
    %59 = vector.extract_strided_slice %57 {offsets = [16, 128], sizes = [16, 60], strides = [1, 1]} : vector<128x1024xf32> to vector<16x60xf32>
    %60 = arith.addf %58, %59 : vector<16x60xf32>
    %61 = vector.extract_strided_slice %57 {offsets = [32, 256], sizes = [16, 60], strides = [1, 1]} : vector<128x1024xf32> to vector<16x60xf32>
    %62 = arith.addf %60, %61 : vector<16x60xf32>
    %63 = vector.extract_strided_slice %57 {offsets = [48, 384], sizes = [16, 60], strides = [1, 1]} : vector<128x1024xf32> to vector<16x60xf32>
    %64 = arith.addf %62, %63 : vector<16x60xf32>
    %65 = vector.extract_strided_slice %57 {offsets = [64, 512], sizes = [16, 60], strides = [1, 1]} : vector<128x1024xf32> to vector<16x60xf32>
    %66 = arith.addf %64, %65 : vector<16x60xf32>
    %67 = vector.extract_strided_slice %57 {offsets = [80, 640], sizes = [16, 60], strides = [1, 1]} : vector<128x1024xf32> to vector<16x60xf32>
    %68 = arith.addf %66, %67 : vector<16x60xf32>
    %69 = vector.extract_strided_slice %57 {offsets = [96, 768], sizes = [16, 60], strides = [1, 1]} : vector<128x1024xf32> to vector<16x60xf32>
    %70 = arith.addf %68, %69 : vector<16x60xf32>
    %71 = vector.extract_strided_slice %57 {offsets = [112, 896], sizes = [16, 60], strides = [1, 1]} : vector<128x1024xf32> to vector<16x60xf32>
    %72 = arith.addf %70, %71 : vector<16x60xf32>
    %73 = vector.broadcast %10 : vector<1x60xf32> to vector<16x60xf32>
    %74 = arith.addf %72, %73 : vector<16x60xf32>
    %cst_30 = arith.constant 0.000000e+00 : f32
    %75 = vector.broadcast %cst_30 : f32 to vector<16x60xf32>
    %76 = arith.maximumf %74, %75 : vector<16x60xf32>
    %cst_31 = arith.constant dense<0.000000e+00> : vector<16x20xf32>
    %77 = tpu.matmul %76, %4, %cst_31 {dimension_numbers = #tpu.dot_dimension_numbers<[1], [0], [0], [1], [0, 0, 1, 1], [], []>} : vector<16x60xf32>, vector<60x20xf32>, vector<16x20xf32> -> vector<16x20xf32>
    %78 = vector.broadcast %11 : vector<1x20xf32> to vector<16x20xf32>
    %79 = arith.addf %77, %78 : vector<16x20xf32>
    %cst_32 = arith.constant 0.000000e+00 : f32
    %80 = vector.broadcast %cst_32 : f32 to vector<16x20xf32>
    %81 = arith.maximumf %79, %80 : vector<16x20xf32>
    %cst_33 = arith.constant dense<0.000000e+00> : vector<16x128xf32>
    %82 = tpu.matmul %81, %5, %cst_33 {dimension_numbers = #tpu.dot_dimension_numbers<[1], [0], [0], [1], [0, 0, 1, 1], [], []>} : vector<16x20xf32>, vector<20x128xf32>, vector<16x128xf32> -> vector<16x128xf32>
    %83 = vector.broadcast %12 : vector<1x128xf32> to vector<16x128xf32>
    %84 = arith.addf %82, %83 : vector<16x128xf32>
    %c0_34 = arith.constant 0 : index
    %c0_35 = arith.constant 0 : index
    %85 = vector.load %arg5[%c0_34, %c0_35] : memref<16x128xf32, #tpu.memory_space<vmem>>, vector<16x128xf32>
    tpu.vector_store %arg5[%c0_34, %c0_35], %84 {strides = array<i32>} : memref<16x128xf32, #tpu.memory_space<vmem>>, vector<16x128xf32>,
    return
  }
  func.func @transform_0(%arg0: i32) -> (i32, i32) {
    %c0_i32 = arith.constant 0 : i32
    %c0_i32_0 = arith.constant 0 : i32
    return %arg0, %c0_i32 : i32, i32
  }
  func.func @transform_1(%arg0: i32) -> (i32, i32) {
    %c0_i32 = arith.constant 0 : i32
    %c0_i32_0 = arith.constant 0 : i32
    return %arg0, %c0_i32 : i32, i32
  }
  func.func @transform_2(%arg0: i32) -> (i32, i32) {
    %c0_i32 = arith.constant 0 : i32
    %c0_i32_0 = arith.constant 0 : i32
    %c0_i32_1 = arith.constant 0 : i32
    return %c0_i32, %c0_i32_0 : i32, i32
  }
  func.func @transform_3(%arg0: i32) -> (i32, i32) {
    %c0_i32 = arith.constant 0 : i32
    %c0_i32_0 = arith.constant 0 : i32
    %c0_i32_1 = arith.constant 0 : i32
    return %c0_i32, %c0_i32_0 : i32, i32
  }
  func.func @transform_4(%arg0: i32) -> (i32, i32) {
    %c0_i32 = arith.constant 0 : i32
    %c0_i32_0 = arith.constant 0 : i32
    return %arg0, %c0_i32 : i32, i32
  }
}

</mosaic_0001>

<bundles_post_ra>
// kernel: attention_network_forward.1
= control target key start
LH: loop header
LB: loop body
LE: loop exit
PB: predicated region body
PF: predicated region fallthrough
CT: control target
= control target key end

     0   :  { %s5264_s15 = smov 0   ;;  %s7398_s0 = inlined_call_operand.vmem [shape: f32[1024,20], index: 0, kind: input, shape index: {}]   ;;  %s7399_s1 = inlined_call_operand.vmem [shape: f32[64,128], index: 1, kind: input, shape index: {}]   ;;  %s7400_s2 = inlined_call_operand.vmem [shape: f32[1392,128], index: 2, kind: input, shape index: {}]   ;;  %s7401_s3 = inlined_call_operand.vmem [shape: f32[20,1024], index: 3, kind: input, shape index: {}]   ;;  %s7402_s4 = inlined_call_operand.vmem [shape: f32[128,128], index: 4, kind: output, shape index: {}]  }
   0x1 LB: > { %s5270_s16 = sadd.s32 4294967295, %s5235_s15   ;;  %p3864_p0 = scmp.ge.s32.totalorder %s5235_s15, 1  ;;  %s5235_s15 = sphi %s5264_s15, %s14_s15  }
   0x2   : > { %p172_p1 = scmp.lt.s32.totalorder %s5235_s15, 9 }
   0x4   : > { %p173_p2 = pnand %p3864_p0, %p172_p1 }
   0x6   : > { %176 = sbr.rel (%p173_p2) target bundleno = 2211 (0x8a3), region = 36 }
   0xd   : > { %v218_v0 = vld [vmem:[%s7400_s2] sm:$0xff]  ;;  %v219_v1 = vld [vmem:[%s7400_s2 + $0x8] sm:$0xff]  ;;  %s3865_s21 = sshll.u32 %s5270_s16, 4  ;;  %v220_v3 = vld [vmem:[%s7400_s2 + $0x10] sm:$0xf]  ;;  %vm477_vm0 = vcmask 1043456  }
   0xe   : > { %v4761_v2 = vpack.c.bf16 %v219_v1, %v218_v0  ;;  %p203_p3 = scmp.lt.s32.totalorder %s3865_s21, 127  ;;  %v248_v4 = vld [vmem:[%s7400_s2 + $0xf0] sm:$0xff]  ;;  %v249_v5 = vld [vmem:[%s7400_s2 + $0xf8] sm:$0xff]  ;;  %v250_v6 = vld [vmem:[%s7400_s2 + $0x100] sm:$0xff]  ;;  %vm428_vm1 = vcmask 162816   ;;  %p208_p4 = scmp.lt.s32.totalorder %s5270_s16, 7 }
   0xf   : > { %v251_v7 = vld [vmem:[%s7400_s2 + $0x108] sm:$0xff]  ;;  %v224_v8 = vld [vmem:[%s7400_s2 + $0x30] sm:$0xff]  ;;  %v225_v9 = vld [vmem:[%s7400_s2 + $0x38] sm:$0xff]  ;;  %vm5238_vm3 = vmmov 1   ;;  %vm3615_vm5 = vcmask 490496   ;;  %s3868_s22 = sshll.u32 %s5270_s16, 1 }
  0x10   : > { %4762 = vmatprep.subr.bf16.mxu0 %v4761_v2  ;;  %s7499_s21 = smov (!%p203_p3, %s3865_s21), 127  ;;  %4895 = vmatprep.subr.bf16.mxu1 %v4761_v2  ;;  %v4769_v13 = vpack.c.bf16 %v225_v9, %v224_v8  ;;  %v252_v18 = vld [vmem:[%s7400_s2 + $0x110] sm:$0xff]  ;;  %v261_v21 = vld [vmem:[%s7400_s2 + $0x158] sm:$0xff]  ;;  %v262_v22 = vld [vmem:[%s7400_s2 + $0x160] sm:$0xff]  ;;  %p213_p5 = scmp.lt.s32.totalorder %s3868_s22, 15 }
  0x11   : > { %4764 = vmatpush3.bf16.msra.mxu0 %v4761_v2  ;;  %4897 = vmatpush3.bf16.msra.mxu1 %v4761_v2  ;;  %s3866_s24 = sshll.u32 %s7499_s21, 3  ;;  %v260_v20 = vld [vmem:[%s7400_s2 + $0x150] sm:$0xff]  ;;  %v253_v23 = vld [vmem:[%s7400_s2 + $0x118] sm:$0xff]  ;;  %v263_v25 = vld [vmem:[%s7400_s2 + $0x168] sm:$0xff] }
  0x12   : > { %4361 = vmatprep.subr.msk.mxu0 %vm477_vm0, %v220_v3  ;;  %4896 = vmatprep.subr.msk.mxu1 %vm477_vm0, %v220_v3  ;;  %s5298_s7 = scalar_lea.vmem %s7398_s0, %s3866_s24  ;;  %v226_v35 = vld [vmem:[%s7400_s2 + $0x40] sm:$0xf]  ;;  %v221_v36 = vld [vmem:[%s7400_s2 + $0x18] sm:$0xff]  ;;  %v255_v44 = vld [vmem:[%s7400_s2 + $0x128] sm:$0xff]  ;;  %s7501_s22 = smov (!%p213_p5, %s3868_s22), 15 }
  0x13   : > { %v392_v10 = vld [vmem:[%s5298_s7] sm:$0xff]  ;;  %v393_v11 = vld [vmem:[%s5298_s7 + $0x8] sm:$0xff]  ;;  %v394_v12 = vld [vmem:[%s5298_s7 + $0x10] sm:$0xff]  ;;  %s209_s23 = scalar_select %p208_p4, %s5270_s16, 7 }
  0x14   : > { %v408_v14 = vadd.f32 %v392_v10, %v248_v4  ;;  %v409_v15 = vadd.f32 %v393_v11, %v249_v5  ;;  %v410_v16 = vadd.f32 %v394_v12, %v250_v6  ;;  %v395_v17 = vld [vmem:[%s5298_s7 + $0x18] sm:$0xff]  ;;  %v396_v19 = vld [vmem:[%s5298_s7 + $0x20] sm:$0xff]  ;;  %v397_v24 = vld [vmem:[%s5298_s7 + $0x28] sm:$0xff] }
  0x15   : > { %4362 = vmatpush3.msk.msra.mxu0 %vm477_vm0, %v220_v3  ;;  %4898 = vmatpush3.msk.msra.mxu1 %vm477_vm0, %v220_v3  ;;  %v411_v26 = vadd.f32 %v395_v17, %v251_v7  ;;  %v412_v27 = vadd.f32 %v396_v19, %v252_v18  ;;  %v404_v28 = vld [vmem:[%s5298_s7 + $0x60] sm:$0xff]  ;;  %v405_v29 = vld [vmem:[%s5298_s7 + $0x68] sm:$0xff]  ;;  %v406_v30 = vld [vmem:[%s5298_s7 + $0x70] sm:$0xff]  ;;  %v413_v41 = vadd.f32 %v397_v24, %v253_v23  ;;  %s3867_s24 = sshll.u32 %s209_s23, 3  ;;  %s3869_s23 = sshll.u32 %s7501_s22, 3 }
  0x16   : > { %4770 = vmatprep.subr.bf16.mxu0 %v4769_v13  ;;  %4363 = vmatprep.mubr.msk.f32.mxu0 %vm428_vm1, %v408_v14  ;;  %v420_v31 = vadd.f32 %v404_v28, %v260_v20  ;;  %v421_v32 = vadd.f32 %v405_v29, %v261_v21  ;;  %v422_v33 = vadd.f32 %v406_v30, %v262_v22  ;;  %v407_v34 = vld [vmem:[%s5298_s7 + $0x78] sm:$0xff]  ;;  %v254_v37 = vld [vmem:[%s7400_s2 + $0x120] sm:$0xff]  ;;  %v398_v38 = vld [vmem:[%s5298_s7 + $0x30] sm:$0xff]  ;;  %s216_s27 = scalar_lea.vmem %s7402_s4, %s3869_s23 }
  0x17   : > { %4364 = vmatmul.mubr.msk.f32.vlgmr.msra.gmra.mrb[0].mxu0 %vm428_vm1, %v409_v15  ;;  %v222_v39 = vld [vmem:[%s7400_s2 + $0x20] sm:$0xff]  ;;  %v423_v42 = vadd.f32 %v407_v34, %v263_v25  ;;  %v414_v43 = vadd.f32 %v398_v38, %v254_v37  ;;  %v399_v45 = vld [vmem:[%s5298_s7 + $0x38] sm:$0xff]  ;;  %v256_v46 = vld [vmem:[%s7400_s2 + $0x130] sm:$0xff] }
  0x18   : > { %4366 = vmatprep.mubr.msk.f32.mxu0 %vm428_vm1, %v410_v16  ;;  %4772 = vmatpush3.bf16.msra.mxu0 %v4769_v13  ;;  %v4765_v40 = vpack.c.bf16 %v222_v39, %v221_v36  ;;  %v400_v47 = vld [vmem:[%s5298_s7 + $0x40] sm:$0xff]  ;;  %v415_v48 = vadd.f32 %v399_v45, %v255_v44  ;;  %v257_v50 = vld [vmem:[%s7400_s2 + $0x138] sm:$0xff]  ;;  %v401_v51 = vld [vmem:[%s5298_s7 + $0x48] sm:$0xff] }
  0x19   : > { %4421 = vmatprep.subr.msk.mxu0 %vm477_vm0, %v226_v35  ;;  %4381 = vmatprep.mubr.msk.f32.mxu1 %vm428_vm1, %v420_v31  ;;  %v416_v49 = vadd.f32 %v400_v47, %v256_v46  ;;  %v258_v52 = vld [vmem:[%s7400_s2 + $0x140] sm:$0xff]  ;;  %v402_v53 = vld [vmem:[%s5298_s7 + $0x50] sm:$0xff]  ;;  %v417_v54 = vadd.f32 %v401_v51, %v257_v50  ;;  %v259_v56 = vld [vmem:[%s7400_s2 + $0x148] sm:$0xff] }
  0x1a   : > { %4382 = vmatmul.mubr.msk.f32.vlgmr.msra.gmra.mrb[0].mxu1 %vm428_vm1, %v421_v32  ;;  %4766 = vmatprep.subr.bf16.mxu1 %v4765_v40  ;;  %v418_v55 = vadd.f32 %v402_v53, %v258_v52  ;;  %v403_v57 = vld [vmem:[%s5298_s7 + $0x58] sm:$0xff]  ;;  %v223_v59 = vld [vmem:[%s7400_s2 + $0x28] sm:$0xf]  ;;  %v228_v61 = vld [vmem:[%s7400_s2 + $0x50] sm:$0xff]  ;;  %s211_s7 = scalar_lea.vmem %s7399_s1, %s3867_s24 }
  0x1b   : > { %4367 = vmatmul.mubr.msk.f32.gmra.mrb[2].mxu0 %vm428_vm1, %v411_v26  ;;  %4384 = vmatprep.mubr.msk.f32.mxu1 %vm428_vm1, %v422_v33  ;;  %v419_v58 = vadd.f32 %v403_v57, %v259_v56  ;;  %v227_v60 = vld [vmem:[%s7400_s2 + $0x48] sm:$0xff]  ;;  %v3870_v63 = vld [vmem:[%s7400_s2 + $0xb8] ss:$0 sm:$0xff]  ;;  %v5470_v33 = vld [vmem:[%s7400_s2 + $0xc0] ss:$0 sm:$0xff] }
  0x1c   : > { %4369 = vmatprep.mubr.msk.f32.mxu0 %vm428_vm1, %v412_v27  ;;  %4422 = vmatpush3.msk.msra.mxu0 %vm477_vm0, %v226_v35  ;;  %v4773_v62 = vpack.c.bf16 %v228_v61, %v227_v60  ;;  %v229_v6 = vld [vmem:[%s7400_s2 + $0x58] sm:$0xf]  ;;  %v5475_v34 = vld [vmem:[%s7400_s2 + $0xc8] ss:$0 sm:$0xff]  ;;  %vm5490_vm2 = vmpackc.low %vm428_vm1, %vm428_vm1 }
  0x1d   : > { %4768 = vmatpush3.bf16.msra.mxu1 %v4765_v40  ;;  %v267_v44 = vld [vmem:[%s7400_s2 + $0x188] sm:$0xff]  ;;  %vm4886_vm4 = vmpackc.low %vm477_vm0, %vm5238_vm3 }
  0x1e   : > { %4385 = vmatmul.mubr.msk.f32.gmra.mrb[2].mxu1 %vm428_vm1, %v423_v42  ;;  %4391 = vmatprep.subr.msk.mxu1 %vm477_vm0, %v223_v59 }
  0x1f   : > { %4370 = vmatmul.mubr.msk.f32.gmra.mrb[4].mxu0 %vm428_vm1, %v413_v41  ;;  %v264_v41 = vld [vmem:[%s7400_s2 + $0x170] sm:$0xff] }
  0x20   : > { %4372 = vmatprep.mubr.msk.f32.mxu0 %vm428_vm1, %v414_v43 }
  0x21   : > { %4392 = vmatpush3.msk.msra.mxu1 %vm477_vm0, %v223_v59 }
  0x22   : > { %4774 = vmatprep.subr.bf16.mxu1 %v4773_v62 }
  0x23   : > { %4373 = vmatmul.mubr.msk.f32.gmra.mrb[6].mxu0 %vm428_vm1, %v415_v48 }
  0x24   : > { %4375 = vmatprep.mubr.msk.f32.mxu0 %vm428_vm1, %v416_v49 }
  0x27   : > { %4376 = vmatmul.mubr.msk.f32.gmra.mrb[8].mxu0 %vm428_vm1, %v417_v54 }
  0x28   : > { %4378 = vmatprep.mubr.msk.f32.mxu0 %vm428_vm1, %v418_v55 }
  0x2b   : > { %4379 = vmatmul.mubr.msk.f32.gmra.mrb[10].mxu0 %vm428_vm1, %v419_v58 }
  0xea   : > { %v4365_v0 = vpop.f32.mrb[0].mxu0 }
  0xeb   : > { %v547_v1 = vpop.f32.mrb[1].mxu0  ;;  %v5406_v3 = vadd.f32 %v4365_v0, %v3870_v63 }
  0xec   : > { %v5404_v2 = vadd.f32 %v3870_v63, %v547_v1 }
  0xed   : > { %v4383_v5 = vpop.f32.mrb[0].mxu1 }
  0xee   : > { %v4368_v4 = vpop.f32.mrb[2].mxu0  ;;  %4393 = vmatprep.mubr.msk.f32.mxu1 %vm428_vm1, %v5404_v2  ;;  %4423 = vmatprep.mubr.msk.f32.mxu0 %vm428_vm1, %v5404_v2  ;;  %v607_v9 = vpop.f32.mrb[1].mxu1  ;;  %v613_v30 = vadd.f32 %v4383_v5, %v3870_v63 }
  0xef   : > { %v563_v7 = vadd.f32 %v4368_v4, %v3870_v63  ;;  %v557_v8 = vpop.f32.mrb[3].mxu0  ;;  %4394 = vmatmul.mubr.msk.f32.vlgmr.msra.gmra.mrb[4].mxu1 %vm428_vm1, %v5406_v3  ;;  %4424 = vmatmul.mubr.msk.f32.vlgmr.msra.gmra.mrb[12].mxu0 %vm428_vm1, %v5406_v3  ;;  %v608_v29 = vadd.f32 %v3870_v63, %v607_v9 }
  0xf0   : > { %v558_v10 = vadd.f32 %v3870_v63, %v557_v8  ;;  %4776 = vmatpush3.bf16.msra.mxu1 %v4773_v62 }
  0xf1   : > { %4451 = vmatprep.subr.msk.mxu1 %vm477_vm0, %v229_v6  ;;  %v4386_v12 = vpop.f32.mrb[2].mxu1 }
  0xf2   : > { %v4371_v11 = vpop.f32.mrb[4].mxu0  ;;  %4396 = vmatprep.mubr.msk.f32.mxu1 %vm428_vm1, %v558_v10  ;;  %4426 = vmatprep.mubr.msk.f32.mxu0 %vm428_vm1, %v558_v10  ;;  %v617_v15 = vpop.f32.mrb[3].mxu1  ;;  %v623_v32 = vadd.f32 %v4386_v12, %v3870_v63 }
  0xf3   : > { %v573_v13 = vadd.f32 %v4371_v11, %v3870_v63  ;;  %v567_v14 = vpop.f32.mrb[5].mxu0  ;;  %4397 = vmatmul.mubr.msk.f32.gmra.mrb[6].mxu1 %vm428_vm1, %v563_v7  ;;  %4427 = vmatmul.mubr.msk.f32.gmra.mrb[14].mxu0 %vm428_vm1, %v563_v7  ;;  %v618_v31 = vadd.f32 %v3870_v63, %v617_v15 }
  0xf4   : > { %v568_v16 = vadd.f32 %v3870_v63, %v567_v14  ;;  %4452 = vmatpush3.msk.msra.mxu1 %vm477_vm0, %v229_v6 }
  0xf6   : > { %v4374_v17 = vpop.f32.mrb[6].mxu0  ;;  %4399 = vmatprep.mubr.msk.f32.mxu1 %vm428_vm1, %v568_v16  ;;  %4429 = vmatprep.mubr.msk.f32.mxu0 %vm428_vm1, %v568_v16 }
  0xf7   : > { %v583_v18 = vadd.f32 %v4374_v17, %v3870_v63  ;;  %v577_v19 = vpop.f32.mrb[7].mxu0  ;;  %4400 = vmatmul.mubr.msk.f32.gmra.mrb[8].mxu1 %vm428_vm1, %v573_v13  ;;  %4430 = vmatmul.mubr.msk.f32.gmra.mrb[16].mxu0 %vm428_vm1, %v573_v13 }
  0xf8   : > { %v578_v20 = vadd.f32 %v3870_v63, %v577_v19 }
  0xfa   : > { %v4377_v21 = vpop.f32.mrb[8].mxu0  ;;  %4402 = vmatprep.mubr.msk.f32.mxu1 %vm428_vm1, %v578_v20  ;;  %4432 = vmatprep.mubr.msk.f32.mxu0 %vm428_vm1, %v578_v20 }
  0xfb   : > { %v593_v22 = vadd.f32 %v4377_v21, %v3870_v63  ;;  %v587_v23 = vpop.f32.mrb[9].mxu0  ;;  %4403 = vmatmul.mubr.msk.f32.gmra.mrb[10].mxu1 %vm428_vm1, %v583_v18  ;;  %4433 = vmatmul.mubr.msk.f32.gmra.mrb[18].mxu0 %vm428_vm1, %v583_v18 }
  0xfc   : > { %v588_v24 = vadd.f32 %v3870_v63, %v587_v23 }
  0xfe   : > { %v4380_v25 = vpop.f32.mrb[10].mxu0  ;;  %4405 = vmatprep.mubr.msk.f32.mxu1 %vm428_vm1, %v588_v24  ;;  %4435 = vmatprep.mubr.msk.f32.mxu0 %vm428_vm1, %v588_v24 }
  0xff   : > { %v603_v26 = vadd.f32 %v4380_v25, %v3870_v63  ;;  %v597_v27 = vpop.f32.mrb[11].mxu0  ;;  %4406 = vmatmul.mubr.msk.f32.gmra.mrb[12].mxu1 %vm428_vm1, %v593_v22  ;;  %4436 = vmatmul.mubr.msk.f32.gmra.mrb[20].mxu0 %vm428_vm1, %v593_v22 }
 0x100   : > { %v598_v28 = vadd.f32 %v3870_v63, %v597_v27 }
 0x102   : > { %4408 = vmatprep.mubr.msk.f32.mxu1 %vm428_vm1, %v598_v28  ;;  %4438 = vmatprep.mubr.msk.f32.mxu0 %vm428_vm1, %v598_v28 }
 0x103   : > { %4409 = vmatmul.mubr.msk.f32.gmra.mrb[14].mxu1 %vm428_vm1, %v603_v26  ;;  %4439 = vmatmul.mubr.msk.f32.gmra.mrb[22].mxu0 %vm428_vm1, %v603_v26 }
 0x104   : > { %4411 = vmatprep.mubr.msk.f32.mxu1 %vm428_vm1, %v608_v29  ;;  %4441 = vmatprep.mubr.msk.f32.mxu0 %vm428_vm1, %v608_v29 }
 0x107   : > { %4412 = vmatmul.mubr.msk.f32.gmra.mrb[16].mxu1 %vm428_vm1, %v613_v30  ;;  %4442 = vmatmul.mubr.msk.f32.gmra.mrb[24].mxu0 %vm428_vm1, %v613_v30 }
 0x108   : > { %4414 = vmatprep.mubr.msk.f32.mxu1 %vm428_vm1, %v618_v31  ;;  %4444 = vmatprep.mubr.msk.f32.mxu0 %vm428_vm1, %v618_v31 }
 0x10b   : > { %4415 = vmatmul.mubr.msk.f32.gmra.mrb[18].mxu1 %vm428_vm1, %v623_v32  ;;  %4445 = vmatmul.mubr.msk.f32.gmra.mrb[26].mxu0 %vm428_vm1, %v623_v32 }
 0x10c   : > { %4453 = vmatprep.mubr.msk.f32.mxu1 %vm428_vm1, %v5404_v2 }
 0x10f   : > { %4454 = vmatmul.mubr.msk.f32.vlgmr.msra.gmra.mrb[20].mxu1 %vm428_vm1, %v5406_v3 }
 0x110   : > { %4456 = vmatprep.mubr.msk.f32.mxu1 %vm428_vm1, %v558_v10 }
 0x113   : > { %4457 = vmatmul.mubr.msk.f32.gmra.mrb[22].mxu1 %vm428_vm1, %v563_v7 }
 0x114   : > { %4459 = vmatprep.mubr.msk.f32.mxu1 %vm428_vm1, %v568_v16 }
 0x117   : > { %4460 = vmatmul.mubr.msk.f32.gmra.mrb[24].mxu1 %vm428_vm1, %v573_v13 }
 0x118   : > { %4462 = vmatprep.mubr.msk.f32.mxu1 %vm428_vm1, %v578_v20 }
 0x11b   : > { %4463 = vmatmul.mubr.msk.f32.gmra.mrb[26].mxu1 %vm428_vm1, %v583_v18 }
 0x11c   : > { %4465 = vmatprep.mubr.msk.f32.mxu1 %vm428_vm1, %v588_v24 }
 0x11f   : > { %4466 = vmatmul.mubr.msk.f32.gmra.mrb[28].mxu1 %vm428_vm1, %v593_v22 }
 0x120   : > { %4468 = vmatprep.mubr.msk.f32.mxu1 %vm428_vm1, %v598_v28 }
 0x123   : > { %4469 = vmatmul.mubr.msk.f32.gmra.mrb[30].mxu1 %vm428_vm1, %v603_v26 }
 0x124   : > { %4471 = vmatprep.mubr.msk.f32.mxu1 %vm428_vm1, %v608_v29 }
 0x127   : > { %4472 = vmatmul.mubr.msk.f32.gmra.mrb[32].mxu1 %vm428_vm1, %v613_v30 }
 0x128   : > { %4474 = vmatprep.mubr.msk.f32.mxu1 %vm428_vm1, %v618_v31 }
 0x12b   : > { %4475 = vmatmul.mubr.msk.f32.gmra.mrb[34].mxu1 %vm428_vm1, %v623_v32 }
 0x1c2   : > { %v4395_v35 = vpop.f32.mrb[4].mxu1  ;;  %v4425_v36 = vpop.f32.mrb[12].mxu0 }
 0x1c3   : > { %v5478_v37 = vadd.f32 %v4395_v35, %v5470_v33  ;;  %v905_v38 = vadd.f32 %v4425_v36, %v5475_v34  ;;  %v747_v39 = vpop.f32.mrb[5].mxu1  ;;  %v899_v40 = vpop.f32.mrb[13].mxu0 }
 0x1c4   : > { %v5485_v42 = vadd.f32 %v5470_v33, %v747_v39  ;;  %v900_v43 = vadd.f32 %v5475_v34, %v899_v40 }
 0x1c6   : > { %v4777_v45 = vpack.c.bf16 %v905_v38, %v900_v43  ;;  %v4398_v46 = vpop.f32.mrb[6].mxu1  ;;  %v4428_v47 = vpop.f32.mrb[14].mxu0  ;;  %v1130_v48 = vmul.f32 %v5485_v42, %v264_v41 }
 0x1c7   : > { %v5496_v49 = vadd.f32 %v4398_v46, %v5470_v33  ;;  %v915_v50 = vadd.f32 %v4428_v47, %v5475_v34  ;;  %v757_v51 = vpop.f32.mrb[7].mxu1  ;;  %v909_v52 = vpop.f32.mrb[15].mxu0 }
 0x1c8   : > { %v5500_v53 = vadd.f32 %v5470_v33, %v757_v51  ;;  %v910_v54 = vadd.f32 %v5475_v34, %v909_v52  ;;  %4779 = vmatprep.subr.msk.bf16.mxu0 %vm5490_vm2, %v4777_v45  ;;  %4509 = vmatprep.mubr.msk.f32.mxu0 %vm428_vm1, %v1130_v48 }
 0x1c9   : > { %4782 = vmatpush3.bf16.xpose.msk.msra.mxu0 %vm5490_vm2, %v4777_v45 }
 0x1ca   : > { %v4783_v55 = vpack.c.bf16 %v915_v50, %v910_v54  ;;  %v4401_v56 = vpop.f32.mrb[8].mxu1  ;;  %v4431_v57 = vpop.f32.mrb[16].mxu0  ;;  %v3924_v50 = vld [vmem:[%s7400_s2 + $0xd0] ss:$0 sm:$0xff] }
 0x1cb   : > { %v5509_v58 = vadd.f32 %v4401_v56, %v5470_v33  ;;  %v925_v59 = vadd.f32 %v4431_v57, %v5475_v34  ;;  %v767_v60 = vpop.f32.mrb[9].mxu1  ;;  %v919_v61 = vpop.f32.mrb[17].mxu0 }
 0x1cc   : > { %4785 = vmatprep.subr.msk.bf16.mxu0 %vm5490_vm2, %v4783_v55  ;;  %v5515_v62 = vadd.f32 %v5470_v33, %v767_v60  ;;  %v920_v63 = vadd.f32 %v5475_v34, %v919_v61 }
 0x1ce   : > { %v4789_v0 = vpack.c.bf16 %v925_v59, %v920_v63  ;;  %v4404_v1 = vpop.f32.mrb[10].mxu1  ;;  %v4434_v2 = vpop.f32.mrb[18].mxu0 }
 0x1cf   : > { %v5519_v3 = vadd.f32 %v4404_v1, %v5470_v33  ;;  %v935_v4 = vadd.f32 %v4434_v2, %v5475_v34  ;;  %v777_v5 = vpop.f32.mrb[11].mxu1  ;;  %v929_v6 = vpop.f32.mrb[19].mxu0 }
 0x1d0   : > { %v5523_v7 = vadd.f32 %v5470_v33, %v777_v5  ;;  %v930_v8 = vadd.f32 %v5475_v34, %v929_v6 }
 0x1d1   : > { %4788 = vmatpush3.bf16.xpose.msk.msra.mxu0 %vm5490_vm2, %v4783_v55 }
 0x1d2   : > { %4791 = vmatprep.subr.msk.bf16.mxu0 %vm5490_vm2, %v4789_v0  ;;  %v4795_v9 = vpack.c.bf16 %v935_v4, %v930_v8  ;;  %v4407_v10 = vpop.f32.mrb[12].mxu1  ;;  %v4437_v11 = vpop.f32.mrb[20].mxu0 }
 0x1d3   : > { %v5531_v12 = vadd.f32 %v4407_v10, %v5470_v33  ;;  %v787_v13 = vpop.f32.mrb[13].mxu1  ;;  %v945_v14 = vadd.f32 %v4437_v11, %v5475_v34  ;;  %v939_v15 = vpop.f32.mrb[21].mxu0 }
 0x1d4   : > { %v5535_v16 = vadd.f32 %v5470_v33, %v787_v13  ;;  %v940_v17 = vadd.f32 %v5475_v34, %v939_v15 }
 0x1d6   : > { %v4410_v18 = vpop.f32.mrb[14].mxu1  ;;  %v4801_v19 = vpack.c.bf16 %v945_v14, %v940_v17  ;;  %v4440_v20 = vpop.f32.mrb[22].mxu0 }
 0x1d7   : > { %v5539_v21 = vadd.f32 %v4410_v18, %v5470_v33  ;;  %v797_v22 = vpop.f32.mrb[15].mxu1  ;;  %v955_v23 = vadd.f32 %v4440_v20, %v5475_v34  ;;  %v949_v24 = vpop.f32.mrb[23].mxu0 }
 0x1d8   : > { %v5543_v25 = vadd.f32 %v5470_v33, %v797_v22  ;;  %v950_v26 = vadd.f32 %v5475_v34, %v949_v24 }
 0x1d9   : > { %4794 = vmatpush3.bf16.xpose.msk.msra.mxu0 %vm5490_vm2, %v4789_v0 }
 0x1da   : > { %4797 = vmatprep.subr.msk.bf16.mxu0 %vm5490_vm2, %v4795_v9  ;;  %v4413_v27 = vpop.f32.mrb[16].mxu1  ;;  %v4807_v28 = vpack.c.bf16 %v955_v23, %v950_v26  ;;  %v4443_v29 = vpop.f32.mrb[24].mxu0 }
 0x1db   : > { %v5551_v30 = vadd.f32 %v4413_v27, %v5470_v33  ;;  %v807_v31 = vpop.f32.mrb[17].mxu1  ;;  %v965_v32 = vadd.f32 %v4443_v29, %v5475_v34  ;;  %v959_v35 = vpop.f32.mrb[25].mxu0 }
 0x1dc   : > { %v5555_v36 = vadd.f32 %v5470_v33, %v807_v31  ;;  %v960_v38 = vadd.f32 %v5475_v34, %v959_v35 }
 0x1de   : > { %v4416_v39 = vpop.f32.mrb[18].mxu1  ;;  %v4813_v40 = vpack.c.bf16 %v965_v32, %v960_v38  ;;  %v4446_v41 = vpop.f32.mrb[26].mxu0 }
 0x1df   : > { %v5559_v43 = vadd.f32 %v4416_v39, %v5470_v33  ;;  %v817_v45 = vpop.f32.mrb[19].mxu1  ;;  %v975_v46 = vadd.f32 %v4446_v41, %v5475_v34  ;;  %v969_v47 = vpop.f32.mrb[27].mxu0  ;;  %v265_v41 = vld [vmem:[%s7400_s2 + $0x178] sm:$0xff] }
 0x1e0   : > { %v5563_v48 = vadd.f32 %v5470_v33, %v817_v45  ;;  %v970_v51 = vadd.f32 %v5475_v34, %v969_v47  ;;  %v266_v45 = vld [vmem:[%s7400_s2 + $0x180] sm:$0xff] }
 0x1e1   : > { %4800 = vmatpush3.bf16.xpose.msk.msra.mxu0 %vm5490_vm2, %v4795_v9  ;;  %v1132_v47 = vmul.f32 %v5500_v53, %v266_v45  ;;  %v290_v45 = vld [vmem:[%s7400_s2 + $0x240] sm:$0xff] }
 0x1e2   : > { %v4455_v52 = vpop.f32.mrb[20].mxu1  ;;  %4803 = vmatprep.subr.msk.bf16.mxu0 %vm5490_vm2, %v4801_v19  ;;  %v4819_v54 = vpack.c.bf16 %v975_v46, %v970_v51  ;;  %v1131_v46 = vmul.f32 %v5478_v37, %v265_v41  ;;  %v1133_v51 = vmul.f32 %v5496_v49, %v267_v44  ;;  %v289_v41 = vld [vmem:[%s7400_s2 + $0x238] sm:$0xff]  ;;  %v291_v44 = vld [vmem:[%s7400_s2 + $0x248] sm:$0xff] }
 0x1e3   : > { %v1057_v55 = vadd.f32 %v4455_v52, %v3924_v50  ;;  %v1051_v56 = vpop.f32.mrb[21].mxu1 }
 0x1e4   : > { %v1052_v57 = vadd.f32 %v3924_v50, %v1051_v56 }
 0x1e6   : > { %v4825_v59 = vpack.c.bf16 %v1057_v55, %v1052_v57  ;;  %v4458_v33 = vpop.f32.mrb[22].mxu1  ;;  %v270_v55 = vld [vmem:[%s7400_s2 + $0x1a0] sm:$0xff] }
 0x1e7   : > { %v1067_v60 = vadd.f32 %v4458_v33, %v3924_v50  ;;  %v1061_v61 = vpop.f32.mrb[23].mxu1  ;;  %v1136_v57 = vmul.f32 %v5523_v7, %v270_v55  ;;  %v272_v33 = vld [vmem:[%s7400_s2 + $0x1b0] sm:$0xff]  ;;  %v294_v55 = vld [vmem:[%s7400_s2 + $0x260] sm:$0xff] }
 0x1e8   : > { %v1062_v63 = vadd.f32 %v3924_v50, %v1061_v61  ;;  %4826 = vmatprep.subr.bf16.mxu1 %v4825_v59  ;;  %v1138_v61 = vmul.f32 %v5535_v16, %v272_v33  ;;  %v296_v33 = vld [vmem:[%s7400_s2 + $0x270] sm:$0xff] }
 0x1e9   : > { %4806 = vmatpush3.bf16.xpose.msk.msra.mxu0 %vm5490_vm2, %v4801_v19  ;;  %4828 = vmatpush3.bf16.msra.mxu1 %v4825_v59  ;;  %v271_v59 = vld [vmem:[%s7400_s2 + $0x1a8] sm:$0xff] }
 0x1ea   : > { %v4829_v34 = vpack.c.bf16 %v1067_v60, %v1062_v63  ;;  %v4461_v0 = vpop.f32.mrb[24].mxu1  ;;  %4809 = vmatprep.subr.msk.bf16.mxu0 %vm5490_vm2, %v4807_v28  ;;  %v1137_v60 = vmul.f32 %v5519_v3, %v271_v59  ;;  %v273_v63 = vld [vmem:[%s7400_s2 + $0x1b8] sm:$0xff]  ;;  %v295_v59 = vld [vmem:[%s7400_s2 + $0x268] sm:$0xff] }
 0x1eb   : > { %v1077_v1 = vadd.f32 %v4461_v0, %v3924_v50  ;;  %v1071_v2 = vpop.f32.mrb[25].mxu1  ;;  %v1139_v0 = vmul.f32 %v5531_v12, %v273_v63  ;;  %v297_v63 = vld [vmem:[%s7400_s2 + $0x278] sm:$0xff] }
 0x1ec   : > { %v1072_v4 = vadd.f32 %v3924_v50, %v1071_v2  ;;  %4830 = vmatprep.subr.bf16.mxu1 %v4829_v34  ;;  %v275_v2 = vld [vmem:[%s7400_s2 + $0x1c8] sm:$0xff] }
 0x1ed   : > { %4832 = vmatpush3.bf16.msra.mxu1 %v4829_v34  ;;  %v274_v34 = vld [vmem:[%s7400_s2 + $0x1c0] sm:$0xff] }
 0x1ee   : > { %v4833_v5 = vpack.c.bf16 %v1077_v1, %v1072_v4  ;;  %v4464_v6 = vpop.f32.mrb[26].mxu1  ;;  %v1140_v1 = vmul.f32 %v5543_v25, %v274_v34  ;;  %v276_v4 = vld [vmem:[%s7400_s2 + $0x1d0] sm:$0xff]  ;;  %v298_v34 = vld [vmem:[%s7400_s2 + $0x280] sm:$0xff] }
 0x1ef   : > { %v1087_v8 = vadd.f32 %v4464_v6, %v3924_v50  ;;  %v1081_v9 = vpop.f32.mrb[27].mxu1  ;;  %v1142_v6 = vmul.f32 %v5555_v36, %v276_v4  ;;  %v300_v4 = vld [vmem:[%s7400_s2 + $0x290] sm:$0xff] }
 0x1f0   : > { %v1082_v10 = vadd.f32 %v3924_v50, %v1081_v9  ;;  %4834 = vmatprep.subr.bf16.mxu1 %v4833_v5  ;;  %v278_v9 = vld [vmem:[%s7400_s2 + $0x1e0] sm:$0xff] }
 0x1f1   : > { %4812 = vmatpush3.bf16.xpose.msk.msra.mxu0 %vm5490_vm2, %v4807_v28  ;;  %4836 = vmatpush3.bf16.msra.mxu1 %v4833_v5  ;;  %v1141_v5 = vmul.f32 %v5539_v21, %v275_v2  ;;  %v299_v2 = vld [vmem:[%s7400_s2 + $0x288] sm:$0xff] }
 0x1f2   : > { %v4837_v11 = vpack.c.bf16 %v1087_v8, %v1082_v10  ;;  %v4467_v13 = vpop.f32.mrb[28].mxu1  ;;  %4815 = vmatprep.subr.msk.bf16.mxu0 %vm5490_vm2, %v4813_v40  ;;  %v277_v8 = vld [vmem:[%s7400_s2 + $0x1d8] sm:$0xff] }
 0x1f3   : > { %v1097_v14 = vadd.f32 %v4467_v13, %v3924_v50  ;;  %v1091_v15 = vpop.f32.mrb[29].mxu1  ;;  %v1143_v10 = vmul.f32 %v5551_v30, %v277_v8  ;;  %v279_v13 = vld [vmem:[%s7400_s2 + $0x1e8] sm:$0xff]  ;;  %v301_v8 = vld [vmem:[%s7400_s2 + $0x298] sm:$0xff] }
 0x1f4   : > { %v1092_v17 = vadd.f32 %v3924_v50, %v1091_v15  ;;  %4838 = vmatprep.subr.bf16.mxu1 %v4837_v11  ;;  %v1145_v15 = vmul.f32 %v5559_v43, %v279_v13  ;;  %v303_v13 = vld [vmem:[%s7400_s2 + $0x2a8] sm:$0xff] }
 0x1f5   : > { %4840 = vmatpush3.bf16.msra.mxu1 %v4837_v11  ;;  %v1144_v11 = vmul.f32 %v5563_v48, %v278_v9  ;;  %v302_v9 = vld [vmem:[%s7400_s2 + $0x2a0] sm:$0xff] }
 0x1f6   : > { %v4841_v18 = vpack.c.bf16 %v1097_v14, %v1092_v17  ;;  %v4470_v19 = vpop.f32.mrb[30].mxu1  ;;  %v280_v14 = vld [vmem:[%s7400_s2 + $0x1f0] sm:$0xff] }
 0x1f7   : > { %v1107_v20 = vadd.f32 %v4470_v19, %v3924_v50  ;;  %v1101_v22 = vpop.f32.mrb[31].mxu1  ;;  %v1146_v17 = vmul.f32 %v5485_v42, %v280_v14  ;;  %v282_v19 = vld [vmem:[%s7400_s2 + $0x200] sm:$0xff]  ;;  %v304_v14 = vld [vmem:[%s7400_s2 + $0x2b0] sm:$0xff] }
 0x1f8   : > { %v1102_v23 = vadd.f32 %v3924_v50, %v1101_v22  ;;  %4842 = vmatprep.subr.bf16.mxu1 %v4841_v18  ;;  %v1148_v22 = vmul.f32 %v5500_v53, %v282_v19  ;;  %v306_v19 = vld [vmem:[%s7400_s2 + $0x2c0] sm:$0xff] }
 0x1f9   : > { %4818 = vmatpush3.bf16.xpose.msk.msra.mxu0 %vm5490_vm2, %v4813_v40  ;;  %4844 = vmatpush3.bf16.msra.mxu1 %v4841_v18  ;;  %v281_v18 = vld [vmem:[%s7400_s2 + $0x1f8] sm:$0xff] }
 0x1fa   : > { %v4845_v24 = vpack.c.bf16 %v1107_v20, %v1102_v23  ;;  %v4473_v26 = vpop.f32.mrb[32].mxu1  ;;  %4821 = vmatprep.subr.msk.bf16.mxu0 %vm5490_vm2, %v4819_v54  ;;  %v1147_v20 = vmul.f32 %v5478_v37, %v281_v18  ;;  %v283_v23 = vld [vmem:[%s7400_s2 + $0x208] sm:$0xff]  ;;  %v305_v18 = vld [vmem:[%s7400_s2 + $0x2b8] sm:$0xff] }
 0x1fb   : > { %v1117_v27 = vadd.f32 %v4473_v26, %v3924_v50  ;;  %v1111_v28 = vpop.f32.mrb[33].mxu1  ;;  %v1149_v26 = vmul.f32 %v5496_v49, %v283_v23  ;;  %v307_v23 = vld [vmem:[%s7400_s2 + $0x2c8] sm:$0xff] }
 0x1fc   : > { %v1112_v29 = vadd.f32 %v3924_v50, %v1111_v28  ;;  %4846 = vmatprep.subr.bf16.mxu1 %v4845_v24  ;;  %v285_v28 = vld [vmem:[%s7400_s2 + $0x218] sm:$0xff] }
 0x1fd   : > { %4848 = vmatpush3.bf16.msra.mxu1 %v4845_v24  ;;  %v284_v24 = vld [vmem:[%s7400_s2 + $0x210] sm:$0xff] }
 0x1fe   : > { %v4849_v31 = vpack.c.bf16 %v1117_v27, %v1112_v29  ;;  %v4476_v32 = vpop.f32.mrb[34].mxu1  ;;  %v1150_v27 = vmul.f32 %v5515_v62, %v284_v24  ;;  %v286_v29 = vld [vmem:[%s7400_s2 + $0x220] sm:$0xff]  ;;  %v308_v24 = vld [vmem:[%s7400_s2 + $0x2d0] sm:$0xff] }
 0x1ff   : > { %v1127_v35 = vadd.f32 %v4476_v32, %v3924_v50  ;;  %v1121_v38 = vpop.f32.mrb[35].mxu1  ;;  %v1152_v32 = vmul.f32 %v5523_v7, %v286_v29  ;;  %v310_v29 = vld [vmem:[%s7400_s2 + $0x2e0] sm:$0xff] }
 0x200   : > { %v1122_v39 = vadd.f32 %v3924_v50, %v1121_v38  ;;  %4850 = vmatprep.subr.bf16.mxu1 %v4849_v31  ;;  %v268_v50 = vld [vmem:[%s7400_s2 + $0x190] sm:$0xff] }
 0x201   : > { %4824 = vmatpush3.bf16.xpose.msk.msra.mxu0 %vm5490_vm2, %v4819_v54  ;;  %4852 = vmatpush3.bf16.msra.mxu1 %v4849_v31  ;;  %v1134_v52 = vmul.f32 %v5515_v62, %v268_v50  ;;  %v269_v54 = vld [vmem:[%s7400_s2 + $0x198] sm:$0xff]  ;;  %v1151_v31 = vmul.f32 %v5509_v58, %v285_v28  ;;  %v288_v38 = vld [vmem:[%s7400_s2 + $0x230] sm:$0xff] }
 0x202   : > { %v4853_v40 = vpack.c.bf16 %v1127_v35, %v1122_v39  ;;  %v1135_v56 = vmul.f32 %v5509_v58, %v269_v54  ;;  %v287_v35 = vld [vmem:[%s7400_s2 + $0x228] sm:$0xff]  ;;  %v292_v50 = vld [vmem:[%s7400_s2 + $0x250] sm:$0xff]  ;;  %v293_v54 = vld [vmem:[%s7400_s2 + $0x258] sm:$0xff] }
 0x203   : > { %v1153_v39 = vmul.f32 %v5519_v3, %v287_v35  ;;  %v309_v28 = vld [vmem:[%s7400_s2 + $0x2d8] sm:$0xff]  ;;  %v311_v35 = vld [vmem:[%s7400_s2 + $0x2e8] sm:$0xff] }
 0x204   : > { %4854 = vmatprep.subr.bf16.mxu1 %v4853_v40 }
 0x205   : > { %4856 = vmatpush3.bf16.msra.mxu1 %v4853_v40  ;;  %v1154_v40 = vmul.f32 %v5535_v16, %v288_v38  ;;  %v312_v38 = vld [vmem:[%s7400_s2 + $0x2f0] sm:$0xff] }
 0x208   : > { %4510 = vmatmul.mubr.msk.f32.vlgmr.msra.gmra.mrb[28].mxu0 %vm428_vm1, %v1131_v46  ;;  %v1155_v46 = vmul.f32 %v5531_v12, %v289_v41  ;;  %v313_v41 = vld [vmem:[%s7400_s2 + $0x2f8] sm:$0xff] }
 0x209   : > { %4512 = vmatprep.mubr.msk.f32.mxu0 %vm428_vm1, %v1132_v47  ;;  %v1156_v47 = vmul.f32 %v5543_v25, %v290_v45  ;;  %v314_v45 = vld [vmem:[%s7400_s2 + $0x300] sm:$0xff] }
 0x20c   : > { %4513 = vmatmul.mubr.msk.f32.gmra.mrb[30].mxu0 %vm428_vm1, %v1133_v51  ;;  %v1157_v51 = vmul.f32 %v5539_v21, %v291_v44  ;;  %v316_v44 = vld [vmem:[%s7400_s2 + $0x310] sm:$0xff] }
 0x20d   : > { %4515 = vmatprep.mubr.msk.f32.mxu0 %vm428_vm1, %v1134_v52  ;;  %v1158_v52 = vmul.f32 %v5555_v36, %v292_v50 }
 0x210   : > { %4516 = vmatmul.mubr.msk.f32.gmra.mrb[32].mxu0 %vm428_vm1, %v1135_v56  ;;  %v1159_v56 = vmul.f32 %v5551_v30, %v293_v54 }
 0x211   : > { %4518 = vmatprep.mubr.msk.f32.mxu0 %vm428_vm1, %v1136_v57  ;;  %v1160_v57 = vmul.f32 %v5563_v48, %v294_v55 }
 0x214   : > { %4519 = vmatmul.mubr.msk.f32.gmra.mrb[34].mxu0 %vm428_vm1, %v1137_v60  ;;  %v1161_v60 = vmul.f32 %v5559_v43, %v295_v59 }
 0x215   : > { %4521 = vmatprep.mubr.msk.f32.mxu0 %vm428_vm1, %v1138_v61  ;;  %v1162_v61 = vmul.f32 %v5485_v42, %v296_v33 }
 0x218   : > { %4522 = vmatmul.mubr.msk.f32.gmra.mrb[36].mxu0 %vm428_vm1, %v1139_v0  ;;  %v1163_v0 = vmul.f32 %v5478_v37, %v297_v63 }
 0x219   : > { %4524 = vmatprep.mubr.msk.f32.mxu0 %vm428_vm1, %v1140_v1  ;;  %v1164_v1 = vmul.f32 %v5500_v53, %v298_v34  ;;  %v328_v34 = vld [vmem:[%s7400_s2 + $0x370] sm:$0xff] }
 0x21c   : > { %4525 = vmatmul.mubr.msk.f32.gmra.mrb[38].mxu0 %vm428_vm1, %v1141_v5  ;;  %v1165_v5 = vmul.f32 %v5496_v49, %v299_v2  ;;  %v331_v2 = vld [vmem:[%s7400_s2 + $0x388] sm:$0xff] }
 0x21d   : > { %4527 = vmatprep.mubr.msk.f32.mxu0 %vm428_vm1, %v1142_v6  ;;  %v1166_v6 = vmul.f32 %v5515_v62, %v300_v4 }
 0x220   : > { %4528 = vmatmul.mubr.msk.f32.gmra.mrb[40].mxu0 %vm428_vm1, %v1143_v10  ;;  %v1167_v10 = vmul.f32 %v5509_v58, %v301_v8  ;;  %v330_v8 = vld [vmem:[%s7400_s2 + $0x380] sm:$0xff] }
 0x221   : > { %4530 = vmatprep.mubr.msk.f32.mxu0 %vm428_vm1, %v1144_v11  ;;  %v1168_v11 = vmul.f32 %v5523_v7, %v302_v9 }
 0x224   : > { %4531 = vmatmul.mubr.msk.f32.gmra.mrb[42].mxu0 %vm428_vm1, %v1145_v15  ;;  %v1169_v15 = vmul.f32 %v5519_v3, %v303_v13 }
 0x225   : > { %4533 = vmatprep.mubr.msk.f32.mxu0 %vm428_vm1, %v1146_v17  ;;  %v1170_v17 = vmul.f32 %v5535_v16, %v304_v14  ;;  %v332_v14 = vld [vmem:[%s7400_s2 + $0x390] sm:$0xff] }
 0x228   : > { %4534 = vmatmul.mubr.msk.f32.gmra.mrb[44].mxu0 %vm428_vm1, %v1147_v20  ;;  %v1171_v20 = vmul.f32 %v5531_v12, %v305_v18 }
 0x229   : > { %4536 = vmatprep.mubr.msk.f32.mxu0 %vm428_vm1, %v1148_v22  ;;  %v1172_v22 = vmul.f32 %v5543_v25, %v306_v19 }
 0x22c   : > { %4537 = vmatmul.mubr.msk.f32.gmra.mrb[46].mxu0 %vm428_vm1, %v1149_v26  ;;  %v1173_v26 = vmul.f32 %v5539_v21, %v307_v23  ;;  %v334_v23 = vld [vmem:[%s7400_s2 + $0x3a0] sm:$0xff] }
 0x22d   : > { %4539 = vmatprep.mubr.msk.f32.mxu0 %vm428_vm1, %v1150_v27  ;;  %v1174_v27 = vmul.f32 %v5555_v36, %v308_v24 }
 0x230   : > { %4540 = vmatmul.mubr.msk.f32.gmra.mrb[48].mxu0 %vm428_vm1, %v1151_v31  ;;  %v1175_v31 = vmul.f32 %v5551_v30, %v309_v28 }
 0x231   : > { %4542 = vmatprep.mubr.msk.f32.mxu0 %vm428_vm1, %v1152_v32  ;;  %v1176_v32 = vmul.f32 %v5563_v48, %v310_v29 }
 0x234   : > { %4543 = vmatmul.mubr.msk.f32.gmra.mrb[50].mxu0 %vm428_vm1, %v1153_v39  ;;  %v1177_v39 = vmul.f32 %v5559_v43, %v311_v35  ;;  %v336_v35 = vld [vmem:[%s7400_s2 + $0x3b0] sm:$0xff] }
 0x235   : > { %4545 = vmatprep.mubr.msk.f32.mxu0 %vm428_vm1, %v1154_v40  ;;  %v1178_v40 = vmul.f32 %v5485_v42, %v312_v38  ;;  %v315_v42 = vld [vmem:[%s7400_s2 + $0x308] sm:$0xff] }
 0x236   : > { %v1181_v50 = vmul.f32 %v5496_v49, %v315_v42  ;;  %v319_v49 = vld [vmem:[%s7400_s2 + $0x328] sm:$0xff]  ;;  %v338_v42 = vld [vmem:[%s7400_s2 + $0x3c0] sm:$0xff] }
 0x237   : > { %v1185_v55 = vmul.f32 %v5519_v3, %v319_v49  ;;  %v323_v3 = vld [vmem:[%s7400_s2 + $0x348] sm:$0xff]  ;;  %v340_v49 = vld [vmem:[%s7400_s2 + $0x3d0] sm:$0xff] }
 0x238   : > { %4546 = vmatmul.mubr.msk.f32.gmra.mrb[52].mxu0 %vm428_vm1, %v1155_v46  ;;  %v1179_v46 = vmul.f32 %v5478_v37, %v313_v41  ;;  %v317_v37 = vld [vmem:[%s7400_s2 + $0x318] sm:$0xff]  ;;  %v1189_v33 = vmul.f32 %v5539_v21, %v323_v3  ;;  %v327_v21 = vld [vmem:[%s7400_s2 + $0x368] sm:$0xff]  ;;  %v342_v3 = vld [vmem:[%s7400_s2 + $0x3e0] sm:$0xff] }
 0x239   : > { %4548 = vmatprep.mubr.msk.f32.mxu0 %vm428_vm1, %v1156_v47  ;;  %v1180_v47 = vmul.f32 %v5500_v53, %v314_v45  ;;  %v318_v53 = vld [vmem:[%s7400_s2 + $0x320] sm:$0xff] }
 0x23a   : > { %v1184_v54 = vmul.f32 %v5523_v7, %v318_v53  ;;  %v322_v7 = vld [vmem:[%s7400_s2 + $0x340] sm:$0xff] }
 0x23b   : > { %v1188_v59 = vmul.f32 %v5543_v25, %v322_v7  ;;  %v325_v25 = vld [vmem:[%s7400_s2 + $0x358] sm:$0xff] }
 0x23c   : > { %4549 = vmatmul.mubr.msk.f32.gmra.mrb[54].mxu0 %vm428_vm1, %v1157_v51  ;;  %v1182_v51 = vmul.f32 %v5515_v62, %v316_v44  ;;  %v320_v62 = vld [vmem:[%s7400_s2 + $0x330] sm:$0xff] }
 0x23d   : > { %4551 = vmatprep.mubr.msk.f32.mxu0 %vm428_vm1, %v1158_v52  ;;  %v1183_v52 = vmul.f32 %v5509_v58, %v317_v37  ;;  %v321_v58 = vld [vmem:[%s7400_s2 + $0x338] sm:$0xff] }
 0x240   : > { %4552 = vmatmul.mubr.msk.f32.gmra.mrb[56].mxu0 %vm428_vm1, %v1159_v56  ;;  %v1186_v56 = vmul.f32 %v5535_v16, %v320_v62  ;;  %v324_v16 = vld [vmem:[%s7400_s2 + $0x350] sm:$0xff] }
 0x241   : > { %4554 = vmatprep.mubr.msk.f32.mxu0 %vm428_vm1, %v1160_v57  ;;  %v1187_v57 = vmul.f32 %v5531_v12, %v321_v58  ;;  %v1190_v12 = vmul.f32 %v5555_v36, %v324_v16  ;;  %v1193_v36 = vmul.f32 %v5559_v43, %v327_v21  ;;  %v344_v21 = vld [vmem:[%s7400_s2 + $0x3f0] sm:$0xff] }
 0x244   : > { %4555 = vmatmul.mubr.msk.f32.gmra.mrb[58].mxu0 %vm428_vm1, %v1161_v60  ;;  %v326_v60 = vld [vmem:[%s7400_s2 + $0x360] sm:$0xff] }
 0x245   : > { %4557 = vmatprep.mubr.msk.f32.mxu0 %vm428_vm1, %v1162_v61  ;;  %v1191_v61 = vmul.f32 %v5551_v30, %v325_v25  ;;  %v1192_v63 = vmul.f32 %v5563_v48, %v326_v60  ;;  %v329_v30 = vld [vmem:[%s7400_s2 + $0x378] sm:$0xff] }
 0x248   : > { %4558 = vmatmul.mubr.msk.f32.gmra.mrb[60].mxu0 %vm428_vm1, %v1163_v0  ;;  %v5913_v0 = vld [vmem:[%s211_s7] ss:$0 sm:$0xff] }
 0x249   : > { %4560 = vmatprep.mubr.msk.f32.mxu0 %vm428_vm1, %v1164_v1 }
 0x24c   : > { %4561 = vmatmul.mubr.msk.f32.gmra.mrb[62].mxu0 %vm428_vm1, %v1165_v5 }
 0x24d   : > { %4563 = vmatprep.mubr.msk.f32.mxu0 %vm428_vm1, %v1166_v6 }
 0x250   : > { %4564 = vmatmul.mubr.msk.f32.gmra.mrb[64].mxu0 %vm428_vm1, %v1167_v10 }
 0x251   : > { %4566 = vmatprep.mubr.msk.f32.mxu0 %vm428_vm1, %v1168_v11 }
 0x254   : > { %4567 = vmatmul.mubr.msk.f32.gmra.mrb[66].mxu0 %vm428_vm1, %v1169_v15 }
 0x255   : > { %4569 = vmatprep.mubr.msk.f32.mxu0 %vm428_vm1, %v1170_v17  ;;  %v333_v17 = vld [vmem:[%s7400_s2 + $0x398] sm:$0xff] }
 0x258   : > { %4570 = vmatmul.mubr.msk.f32.gmra.mrb[68].mxu0 %vm428_vm1, %v1171_v20 }
 0x259   : > { %4572 = vmatprep.mubr.msk.f32.mxu0 %vm428_vm1, %v1172_v22 }
 0x25c   : > { %4573 = vmatmul.mubr.msk.f32.gmra.mrb[70].mxu0 %vm428_vm1, %v1173_v26  ;;  %v335_v26 = vld [vmem:[%s7400_s2 + $0x3a8] sm:$0xff] }
 0x25d   : > { %4575 = vmatprep.mubr.msk.f32.mxu0 %vm428_vm1, %v1174_v27 }
 0x260   : > { %4576 = vmatmul.mubr.msk.f32.gmra.mrb[72].mxu0 %vm428_vm1, %v1175_v31 }
 0x261   : > { %4578 = vmatprep.mubr.msk.f32.mxu0 %vm428_vm1, %v1176_v32 }
 0x264   : > { %4579 = vmatmul.mubr.msk.f32.gmra.mrb[74].mxu0 %vm428_vm1, %v1177_v39  ;;  %v337_v39 = vld [vmem:[%s7400_s2 + $0x3b8] sm:$0xff] }
 0x265   : > { %4581 = vmatprep.mubr.msk.f32.mxu0 %vm428_vm1, %v1178_v40 }
 0x268   : > { %4582 = vmatmul.mubr.msk.f32.gmra.mrb[76].mxu0 %vm428_vm1, %v1179_v46 }
 0x269   : > { %4584 = vmatprep.mubr.msk.f32.mxu0 %vm428_vm1, %v1180_v47 }
 0x26c   : > { %4585 = vmatmul.mubr.msk.f32.gmra.mrb[78].mxu0 %vm428_vm1, %v1181_v50  ;;  %v339_v50 = vld [vmem:[%s7400_s2 + $0x3c8] sm:$0xff] }
 0x26d   : > { %4587 = vmatprep.mubr.msk.f32.mxu0 %vm428_vm1, %v1182_v51 }
 0x270   : > { %4588 = vmatmul.mubr.msk.f32.gmra.mrb[80].mxu0 %vm428_vm1, %v1183_v52 }
 0x271   : > { %4590 = vmatprep.mubr.msk.f32.mxu0 %vm428_vm1, %v1184_v54 }
 0x274   : > { %4591 = vmatmul.mubr.msk.f32.gmra.mrb[82].mxu0 %vm428_vm1, %v1185_v55  ;;  %v341_v55 = vld [vmem:[%s7400_s2 + $0x3d8] sm:$0xff] }
 0x275   : > { %4593 = vmatprep.mubr.msk.f32.mxu0 %vm428_vm1, %v1186_v56 }
 0x278   : > { %4594 = vmatmul.mubr.msk.f32.gmra.mrb[84].mxu0 %vm428_vm1, %v1187_v57 }
 0x279   : > { %4596 = vmatprep.mubr.msk.f32.mxu0 %vm428_vm1, %v1188_v59 }
 0x27c   : > { %4597 = vmatmul.mubr.msk.f32.gmra.mrb[86].mxu0 %vm428_vm1, %v1189_v33  ;;  %v343_v33 = vld [vmem:[%s7400_s2 + $0x3e8] sm:$0xff] }
 0x27d   : > { %4599 = vmatprep.mubr.msk.f32.mxu0 %vm428_vm1, %v1190_v12 }
 0x280   : > { %4600 = vmatmul.mubr.msk.f32.gmra.mrb[88].mxu0 %vm428_vm1, %v1191_v61 }
 0x281   : > { %4602 = vmatprep.mubr.msk.f32.mxu0 %vm428_vm1, %v1192_v63 }
 0x284   : > { %4603 = vmatmul.mubr.msk.f32.gmra.mrb[90].mxu0 %vm428_vm1, %v1193_v36 }
 0x2db   : > { %v4511_v48 = vpop.f32.mrb[28].mxu0 }
 0x2dc   : > { %v1506_v43 = vadd.f32 %v4511_v48, %v329_v30  ;;  %v1500_v1 = vpop.f32.mrb[29].mxu0  ;;  %v345_v30 = vld [vmem:[%s7400_s2 + $0x3f8] sm:$0xff] }
 0x2dd   : > { %v1501_v4 = vadd.f32 %v1500_v1, %v328_v34 }
 0x2de   : > { %v5919_v5 = vadd.f32 %v5913_v0, %v1506_v43 }
 0x2df   : > { %v4514_v6 = vpop.f32.mrb[30].mxu0  ;;  %v5932_v15 = vadd.f32 %v5913_v0, %v1501_v4  ;;  %v346_v4 = vld [vmem:[%s7400_s2 + $0x400] sm:$0xff] }
 0x2e0   : > { %v1516_v9 = vadd.f32 %v4514_v6, %v331_v2  ;;  %1890 = vmax.xlane.f32.xlu0 %v5919_v5  ;;  %v1510_v10 = vpop.f32.mrb[31].mxu0 }
 0x2e1   : > { %v1511_v11 = vadd.f32 %v1510_v10, %v330_v8  ;;  %v347_v8 = vld [vmem:[%s7400_s2 + $0x408] sm:$0xff] }
 0x2e2   : > { %v5926_v13 = vadd.f32 %v5913_v0, %v1516_v9 }
 0x2e3   : > { %v4517_v18 = vpop.f32.mrb[32].mxu0  ;;  %v5943_v24 = vadd.f32 %v5913_v0, %v1511_v11 }
 0x2e4   : > { %1894 = vmax.xlane.f32.xlu1 %v5926_v13  ;;  %v1520_v19 = vpop.f32.mrb[33].mxu0  ;;  %1888 = vmax.xlane.f32.xlu0 %v5932_v15  ;;  %v1526_v22 = vadd.f32 %v4517_v18, %v333_v17  ;;  %v348_v18 = vld [vmem:[%s7400_s2 + $0x410] sm:$0xff] }
 0x2e5   : > { %v1521_v20 = vadd.f32 %v1520_v19, %v332_v14 }
 0x2e6   : > { %v5957_v38 = vadd.f32 %v5913_v0, %v1526_v22 }
 0x2e7   : > { %v4520_v27 = vpop.f32.mrb[34].mxu0  ;;  %v5949_v28 = vadd.f32 %v5913_v0, %v1521_v20  ;;  %v349_v20 = vld [vmem:[%s7400_s2 + $0x418] sm:$0xff] }
 0x2e8   : > { %v1530_v29 = vpop.f32.mrb[35].mxu0  ;;  %1892 = vmax.xlane.f32.xlu1 %v5943_v24  ;;  %v1536_v32 = vadd.f32 %v4520_v27, %v335_v26 }
 0x2e9   : > { %v1531_v31 = vadd.f32 %v1530_v29, %v334_v23  ;;  %1896 = vmax.xlane.f32.xlu0 %v5949_v28 }
 0x2ea   : > { %v5971_v44 = vadd.f32 %v5913_v0, %v1536_v32 }
 0x2eb   : > { %v4523_v40 = vpop.f32.mrb[36].mxu0  ;;  %v5963_v41 = vadd.f32 %v5913_v0, %v1531_v31  ;;  %v350_v31 = vld [vmem:[%s7400_s2 + $0x420] sm:$0xff] }
 0x2ec   : > { %v1540_v45 = vpop.f32.mrb[37].mxu0  ;;  %1898 = vmax.xlane.f32.xlu1 %v5957_v38  ;;  %v1546_v47 = vadd.f32 %v4523_v40, %v337_v39 }
 0x2ed   : > { %v1541_v46 = vadd.f32 %v1540_v45, %v336_v35  ;;  %1900 = vmax.xlane.f32.xlu0 %v5963_v41  ;;  %v351_v35 = vld [vmem:[%s7400_s2 + $0x428] sm:$0xff] }
 0x2ee   : > { %v5985_v62 = vadd.f32 %v5913_v0, %v1546_v47 }
 0x2ef   : > { %v4526_v51 = vpop.f32.mrb[38].mxu0  ;;  %v5977_v37 = vadd.f32 %v5913_v0, %v1541_v46 }
 0x2f0   : > { %v1550_v53 = vpop.f32.mrb[39].mxu0  ;;  %1902 = vmax.xlane.f32.xlu1 %v5971_v44  ;;  %v1556_v54 = vadd.f32 %v4526_v51, %v339_v50  ;;  %v353_v51 = vld [vmem:[%s7400_s2 + $0x438] sm:$0xff] }
 0x2f1   : > { %v1551_v52 = vadd.f32 %v1550_v53, %v338_v42  ;;  %1904 = vmax.xlane.f32.xlu0 %v5977_v37  ;;  %v352_v42 = vld [vmem:[%s7400_s2 + $0x430] sm:$0xff] }
 0x2f2   : > { %v5999_v16 = vadd.f32 %v5913_v0, %v1556_v54 }
 0x2f3   : > { %v4529_v56 = vpop.f32.mrb[40].mxu0  ;;  %v5991_v58 = vadd.f32 %v5913_v0, %v1551_v52 }
 0x2f4   : > { %v1560_v7 = vpop.f32.mrb[41].mxu0  ;;  %1906 = vmax.xlane.f32.xlu1 %v5985_v62  ;;  %v1566_v59 = vadd.f32 %v4529_v56, %v341_v55  ;;  %v354_v56 = vld [vmem:[%s7400_s2 + $0x440] sm:$0xff] }
 0x2f5   : > { %v1561_v57 = vadd.f32 %v1560_v7, %v340_v49  ;;  %1908 = vmax.xlane.f32.xlu0 %v5991_v58 }
 0x2f6   : > { %v6013_v36 = vadd.f32 %v5913_v0, %v1566_v59 }
 0x2f7   : > { %v4532_v12 = vpop.f32.mrb[42].mxu0  ;;  %v6005_v25 = vadd.f32 %v5913_v0, %v1561_v57  ;;  %v355_v57 = vld [vmem:[%s7400_s2 + $0x448] sm:$0xff] }
 0x2f8   : > { %v1570_v60 = vpop.f32.mrb[43].mxu0  ;;  %1910 = vmax.xlane.f32.xlu1 %v5999_v16  ;;  %v1576_v63 = vadd.f32 %v4532_v12, %v343_v33 }
 0x2f9   : > { %v1571_v61 = vadd.f32 %v1570_v60, %v342_v3  ;;  %1912 = vmax.xlane.f32.xlu0 %v6005_v25 }
 0x2fa   : > { %v6027_v6 = vadd.f32 %v5913_v0, %v1576_v63 }
 0x2fb   : > { %v4535_v48 = vpop.f32.mrb[44].mxu0  ;;  %v6019_v34 = vadd.f32 %v5913_v0, %v1571_v61  ;;  %v356_v61 = vld [vmem:[%s7400_s2 + $0x450] sm:$0xff] }
 0x2fc   : > { %v1580_v43 = vpop.f32.mrb[45].mxu0  ;;  %1914 = vmax.xlane.f32.xlu1 %v6013_v36  ;;  %v1586_v2 = vadd.f32 %v4535_v48, %v345_v30 }
 0x2fd   : > { %v1581_v1 = vadd.f32 %v1580_v43, %v344_v21  ;;  %1916 = vmax.xlane.f32.xlu0 %v6019_v34  ;;  %v357_v21 = vld [vmem:[%s7400_s2 + $0x458] sm:$0xff] }
 0x2fe   : > { %v6041_v19 = vadd.f32 %v5913_v0, %v1586_v2 }
 0x2ff   : > { %v4538_v9 = vpop.f32.mrb[46].mxu0  ;;  %v6033_v10 = vadd.f32 %v5913_v0, %v1581_v1 }
 0x300   : > { %v1590_v11 = vpop.f32.mrb[47].mxu0  ;;  %1918 = vmax.xlane.f32.xlu1 %v6027_v6  ;;  %v1596_v17 = vadd.f32 %v4538_v9, %v347_v8  ;;  %v359_v9 = vld [vmem:[%s7400_s2 + $0x468] sm:$0xff] }
 0x301   : > { %v1591_v14 = vadd.f32 %v1590_v11, %v346_v4  ;;  %1920 = vmax.xlane.f32.xlu0 %v6033_v10  ;;  %v358_v4 = vld [vmem:[%s7400_s2 + $0x460] sm:$0xff] }
 0x302   : > { %v6055_v32 = vadd.f32 %v5913_v0, %v1596_v17 }
 0x303   : > { %v4541_v22 = vpop.f32.mrb[48].mxu0  ;;  %v6047_v23 = vadd.f32 %v5913_v0, %v1591_v14 }
 0x304   : > { %v1600_v26 = vpop.f32.mrb[49].mxu0  ;;  %1922 = vmax.xlane.f32.xlu1 %v6041_v19  ;;  %v1606_v29 = vadd.f32 %v4541_v22, %v349_v20  ;;  %v360_v22 = vld [vmem:[%s7400_s2 + $0x470] sm:$0xff] }
 0x305   : > { %v1601_v27 = vadd.f32 %v1600_v26, %v348_v18  ;;  %1924 = vmax.xlane.f32.xlu0 %v6047_v23 }
 0x306   : > { %v6069_v50 = vadd.f32 %v5913_v0, %v1606_v29 }
 0x307   : > { %v4544_v39 = vpop.f32.mrb[50].mxu0  ;;  %v6061_v40 = vadd.f32 %v5913_v0, %v1601_v27  ;;  %v361_v27 = vld [vmem:[%s7400_s2 + $0x478] sm:$0xff] }
 0x308   : > { %v1610_v45 = vpop.f32.mrb[51].mxu0  ;;  %1926 = vmax.xlane.f32.xlu1 %v6055_v32  ;;  %v1616_v47 = vadd.f32 %v4544_v39, %v351_v35 }
 0x309   : > { %v1611_v46 = vadd.f32 %v1610_v45, %v350_v31  ;;  %1928 = vmax.xlane.f32.xlu0 %v6061_v40 }
 0x30a   : > { %v6083_v7 = vadd.f32 %v5913_v0, %v1616_v47 }
 0x30b   : > { %v4547_v53 = vpop.f32.mrb[52].mxu0  ;;  %v6075_v52 = vadd.f32 %v5913_v0, %v1611_v46  ;;  %v362_v46 = vld [vmem:[%s7400_s2 + $0x480] sm:$0xff] }
 0x30c   : > { %v1620_v54 = vpop.f32.mrb[53].mxu0  ;;  %1930 = vmax.xlane.f32.xlu1 %v6069_v50  ;;  %v1626_v55 = vadd.f32 %v4547_v53, %v353_v51 }
 0x30d   : > { %v1621_v49 = vadd.f32 %v1620_v54, %v352_v42  ;;  %1932 = vmax.xlane.f32.xlu0 %v6075_v52  ;;  %v363_v42 = vld [vmem:[%s7400_s2 + $0x488] sm:$0xff] }
 0x30e   : > { %v6097_v63 = vadd.f32 %v5913_v0, %v1626_v55 }
 0x30f   : > { %v4550_v59 = vpop.f32.mrb[54].mxu0  ;;  %v6089_v3 = vadd.f32 %v5913_v0, %v1621_v49 }
 0x310   : > { %v1630_v33 = vpop.f32.mrb[55].mxu0  ;;  %1934 = vmax.xlane.f32.xlu1 %v6083_v7  ;;  %v1636_v60 = vadd.f32 %v4550_v59, %v355_v57  ;;  %v365_v59 = vld [vmem:[%s7400_s2 + $0x498] sm:$0xff] }
 0x311   : > { %v1631_v12 = vadd.f32 %v1630_v33, %v354_v56  ;;  %1936 = vmax.xlane.f32.xlu0 %v6089_v3  ;;  %v364_v56 = vld [vmem:[%s7400_s2 + $0x490] sm:$0xff] }
 0x312   : > { %v6111_v8 = vadd.f32 %v5913_v0, %v1636_v60 }
 0x313   : > { %v4553_v30 = vpop.f32.mrb[56].mxu0  ;;  %v6103_v48 = vadd.f32 %v5913_v0, %v1631_v12 }
 0x314   : > { %v1640_v43 = vpop.f32.mrb[57].mxu0  ;;  %1938 = vmax.xlane.f32.xlu1 %v6097_v63  ;;  %v1646_v2 = vadd.f32 %v4553_v30, %v357_v21  ;;  %v366_v30 = vld [vmem:[%s7400_s2 + $0x4a0] sm:$0xff] }
 0x315   : > { %v1641_v1 = vadd.f32 %v1640_v43, %v356_v61  ;;  %1940 = vmax.xlane.f32.xlu0 %v6103_v48 }
 0x316   : > { %v6125_v26 = vadd.f32 %v5913_v0, %v1646_v2 }
 0x317   : > { %v4556_v11 = vpop.f32.mrb[58].mxu0  ;;  %v6117_v14 = vadd.f32 %v5913_v0, %v1641_v1  ;;  %v367_v1 = vld [vmem:[%s7400_s2 + $0x4a8] sm:$0xff] }
 0x318   : > { %v1650_v17 = vpop.f32.mrb[59].mxu0  ;;  %1942 = vmax.xlane.f32.xlu1 %v6111_v8  ;;  %v1656_v20 = vadd.f32 %v4556_v11, %v359_v9 }
 0x319   : > { %v1651_v18 = vadd.f32 %v1650_v17, %v358_v4  ;;  %1944 = vmax.xlane.f32.xlu0 %v6117_v14 }
 0x31a   : > { %v6139_v47 = vadd.f32 %v5913_v0, %v1656_v20 }
 0x31b   : > { %v4559_v29 = vpop.f32.mrb[60].mxu0  ;;  %v6131_v31 = vadd.f32 %v5913_v0, %v1651_v18  ;;  %v368_v18 = vld [vmem:[%s7400_s2 + $0x4b0] sm:$0xff] }
 0x31c   : > { %v1660_v35 = vpop.f32.mrb[61].mxu0  ;;  %1946 = vmax.xlane.f32.xlu1 %v6125_v26  ;;  %v1666_v45 = vadd.f32 %v4559_v29, %v361_v27 }
 0x31d   : > { %v1661_v39 = vadd.f32 %v1660_v35, %v360_v22  ;;  %1948 = vmax.xlane.f32.xlu0 %v6131_v31  ;;  %v369_v22 = vld [vmem:[%s7400_s2 + $0x4b8] sm:$0xff] }
 0x31e   : > { %v6153_v57 = vadd.f32 %v5913_v0, %v1666_v45 }
 0x31f   : > { %v4562_v51 = vpop.f32.mrb[62].mxu0  ;;  %v6145_v53 = vadd.f32 %v5913_v0, %v1661_v39 }
 0x320   : > { %v1670_v54 = vpop.f32.mrb[63].mxu0  ;;  %1950 = vmax.xlane.f32.xlu1 %v6139_v47  ;;  %v1676_v55 = vadd.f32 %v4562_v51, %v363_v42  ;;  %v371_v51 = vld [vmem:[%s7400_s2 + $0x4c8] sm:$0xff] }
 0x321   : > { %v1671_v49 = vadd.f32 %v1670_v54, %v362_v46  ;;  %1952 = vmax.xlane.f32.xlu0 %v6145_v53  ;;  %v370_v46 = vld [vmem:[%s7400_s2 + $0x4c0] sm:$0xff] }
 0x322   : > { %v6167_v43 = vadd.f32 %v5913_v0, %v1676_v55 }
 0x323   : > { %v4565_v33 = vpop.f32.mrb[64].mxu0  ;;  %v6159_v12 = vadd.f32 %v5913_v0, %v1671_v49 }
 0x324   : > { %v1680_v60 = vpop.f32.mrb[65].mxu0  ;;  %1954 = vmax.xlane.f32.xlu1 %v6153_v57  ;;  %v1686_v21 = vadd.f32 %v4565_v33, %v365_v59 }
 0x325   : > { %7436 = vst [vmem:[#allocation2_spill] sm:$0xff] %v6159_v12  ;;  %v1681_v61 = vadd.f32 %v1680_v60, %v364_v56  ;;  %1956 = vmax.xlane.f32.xlu0 %v6159_v12  ;;  %v373_v60 = vld [vmem:[%s7400_s2 + $0x4d8] sm:$0xff] }
 0x326   : > { %v6181_v20 = vadd.f32 %v5913_v0, %v1686_v21 }
 0x327   : > { %v4568_v2 = vpop.f32.mrb[66].mxu0  ;;  %v6173_v4 = vadd.f32 %v5913_v0, %v1681_v61 }
 0x328   : > { %v1690_v9 = vpop.f32.mrb[67].mxu0  ;;  %1958 = vmax.xlane.f32.xlu1 %v6167_v43  ;;  %v1696_v17 = vadd.f32 %v4568_v2, %v367_v1 }
 0x329   : > { %7437 = vst [vmem:[#allocation3_spill] sm:$0xff] %v6173_v4  ;;  %v1691_v11 = vadd.f32 %v1690_v9, %v366_v30  ;;  %1960 = vmax.xlane.f32.xlu0 %v6173_v4  ;;  %v372_v9 = vld [vmem:[%s7400_s2 + $0x4d0] sm:$0xff] }
 0x32a   : > { %v6195_v42 = vadd.f32 %v5913_v0, %v1696_v17 }
 0x32b   : > { %v4571_v27 = vpop.f32.mrb[68].mxu0  ;;  %v6187_v29 = vadd.f32 %v5913_v0, %v1691_v11 }
 0x32c   : > { %v1700_v35 = vpop.f32.mrb[69].mxu0  ;;  %1962 = vmax.xlane.f32.xlu1 %v6181_v20  ;;  %v1706_v45 = vadd.f32 %v4571_v27, %v369_v22  ;;  %v375_v27 = vld [vmem:[%s7400_s2 + $0x4e8] sm:$0xff] }
 0x32d   : > { %7438 = vst [vmem:[#allocation4_spill] sm:$0xff] %v6187_v29  ;;  %v1701_v39 = vadd.f32 %v1700_v35, %v368_v18  ;;  %1964 = vmax.xlane.f32.xlu0 %v6187_v29 }
 0x32e   : > { %v6206_v33 = vadd.f32 %v5913_v0, %v1706_v45 }
 0x32f   : > { %v4574_v54 = vpop.f32.mrb[70].mxu0  ;;  %v6201_v49 = vadd.f32 %v5913_v0, %v1701_v39 }
 0x330   : > { %v1710_v55 = vpop.f32.mrb[71].mxu0  ;;  %1966 = vmax.xlane.f32.xlu1 %v6195_v42  ;;  %v1716_v59 = vadd.f32 %v4574_v54, %v371_v51  ;;  %v374_v51 = vld [vmem:[%s7400_s2 + $0x4e0] sm:$0xff] }
 0x331   : > { %7439 = vst [vmem:[#allocation5_spill] sm:$0xff] %v6201_v49  ;;  %v1711_v56 = vadd.f32 %v1710_v55, %v370_v46  ;;  %1968 = vmax.xlane.f32.xlu0 %v6201_v49 }
 0x332   : > { %v6217_v2 = vadd.f32 %v5913_v0, %v1716_v59 }
 0x333   : > { %v4577_v61 = vpop.f32.mrb[72].mxu0  ;;  %v6212_v21 = vadd.f32 %v5913_v0, %v1711_v56 }
 0x334   : > { %v1720_v30 = vpop.f32.mrb[73].mxu0  ;;  %1970 = vmax.xlane.f32.xlu1 %v6206_v33  ;;  %v1726_v1 = vadd.f32 %v4577_v61, %v373_v60  ;;  %v377_v60 = vld [vmem:[%s7400_s2 + $0x4f8] sm:$0xff] }
 0x335   : > { %7440 = vst [vmem:[#allocation6_spill] sm:$0xff] %v6212_v21  ;;  %1972 = vmax.xlane.f32.xlu0 %v6212_v21  ;;  %v1721_v18 = vadd.f32 %v1720_v30, %v372_v9 }
 0x336   : > { %v6224_v22 = vadd.f32 %v5913_v0, %v1726_v1 }
 0x337   : > { %v4580_v11 = vpop.f32.mrb[74].mxu0  ;;  %v6231_v46 = vadd.f32 %v5913_v0, %v1721_v18 }
 0x338   : > { %v1730_v17 = vpop.f32.mrb[75].mxu0  ;;  %1974 = vmax.xlane.f32.xlu1 %v6217_v2  ;;  %v1736_v45 = vadd.f32 %v4580_v11, %v375_v27  ;;  %v376_v11 = vld [vmem:[%s7400_s2 + $0x4f0] sm:$0xff] }
 0x339   : > { %7441 = vst [vmem:[#allocation7_spill] sm:$0xff] %v6231_v46  ;;  %v1731_v56 = vadd.f32 %v1730_v17, %v374_v51  ;;  %v379_v51 = vld [vmem:[%s7400_s2 + $0x508] sm:$0xff] }
 0x33a   : > { %v6238_v59 = vadd.f32 %v5913_v0, %v1736_v45 }
 0x33b   : > { %v4583_v35 = vpop.f32.mrb[76].mxu0  ;;  %v6245_v9 = vadd.f32 %v5913_v0, %v1731_v56 }
 0x33c   : > { %v1740_v39 = vpop.f32.mrb[77].mxu0  ;;  %1978 = vmax.xlane.f32.xlu1 %v6224_v22  ;;  %v1746_v1 = vadd.f32 %v4583_v35, %v377_v60 }
 0x33d   : > { %7442 = vst [vmem:[#allocation8_spill] sm:$0xff] %v6245_v9  ;;  %v1741_v27 = vadd.f32 %v1740_v39, %v376_v11  ;;  %v378_v39 = vld [vmem:[%s7400_s2 + $0x500] sm:$0xff] }
 0x33e   : > { %v6252_v45 = vadd.f32 %v5913_v0, %v1746_v1 }
 0x33f   : > { %v4586_v54 = vpop.f32.mrb[78].mxu0 }
 0x340   : > { %v1750_v55 = vpop.f32.mrb[79].mxu0  ;;  %1976 = vmax.xlane.f32.xlu1 %v6231_v46  ;;  %7443 = vst [vmem:[#allocation9_spill] sm:$0xff] %v6252_v45  ;;  %v1756_v60 = vadd.f32 %v4586_v54, %v379_v51  ;;  %v6261_v46 = vadd.f32 %v5913_v0, %v1741_v27  ;;  %v381_v54 = vld [vmem:[%s7400_s2 + $0x518] sm:$0xff] }
 0x342   : > { %7444 = vst [vmem:[#allocation10_spill] sm:$0xff] %v6261_v46  ;;  %v6272_v21 = vadd.f32 %v5913_v0, %v1756_v60 }
 0x343   : > { %v4589_v61 = vpop.f32.mrb[80].mxu0 }
 0x344   : > { %v1760_v30 = vpop.f32.mrb[81].mxu0  ;;  %1982 = vmax.xlane.f32.xlu1 %v6238_v59  ;;  %7445 = vst [vmem:[#allocation11_spill] sm:$0xff] %v6272_v21  ;;  %v1766_v49 = vadd.f32 %v4589_v61, %v381_v54  ;;  %v383_v61 = vld [vmem:[%s7400_s2 + $0x528] sm:$0xff] }
 0x346   : > { %v6294_v4 = vadd.f32 %v5913_v0, %v1766_v49 }
 0x347   : > { %v4592_v17 = vpop.f32.mrb[82].mxu0 }
 0x348   : > { %v1770_v18 = vpop.f32.mrb[83].mxu0  ;;  %1980 = vmax.xlane.f32.xlu1 %v6245_v9  ;;  %v1751_v9 = vadd.f32 %v1750_v55, %v378_v39  ;;  %v380_v55 = vld [vmem:[%s7400_s2 + $0x510] sm:$0xff]  ;;  %7447 = vst [vmem:[#allocation13_spill] sm:$0xff] %v6294_v4 }
 0x34a   : > { %v6283_v29 = vadd.f32 %v5913_v0, %v1751_v9  ;;  %v1776_v9 = vadd.f32 %v4592_v17, %v383_v61 }
 0x34b   : > { %v6257_v35 = vpop.f32.mrb[84].mxu0 }
 0x34c   : > { %v1780_v56 = vpop.f32.mrb[85].mxu0  ;;  %1986 = vmax.xlane.f32.xlu1 %v6252_v45  ;;  %7446 = vst [vmem:[#allocation12_spill] sm:$0xff] %v6283_v29  ;;  %v6308_v49 = vadd.f32 %v5913_v0, %v1776_v9 }
 0x34e   : > { %7449 = vst [vmem:[#allocation15_spill] sm:$0xff] %v6308_v49 }
 0x34f   : > { %v6266_v11 = vpop.f32.mrb[86].mxu0 }
 0x350   : > { %v6268_v1 = vpop.f32.mrb[87].mxu0  ;;  %1984 = vmax.xlane.f32.xlu1 %v6261_v46  ;;  %v1761_v46 = vadd.f32 %v1760_v30, %v380_v55  ;;  %v384_v55 = vld [vmem:[%s7400_s2 + $0x530] sm:$0xff] }
 0x351   : > { %v1781_v17 = vadd.f32 %v1780_v56, %v384_v55 }
 0x352   : > { %v6301_v54 = vadd.f32 %v5913_v0, %v1761_v46 }
 0x353   : > { %v6277_v27 = vpop.f32.mrb[88].mxu0  ;;  %v6319_v61 = vadd.f32 %v5913_v0, %v1781_v17 }
 0x354   : > { %v6279_v51 = vpop.f32.mrb[89].mxu0  ;;  %1990 = vmax.xlane.f32.xlu1 %v6272_v21  ;;  %7448 = vst [vmem:[#allocation14_spill] sm:$0xff] %v6301_v54  ;;  %v382_v21 = vld [vmem:[%s7400_s2 + $0x520] sm:$0xff] }
 0x355   : > { %v1771_v30 = vadd.f32 %v1770_v18, %v382_v21  ;;  %7451 = vst [vmem:[#allocation17_spill] sm:$0xff] %v6319_v61 }
 0x357   : > { %v6288_v60 = vpop.f32.mrb[90].mxu0  ;;  %v6315_v46 = vadd.f32 %v5913_v0, %v1771_v30 }
 0x358   : > { %v6290_v39 = vpop.f32.mrb[91].mxu0  ;;  %1988 = vmax.xlane.f32.xlu1 %v6283_v29 }
 0x359   : > { %7450 = vst [vmem:[#allocation16_spill] sm:$0xff] %v6315_v46 }
 0x35c   : > { %1994 = vmax.xlane.f32.xlu1 %v6294_v4 }
 0x360   : > { %1992 = vmax.xlane.f32.xlu1 %v6301_v54 }
 0x364   : > { %1998 = vmax.xlane.f32.xlu1 %v6308_v49 }
 0x368   : > { %1996 = vmax.xlane.f32.xlu1 %v6315_v46 }
 0x36c   : > { %2000 = vmax.xlane.f32.xlu1 %v6319_v61 }
 0x36d   : > { %v1891_v21 = vpop.xlane.xlu0 %1890 }
 0x36e   : > { %v2017_v18 = vsub.f32 %v5919_v5, %v1891_v21 }
 0x370   : > { %v2082_v9 = vmul.f32 1.442695, %v2017_v18 }
 0x371   : > { %v1895_v54 = vpop.xlane.xlu1 %1894  ;;  %v1889_v29 = vpop.xlane.xlu0 %1888 }
 0x372   : > { %4909 = vpow2.f32 %v2082_v9  ;;  %v2016_v49 = vsub.f32 %v5932_v15, %v1889_v29  ;;  %v2019_v56 = vsub.f32 %v5926_v13, %v1895_v54 }
 0x374   : > { %v2080_v30 = vmul.f32 1.442695, %v2016_v49  ;;  %v2086_v46 = vmul.f32 1.442695, %v2019_v56 }
 0x375   : > { %v1893_v55 = vpop.xlane.xlu1 %1892 }
 0x376   : > { %v1897_v4 = vpop.xlane.xlu0 %1896  ;;  %4911 = vpow2.f32 %v2080_v30  ;;  %v2018_v17 = vsub.f32 %v5943_v24, %v1893_v55  ;;  %v385_v30 = vld [vmem:[%s7400_s2 + $0x538] sm:$0xff] }
 0x377   : > { %4913 = vpow2.f32 %v2086_v46  ;;  %v2020_v29 = vsub.f32 %v5949_v28, %v1897_v4 }
 0x378   : > { %v2084_v12 = vmul.f32 1.442695, %v2018_v17 }
 0x379   : > { %v1899_v45 = vpop.xlane.xlu1 %1898 }
 0x37a   : > { %v1901_v61 = vpop.xlane.xlu0 %1900  ;;  %v2021_v5 = vsub.f32 %v5957_v38, %v1899_v45  ;;  %4915 = vpow2.f32 %v2084_v12  ;;  %v2088_v38 = vmul.f32 1.442695, %v2020_v29 }
 0x37b   : > { %v2022_v45 = vsub.f32 %v5963_v41, %v1901_v61 }
 0x37c   : > { %v6327_v21 = vpop.eup %4909  ;;  %v2090_v54 = vmul.f32 1.442695, %v2021_v5 }
 0x37d   : > { %v1903_v18 = vpop.xlane.xlu1 %1902  ;;  %2210 = vadd.xlane.f32.xlu0 %v6327_v21  ;;  %v2092_v28 = vmul.f32 1.442695, %v2022_v45 }
 0x37e   : > { %v2023_v13 = vsub.f32 %v5971_v44, %v1903_v18  ;;  %v1905_v15 = vpop.xlane.xlu0 %1904 }
 0x37f   : > { %v2024_v5 = vsub.f32 %v5977_v37, %v1905_v15  ;;  %v386_v37 = vld [vmem:[%s7400_s2 + $0x540] sm:$0xff] }
 0x380   : > { %v2094_v49 = vmul.f32 1.442695, %v2023_v13  ;;  %v6332_v24 = vpop.eup %4911 }
 0x381   : > { %v1907_v9 = vpop.xlane.xlu1 %1906  ;;  %2208 = vadd.xlane.f32.xlu0 %v6332_v24  ;;  %v6336_v56 = vpop.eup %4913 }
 0x382   : > { %4917 = vpow2.f32 %v2094_v49  ;;  %v1909_v46 = vpop.xlane.xlu0 %1908  ;;  %v2025_v4 = vsub.f32 %v5985_v62, %v1907_v9  ;;  %v2096_v49 = vmul.f32 1.442695, %v2024_v5 }
 0x383   : > { %4919 = vpow2.f32 %v2090_v54  ;;  %v2026_v9 = vsub.f32 %v5991_v58, %v1909_v46 }
 0x384   : > { %4921 = vpow2.f32 %v2088_v38  ;;  %v6344_v17 = vpop.eup %4915  ;;  %v2098_v18 = vmul.f32 1.442695, %v2025_v4 }
 0x385   : > { %v1911_v44 = vpop.xlane.xlu1 %1910  ;;  %2214 = vadd.xlane.f32.xlu0 %v6336_v56  ;;  %v2100_v58 = vmul.f32 1.442695, %v2026_v9 }
 0x386   : > { %v2027_v12 = vsub.f32 %v5999_v16, %v1911_v44  ;;  %v1913_v61 = vpop.xlane.xlu0 %1912  ;;  %v1786_v16 = vadd.f32 %v6257_v35, %v385_v30  ;;  %v1791_v44 = vadd.f32 %v6268_v1, %v386_v37 }
 0x388   : > { %v2102_v55 = vmul.f32 1.442695, %v2027_v12  ;;  %v6358_v35 = vadd.f32 %v5913_v0, %v1786_v16  ;;  %v2028_v16 = vsub.f32 %v6005_v25, %v1913_v61  ;;  %v6378_v5 = vadd.f32 %v5913_v0, %v1791_v44 }
 0x389   : > { %v1915_v41 = vpop.xlane.xlu1 %1914  ;;  %2212 = vadd.xlane.f32.xlu0 %v6344_v17 }
 0x38a   : > { %4923 = vpow2.f32 %v2102_v55  ;;  %v1917_v15 = vpop.xlane.xlu0 %1916  ;;  %v2029_v46 = vsub.f32 %v6013_v36, %v1915_v41  ;;  %v387_v36 = vld [vmem:[%s7400_s2 + $0x548] sm:$0xff]  ;;  %v2104_v25 = vmul.f32 1.442695, %v2028_v16 }
 0x38b   : > { %4925 = vpow2.f32 %v2092_v28  ;;  %v2030_v61 = vsub.f32 %v6019_v34, %v1917_v15  ;;  %v388_v34 = vld [vmem:[%s7400_s2 + $0x550] sm:$0xff] }
 0x38c   : > { %v6349_v13 = vpop.eup %4917  ;;  %4927 = vpow2.f32 %v2098_v18  ;;  %v2106_v1 = vmul.f32 1.442695, %v2029_v46 }
 0x38d   : > { %v6351_v62 = vpop.eup %4919  ;;  %2222 = vadd.xlane.f32.xlu1 %v6349_v13  ;;  %v1919_v29 = vpop.xlane.xlu1 %1918  ;;  %v2108_v44 = vmul.f32 1.442695, %v2030_v61 }
 0x38e   : > { %v2031_v54 = vsub.f32 %v6027_v6, %v1919_v29  ;;  %2218 = vadd.xlane.f32.xlu0 %v6351_v62  ;;  %v6363_v45 = vpop.eup %4921  ;;  %v1921_v30 = vpop.xlane.xlu0 %1920 }
 0x390   : > { %v2110_v38 = vmul.f32 1.442695, %v2031_v54 }
 0x391   : > { %2002 = vmax.xlane.f32.xlu1 %v6358_v35  ;;  %v1923_v6 = vpop.xlane.xlu1 %1922 }
 0x392   : > { %4929 = vpow2.f32 %v2110_v38  ;;  %2216 = vadd.xlane.f32.xlu0 %v6363_v45 }
 0x393   : > { %4931 = vpow2.f32 %v2096_v49  ;;  %v1925_v49 = vpop.xlane.xlu0 %1924 }
 0x394   : > { %v6369_v12 = vpop.eup %4923  ;;  %4933 = vpow2.f32 %v2100_v58 }
 0x395   : > { %v6371_v28 = vpop.eup %4925  ;;  %2230 = vadd.xlane.f32.xlu1 %v6369_v12  ;;  %v1927_v4 = vpop.xlane.xlu1 %1926 }
 0x396   : > { %v2035_v55 = vsub.f32 %v6055_v32, %v1927_v4  ;;  %2220 = vadd.xlane.f32.xlu0 %v6371_v28  ;;  %v6383_v18 = vpop.eup %4927  ;;  %v1796_v32 = vadd.f32 %v6266_v11, %v387_v36  ;;  %v2033_v11 = vsub.f32 %v6041_v19, %v1923_v6  ;;  %v1801_v19 = vadd.f32 %v6279_v51, %v388_v34 }
 0x397   : > { %v2032_v6 = vsub.f32 %v6033_v10, %v1921_v30  ;;  %v389_v10 = vld [vmem:[%s7400_s2 + $0x558] sm:$0xff] }
 0x398   : > { %v2118_v41 = vmul.f32 1.442695, %v2035_v55  ;;  %v6398_v58 = vadd.f32 %v5913_v0, %v1796_v32  ;;  %v2114_v55 = vmul.f32 1.442695, %v2033_v11  ;;  %v6420_v51 = vadd.f32 %v5913_v0, %v1801_v19 }
 0x399   : > { %2004 = vmax.xlane.f32.xlu1 %v6378_v5  ;;  %v1931_v29 = vpop.xlane.xlu1 %1930  ;;  %v2112_v32 = vmul.f32 1.442695, %v2032_v6 }
 0x39a   : > { %4935 = vpow2.f32 %v2118_v41  ;;  %2226 = vadd.xlane.f32.xlu0 %v6383_v18 }
 0x39b   : > { %4937 = vpow2.f32 %v2106_v1 }
 0x39c   : > { %v6389_v54 = vpop.eup %4929  ;;  %4939 = vpow2.f32 %v2104_v25  ;;  %v2034_v25 = vsub.f32 %v6047_v23, %v1925_v49  ;;  %v1806_v23 = vadd.f32 %v6277_v27, %v389_v10 }
 0x39d   : > { %v6391_v9 = vpop.eup %4931  ;;  %2238 = vadd.xlane.f32.xlu1 %v6389_v54  ;;  %v1935_v37 = vpop.xlane.xlu1 %1934 }
 0x39e   : > { %v2039_v38 = vsub.f32 %v6083_v7, %v1935_v37  ;;  %2224 = vadd.xlane.f32.xlu0 %v6391_v9  ;;  %v6403_v46 = vpop.eup %4933  ;;  %v1929_v7 = vpop.xlane.xlu0 %1928  ;;  %v2116_v49 = vmul.f32 1.442695, %v2034_v25 }
 0x39f   : > { %v2036_v6 = vsub.f32 %v6061_v40, %v1929_v7 }
 0x3a0   : > { %v2126_v15 = vmul.f32 1.442695, %v2039_v38  ;;  %v2037_v38 = vsub.f32 %v6069_v50, %v1931_v29  ;;  %v390_v50 = vld [vmem:[%s7400_s2 + $0x560] sm:$0xff] }
 0x3a1   : > { %2006 = vmax.xlane.f32.xlu1 %v6398_v58  ;;  %v6406_v4 = vpop.xlane.xlu1 %1938  ;;  %v1811_v40 = vadd.f32 %v6290_v39, %v390_v50 }
 0x3a2   : > { %4941 = vpow2.f32 %v2126_v15  ;;  %2228 = vadd.xlane.f32.xlu0 %v6403_v46  ;;  %v1933_v30 = vpop.xlane.xlu0 %1932  ;;  %v2122_v27 = vmul.f32 1.442695, %v2037_v38  ;;  %v2041_v39 = vsub.f32 %v6097_v63, %v6406_v4 }
 0x3a3   : > { %4943 = vpow2.f32 %v2108_v44  ;;  %v2038_v7 = vsub.f32 %v6075_v52, %v1933_v30  ;;  %v6465_v38 = vadd.f32 %v5913_v0, %v1811_v40  ;;  %v391_v52 = vld [vmem:[%s7400_s2 + $0x568] sm:$0xff] }
 0x3a4   : > { %v6411_v16 = vpop.eup %4935  ;;  %4945 = vpow2.f32 %v2114_v55  ;;  %v6442_v55 = vadd.f32 %v5913_v0, %v1806_v23  ;;  %v1816_v63 = vadd.f32 %v6288_v60, %v391_v52 }
 0x3a5   : > { %v6413_v1 = vpop.eup %4937  ;;  %2246 = vadd.xlane.f32.xlu1 %v6411_v16  ;;  %v1943_v36 = vpop.xlane.xlu1 %1942 }
 0x3a6   : > { %v2043_v41 = vsub.f32 %v6111_v8, %v1943_v36  ;;  %2234 = vadd.xlane.f32.xlu0 %v6413_v1  ;;  %v6425_v37 = vpop.eup %4939  ;;  %v1937_v15 = vpop.xlane.xlu0 %1936 }
 0x3a7   : > { %v2040_v4 = vsub.f32 %v6089_v3, %v1937_v15  ;;  %v6486_v3 = vadd.f32 %v5913_v0, %v1816_v63 }
 0x3a8   : > { %v2134_v61 = vmul.f32 1.442695, %v2043_v41 }
 0x3a9   : > { %2008 = vmax.xlane.f32.xlu1 %v6420_v51  ;;  %v6428_v8 = vpop.xlane.xlu1 %1946 }
 0x3aa   : > { %4947 = vpow2.f32 %v2134_v61  ;;  %2232 = vadd.xlane.f32.xlu0 %v6425_v37  ;;  %v1941_v25 = vpop.xlane.xlu0 %1940 }
 0x3ab   : > { %4949 = vpow2.f32 %v2112_v32  ;;  %v2042_v60 = vsub.f32 %v6103_v48, %v1941_v25  ;;  %v2045_v48 = vsub.f32 %v6125_v26, %v6428_v8 }
 0x3ac   : > { %v6433_v44 = vpop.eup %4941  ;;  %4951 = vpow2.f32 %v2116_v49  ;;  %v2124_v49 = vmul.f32 1.442695, %v2038_v7 }
 0x3ad   : > { %v6435_v11 = vpop.eup %4943  ;;  %2254 = vadd.xlane.f32.xlu1 %v6433_v44  ;;  %v1951_v34 = vpop.xlane.xlu1 %1950  ;;  %v2138_v63 = vmul.f32 1.442695, %v2045_v48 }
 0x3ae   : > { %v2047_v19 = vsub.f32 %v6139_v47, %v1951_v34  ;;  %2236 = vadd.xlane.f32.xlu0 %v6435_v11  ;;  %v6447_v36 = vpop.eup %4945  ;;  %v2120_v47 = vmul.f32 1.442695, %v2036_v6 }
 0x3b0   : > { %v2142_v29 = vmul.f32 1.442695, %v2047_v19  ;;  %v1945_v19 = vpop.xlane.xlu0 %1944 }
 0x3b1   : > { %2010 = vmax.xlane.f32.xlu1 %v6442_v55  ;;  %v6450_v41 = vpop.xlane.xlu1 %1954 }
 0x3b2   : > { %4953 = vpow2.f32 %v2142_v29  ;;  %2242 = vadd.xlane.f32.xlu0 %v6447_v36 }
 0x3b3   : > { %4955 = vpow2.f32 %v2122_v27  ;;  %v2130_v27 = vmul.f32 1.442695, %v2041_v39 }
 0x3b4   : > { %v6455_v32 = vpop.eup %4947  ;;  %4957 = vpow2.f32 %v2120_v47  ;;  %v1949_v15 = vpop.xlane.xlu0 %1948 }
 0x3b5   : > { %v6457_v10 = vpop.eup %4949  ;;  %2262 = vadd.xlane.f32.xlu1 %v6455_v32  ;;  %v1959_v61 = vpop.xlane.xlu1 %1958 }
 0x3b6   : > { %v2051_v23 = vsub.f32 %v6167_v43, %v1959_v61  ;;  %2240 = vadd.xlane.f32.xlu0 %v6457_v10  ;;  %v6470_v34 = vpop.eup %4951 }
 0x3b8   : > { %v2150_v30 = vmul.f32 1.442695, %v2051_v23 }
 0x3b9   : > { %2012 = vmax.xlane.f32.xlu1 %v6465_v38  ;;  %v1963_v43 = vpop.xlane.xlu1 %1962 }
 0x3ba   : > { %4959 = vpow2.f32 %v2150_v30  ;;  %v2053_v6 = vsub.f32 %v6181_v20, %v1963_v43  ;;  %2244 = vadd.xlane.f32.xlu0 %v6470_v34  ;;  %v2128_v20 = vmul.f32 1.442695, %v2040_v4  ;;  %v1953_v43 = vpop.xlane.xlu0 %1952 }
 0x3bb   : > { %4961 = vpow2.f32 %v2124_v49  ;;  %v2048_v48 = vsub.f32 %v6145_v53, %v1953_v43 }
 0x3bc   : > { %v6477_v50 = vpop.eup %4953  ;;  %v2154_v29 = vmul.f32 1.442695, %v2053_v6 }
 0x3bd   : > { %v6479_v40 = vpop.eup %4955  ;;  %2270 = vadd.xlane.f32.xlu1 %v6477_v50  ;;  %v1967_v47 = vpop.xlane.xlu1 %1966 }
 0x3be   : > { %4963 = vpow2.f32 %v2154_v29  ;;  %v2055_v7 = vsub.f32 %v6195_v42, %v1967_v47  ;;  %2250 = vadd.xlane.f32.xlu0 %v6479_v40  ;;  %v6488_v23 = vpop.eup %4957  ;;  %v2132_v42 = vmul.f32 1.442695, %v2042_v60  ;;  %v2046_v47 = vsub.f32 %v6131_v31, %v1949_v15 }
 0x3bf   : > { %4965 = vpow2.f32 %v2130_v27 }
 0x3c0   : > { %v2158_v61 = vmul.f32 1.442695, %v2055_v7 }
 0x3c1   : > { %2014 = vmax.xlane.f32.xlu1 %v6486_v3  ;;  %v1971_v49 = vpop.xlane.xlu1 %1970 }
 0x3c2   : > { %4967 = vpow2.f32 %v2158_v61  ;;  %v2057_v39 = vsub.f32 %v6206_v33, %v1971_v49  ;;  %2248 = vadd.xlane.f32.xlu0 %v6488_v23  ;;  %v2044_v33 = vsub.f32 %v6117_v14, %v1945_v19  ;;  %v1957_v14 = vpop.xlane.xlu0 %1956  ;;  %v2049_v61 = vsub.f32 %v6153_v57, %v6450_v41 }
 0x3c3   : > { %4969 = vpow2.f32 %v2128_v20 }
 0x3c4   : > { %v6495_v25 = vpop.eup %4959  ;;  %v2162_v0 = vmul.f32 1.442695, %v2057_v39 }
 0x3c5   : > { %v6497_v52 = vpop.eup %4961  ;;  %2278 = vadd.xlane.f32.xlu1 %v6495_v25  ;;  %v1975_v30 = vpop.xlane.xlu1 %1974 }
 0x3c6   : > { %4971 = vpow2.f32 %v2162_v0  ;;  %v2059_v6 = vsub.f32 %v6217_v2, %v1975_v30  ;;  %2252 = vadd.xlane.f32.xlu0 %v6497_v52  ;;  %v2136_v2 = vmul.f32 1.442695, %v2044_v33  ;;  %v1961_v39 = vpop.xlane.xlu0 %1960  ;;  %v2146_v0 = vmul.f32 1.442695, %v2049_v61 }
 0x3c7   : > { %4973 = vpow2.f32 %v2132_v42  ;;  %v2144_v33 = vmul.f32 1.442695, %v2048_v48 }
 0x3c8   : > { %v6503_v4 = vpop.eup %4963  ;;  %v2166_v26 = vmul.f32 1.442695, %v2059_v6 }
 0x3c9   : > { %v6505_v8 = vpop.eup %4965  ;;  %2282 = vadd.xlane.f32.xlu1 %v6503_v4  ;;  %v1979_v27 = vpop.xlane.xlu1 %1978 }
 0x3ca   : > { %4975 = vpow2.f32 %v2166_v26  ;;  %v2061_v29 = vsub.f32 %v6224_v22, %v1979_v27  ;;  %2258 = vadd.xlane.f32.xlu0 %v6505_v8  ;;  %v2140_v22 = vmul.f32 1.442695, %v2046_v47  ;;  %v1965_v53 = vpop.xlane.xlu0 %1964 }
 0x3cb   : > { %4977 = vpow2.f32 %v2138_v63 }
 0x3cc   : > { %v6511_v7 = vpop.eup %4967  ;;  %v2170_v19 = vmul.f32 1.442695, %v2061_v29  ;;  %v7457_v29 = vld [vmem:[#allocation9_spill] sm:$0xff] }
 0x3cd   : > { %7452 = vst [vmem:[#allocation18_spill] sm:$0xff] %v6511_v7  ;;  %v6513_v20 = vpop.eup %4969  ;;  %2286 = vadd.xlane.f32.xlu1 %v6511_v7  ;;  %v6516_v60 = vpop.xlane.xlu1 %1976 }
 0x3ce   : > { %4979 = vpow2.f32 %v2170_v19  ;;  %2256 = vadd.xlane.f32.xlu0 %v6513_v20  ;;  %v7458_v19 = vld [vmem:[#allocation3_spill] sm:$0xff] }
 0x3cf   : > { %4981 = vpow2.f32 %v2136_v2 }
 0x3d0   : > { %v6521_v49 = vpop.eup %4971  ;;  %4983 = vpow2.f32 %v2140_v22  ;;  %v2052_v22 = vsub.f32 %v7458_v19, %v1961_v39  ;;  %v7461_v39 = vld [vmem:[#allocation11_spill] sm:$0xff] }
 0x3d1   : > { %7453 = vst [vmem:[#allocation19_spill] sm:$0xff] %v6521_v49  ;;  %v6523_v31 = vpop.eup %4973  ;;  %2290 = vadd.xlane.f32.xlu1 %v6521_v49  ;;  %v1983_v15 = vpop.xlane.xlu1 %1982 }
 0x3d2   : > { %v2063_v42 = vsub.f32 %v6238_v59, %v1983_v15  ;;  %2260 = vadd.xlane.f32.xlu0 %v6523_v31  ;;  %v7455_v59 = vld [vmem:[#allocation2_spill] sm:$0xff]  ;;  %v2152_v48 = vmul.f32 1.442695, %v2052_v22 }
 0x3d3   : > { %v2050_v63 = vsub.f32 %v7455_v59, %v1957_v14 }
 0x3d4   : > { %v6529_v30 = vpop.eup %4975  ;;  %v2174_v6 = vmul.f32 1.442695, %v2063_v42  ;;  %v1969_v42 = vpop.xlane.xlu0 %1968 }
 0x3d5   : > { %7454 = vst [vmem:[#allocation20_spill] sm:$0xff] %v6529_v30  ;;  %v6531_v57 = vpop.eup %4977  ;;  %2294 = vadd.xlane.f32.xlu1 %v6529_v30  ;;  %v6534_v41 = vpop.xlane.xlu1 %1980  ;;  %v2148_v47 = vmul.f32 1.442695, %v2050_v63 }
 0x3d6   : > { %4985 = vpow2.f32 %v2174_v6  ;;  %2266 = vadd.xlane.f32.xlu0 %v6531_v57 }
 0x3d7   : > { %4987 = vpow2.f32 %v2146_v0  ;;  %v7459_v0 = vld [vmem:[#allocation4_spill] sm:$0xff] }
 0x3d8   : > { %v6538_v26 = vpop.eup %4979  ;;  %4989 = vpow2.f32 %v2144_v33  ;;  %v2054_v6 = vsub.f32 %v7459_v0, %v1965_v53 }
 0x3d9   : > { %7456 = vst [vmem:[#allocation2_spill] sm:$0xff] %v6538_v26  ;;  %v6540_v43 = vpop.eup %4981  ;;  %2298 = vadd.xlane.f32.xlu1 %v6538_v26  ;;  %v1987_v27 = vpop.xlane.xlu1 %1986 }
 0x3da   : > { %v2065_v2 = vsub.f32 %v7457_v29, %v1987_v27  ;;  %2264 = vadd.xlane.f32.xlu0 %v6540_v43  ;;  %v6546_v15 = vpop.eup %4983  ;;  %v2156_v29 = vmul.f32 1.442695, %v2054_v6 }
 0x3dc   : > { %v2178_v61 = vmul.f32 1.442695, %v2065_v2  ;;  %v7462_v2 = vld [vmem:[#allocation5_spill] sm:$0xff] }
 0x3dd   : > { %v1985_v14 = vpop.xlane.xlu1 %1984  ;;  %v2056_v19 = vsub.f32 %v7462_v2, %v1969_v42  ;;  %v7465_v42 = vld [vmem:[#allocation13_spill] sm:$0xff] }
 0x3de   : > { %4991 = vpow2.f32 %v2178_v61  ;;  %2268 = vadd.xlane.f32.xlu0 %v6546_v15  ;;  %v1973_v61 = vpop.xlane.xlu0 %1972 }
 0x3df   : > { %4993 = vpow2.f32 %v2148_v47  ;;  %v2160_v0 = vmul.f32 1.442695, %v2056_v19 }
 0x3e0   : > { %v6550_v59 = vpop.eup %4985  ;;  %4995 = vpow2.f32 %v2152_v48 }
 0x3e1   : > { %7460 = vst [vmem:[#allocation9_spill] sm:$0xff] %v6550_v59  ;;  %v6552_v27 = vpop.eup %4987  ;;  %2302 = vadd.xlane.f32.xlu1 %v6550_v59  ;;  %v1991_v33 = vpop.xlane.xlu1 %1990  ;;  %v7463_v59 = vld [vmem:[#allocation6_spill] sm:$0xff] }
 0x3e2   : > { %v2067_v63 = vsub.f32 %v7461_v39, %v1991_v33  ;;  %2274 = vadd.xlane.f32.xlu0 %v6552_v27  ;;  %v6558_v22 = vpop.eup %4989  ;;  %v2058_v26 = vsub.f32 %v7463_v59, %v1973_v61 }
 0x3e4   : > { %v2182_v47 = vmul.f32 1.442695, %v2067_v63  ;;  %v2164_v39 = vmul.f32 1.442695, %v2058_v26  ;;  %v7466_v63 = vld [vmem:[#allocation7_spill] sm:$0xff] }
 0x3e5   : > { %v1989_v53 = vpop.xlane.xlu1 %1988  ;;  %v2060_v2 = vsub.f32 %v7466_v63, %v6516_v60  ;;  %v7469_v60 = vld [vmem:[#allocation15_spill] sm:$0xff]  ;;  %v7470_v63 = vld [vmem:[#allocation10_spill] sm:$0xff] }
 0x3e6   : > { %4997 = vpow2.f32 %v2182_v47  ;;  %2272 = vadd.xlane.f32.xlu0 %v6558_v22  ;;  %v7467_v47 = vld [vmem:[#allocation8_spill] sm:$0xff] }
 0x3e7   : > { %4999 = vpow2.f32 %v2156_v29  ;;  %v2168_v61 = vmul.f32 1.442695, %v2060_v2 }
 0x3e8   : > { %v6562_v30 = vpop.eup %4991  ;;  %5001 = vpow2.f32 %v2160_v0 }
 0x3e9   : > { %7464 = vst [vmem:[#allocation3_spill] sm:$0xff] %v6562_v30  ;;  %v6564_v33 = vpop.eup %4993  ;;  %2306 = vadd.xlane.f32.xlu1 %v6562_v30  ;;  %v1995_v48 = vpop.xlane.xlu1 %1994  ;;  %v2062_v30 = vsub.f32 %v7467_v47, %v6534_v41  ;;  %v7471_v47 = vld [vmem:[#allocation12_spill] sm:$0xff] }
 0x3ea   : > { %v2069_v6 = vsub.f32 %v7465_v42, %v1995_v48  ;;  %2276 = vadd.xlane.f32.xlu0 %v6564_v33  ;;  %v6571_v19 = vpop.eup %4995  ;;  %v2066_v49 = vsub.f32 %v7471_v47, %v1989_v53  ;;  %v7474_v53 = vld [vmem:[#allocation16_spill] sm:$0xff] }
 0x3ec   : > { %v2186_v29 = vmul.f32 1.442695, %v2069_v6  ;;  %v2172_v6 = vmul.f32 1.442695, %v2062_v30  ;;  %v2180_v30 = vmul.f32 1.442695, %v2066_v49 }
 0x3ed   : > { %v1993_v59 = vpop.xlane.xlu1 %1992 }
 0x3ee   : > { %5003 = vpow2.f32 %v2186_v29  ;;  %2280 = vadd.xlane.f32.xlu0 %v6571_v19  ;;  %v2064_v29 = vsub.f32 %v7470_v63, %v1985_v14  ;;  %v7473_v14 = vld [vmem:[#allocation14_spill] sm:$0xff] }
 0x3ef   : > { %5005 = vpow2.f32 %v2164_v39 }
 0x3f0   : > { %v6576_v48 = vpop.eup %4997  ;;  %5007 = vpow2.f32 %v2168_v61  ;;  %v2176_v41 = vmul.f32 1.442695, %v2064_v29 }
 0x3f1   : > { %7468 = vst [vmem:[#allocation4_spill] sm:$0xff] %v6576_v48  ;;  %v6578_v42 = vpop.eup %4999  ;;  %2310 = vadd.xlane.f32.xlu1 %v6576_v48  ;;  %v1999_v26 = vpop.xlane.xlu1 %1998 }
 0x3f2   : > { %v2071_v0 = vsub.f32 %v7469_v60, %v1999_v26  ;;  %2284 = vadd.xlane.f32.xlu0 %v6578_v42  ;;  %v6584_v2 = vpop.eup %5001  ;;  %v2068_v26 = vsub.f32 %v7473_v14, %v1993_v59  ;;  %v7477_v59 = vld [vmem:[#allocation17_spill] sm:$0xff] }
 0x3f4   : > { %v2190_v39 = vmul.f32 1.442695, %v2071_v0  ;;  %v2184_v0 = vmul.f32 1.442695, %v2068_v26 }
 0x3f5   : > { %v1997_v61 = vpop.xlane.xlu1 %1996 }
 0x3f6   : > { %5009 = vpow2.f32 %v2190_v39  ;;  %2288 = vadd.xlane.f32.xlu0 %v6584_v2 }
 0x3f7   : > { %5011 = vpow2.f32 %v2172_v6  ;;  %v2070_v6 = vsub.f32 %v7474_v53, %v1997_v61 }
 0x3f8   : > { %v6588_v48 = vpop.eup %5003  ;;  %5013 = vpow2.f32 %v2176_v41 }
 0x3f9   : > { %7472 = vst [vmem:[#allocation11_spill] sm:$0xff] %v6588_v48  ;;  %v6590_v7 = vpop.eup %5005  ;;  %2314 = vadd.xlane.f32.xlu1 %v6588_v48  ;;  %5015 = vpow2.f32 %v2180_v30  ;;  %v2001_v29 = vpop.xlane.xlu1 %2000  ;;  %v2188_v49 = vmul.f32 1.442695, %v2070_v6 }
 0x3fa   : > { %2292 = vadd.xlane.f32.xlu0 %v6590_v7  ;;  %v6595_v60 = vpop.eup %5007  ;;  %5017 = vpow2.f32 %v2184_v0  ;;  %v2072_v41 = vsub.f32 %v7477_v59, %v2001_v29 }
 0x3fb   : > { %5019 = vpow2.f32 %v2188_v49 }
 0x3fc   : > { %v2192_v30 = vmul.f32 1.442695, %v2072_v41 }
 0x3fe   : > { %2296 = vadd.xlane.f32.xlu0 %v6595_v60  ;;  %5021 = vpow2.f32 %v2192_v30 }
 0x400   : > { %v6599_v63 = vpop.eup %5009 }
 0x401   : > { %7475 = vst [vmem:[#allocation5_spill] sm:$0xff] %v6599_v63  ;;  %v6601_v39 = vpop.eup %5011  ;;  %2318 = vadd.xlane.f32.xlu1 %v6599_v63 }
 0x402   : > { %7476 = vst [vmem:[#allocation6_spill] sm:$0xff] %v6601_v39  ;;  %2300 = vadd.xlane.f32.xlu0 %v6601_v39  ;;  %v6606_v47 = vpop.eup %5013 }
 0x403   : > { %7478 = vst [vmem:[#allocation13_spill] sm:$0xff] %v6606_v47  ;;  %v6609_v61 = vpop.eup %5015 }
 0x404   : > { %7479 = vst [vmem:[#allocation7_spill] sm:$0xff] %v6609_v61  ;;  %v6612_v26 = vpop.eup %5017 }
 0x405   : > { %7480 = vst [vmem:[#allocation8_spill] sm:$0xff] %v6612_v26  ;;  %v6615_v53 = vpop.eup %5019 }
 0x406   : > { %2304 = vadd.xlane.f32.xlu0 %v6606_v47  ;;  %7481 = vst [vmem:[#allocation15_spill] sm:$0xff] %v6615_v53 }
 0x408   : > { %v6618_v29 = vpop.eup %5021 }
 0x409   : > { %7482 = vst [vmem:[#allocation10_spill] sm:$0xff] %v6618_v29 }
 0x40a   : > { %2308 = vadd.xlane.f32.xlu0 %v6609_v61  ;;  %v2211_v14 = vpop.xlane.xlu0 %2210 }
 0x40b   : > { %5023 = vrcp.f32 %v2211_v14 }
 0x40e   : > { %2312 = vadd.xlane.f32.xlu0 %v6612_v26  ;;  %v2209_v0 = vpop.xlane.xlu0 %2208 }
 0x40f   : > { %5025 = vrcp.f32 %v2209_v0 }
 0x412   : > { %2316 = vadd.xlane.f32.xlu0 %v6615_v53  ;;  %v2215_v6 = vpop.xlane.xlu0 %2214 }
 0x413   : > { %5027 = vrcp.f32 %v2215_v6 }
 0x415   : > { %v5024_v59 = vpop.eup %5023 }
 0x416   : > { %2320 = vadd.xlane.f32.xlu0 %v6618_v29  ;;  %v2213_v49 = vpop.xlane.xlu0 %2212  ;;  %v2401_v0 = vmul.f32 %v5024_v59, %v6327_v21 }
 0x417   : > { %5029 = vrcp.f32 %v2213_v49 }
 0x419   : > { %v5026_v41 = vpop.eup %5025 }
 0x41a   : > { %v2223_v30 = vpop.xlane.xlu1 %2222  ;;  %v2400_v14 = vmul.f32 %v5026_v41, %v6332_v24 }
 0x41b   : > { %v2219_v63 = vpop.xlane.xlu0 %2218 }
 0x41c   : > { %4637 = vmatprep.mubr.f32.mxu1 %v2400_v14  ;;  %5031 = vrcp.f32 %v2219_v63 }
 0x41d   : > { %4638 = vmatmul.mubr.f32.vlgmr.msra.gmra.mrb[36].mxu1 %v2401_v0  ;;  %v5028_v29 = vpop.eup %5027 }
 0x41e   : > { %v2003_v48 = vpop.xlane.xlu1 %2002  ;;  %v2403_v24 = vmul.f32 %v5028_v29, %v6336_v56 }
 0x41f   : > { %v2073_v53 = vsub.f32 %v6358_v35, %v2003_v48  ;;  %v2217_v26 = vpop.xlane.xlu0 %2216 }
 0x420   : > { %5033 = vrcp.f32 %v2217_v26 }
 0x421   : > { %v2194_v6 = vmul.f32 1.442695, %v2073_v53  ;;  %v5030_v61 = vpop.eup %5029 }
 0x422   : > { %v2231_v49 = vpop.xlane.xlu1 %2230  ;;  %v2402_v39 = vmul.f32 %v5030_v61, %v6344_v17 }
 0x423   : > { %5035 = vpow2.f32 %v2194_v6  ;;  %v2221_v47 = vpop.xlane.xlu0 %2220 }
 0x424   : > { %5037 = vrcp.f32 %v2223_v30  ;;  %4640 = vmatprep.mubr.f32.mxu1 %v2402_v39 }
 0x425   : > { %5039 = vrcp.f32 %v2221_v47  ;;  %4641 = vmatmul.mubr.f32.gmra.mrb[38].mxu1 %v2403_v24 }
 0x426   : > { %v2005_v21 = vpop.xlane.xlu1 %2004  ;;  %v5032_v48 = vpop.eup %5031 }
 0x427   : > { %v2074_v63 = vsub.f32 %v6378_v5, %v2005_v21  ;;  %v2227_v35 = vpop.xlane.xlu0 %2226  ;;  %v2405_v17 = vmul.f32 %v5032_v48, %v6351_v62 }
 0x429   : > { %v2196_v26 = vmul.f32 1.442695, %v2074_v63 }
 0x42a   : > { %v5034_v59 = vpop.eup %5033  ;;  %v2239_v53 = vpop.xlane.xlu1 %2238 }
 0x42b   : > { %5041 = vpow2.f32 %v2196_v26  ;;  %v2225_v41 = vpop.xlane.xlu0 %2224  ;;  %v2404_v14 = vmul.f32 %v5034_v59, %v6363_v45 }
 0x42c   : > { %5043 = vrcp.f32 %v2227_v35 }
 0x42d   : > { %v6629_v61 = vpop.eup %5035  ;;  %5045 = vrcp.f32 %v2225_v41  ;;  %4643 = vmatprep.mubr.f32.mxu1 %v2404_v14 }
 0x42e   : > { %v5038_v56 = vpop.eup %5037  ;;  %4644 = vmatmul.mubr.f32.gmra.mrb[40].mxu1 %v2405_v17  ;;  %2322 = vadd.xlane.f32.xlu1 %v6629_v61  ;;  %v2007_v5 = vpop.xlane.xlu1 %2006  ;;  %5047 = vrcp.f32 %v2231_v49 }
 0x42f   : > { %v5040_v39 = vpop.eup %5039  ;;  %v2075_v47 = vsub.f32 %v6398_v58, %v2007_v5  ;;  %v2229_v29 = vpop.xlane.xlu0 %2228  ;;  %v2407_v62 = vmul.f32 %v5038_v56, %v6349_v13 }
 0x430   : > { %5049 = vrcp.f32 %v2229_v29  ;;  %v2406_v45 = vmul.f32 %v5040_v39, %v6371_v28 }
 0x431   : > { %v2198_v30 = vmul.f32 1.442695, %v2075_v47 }
 0x432   : > { %4646 = vmatprep.mubr.f32.mxu1 %v2406_v45  ;;  %v2247_v0 = vpop.xlane.xlu1 %2246 }
 0x433   : > { %5051 = vpow2.f32 %v2198_v30  ;;  %4647 = vmatmul.mubr.f32.gmra.mrb[42].mxu1 %v2407_v62  ;;  %v2235_v6 = vpop.xlane.xlu0 %2234 }
 0x434   : > { %5053 = vrcp.f32 %v2235_v6 }
 0x435   : > { %v6635_v24 = vpop.eup %5041 }
 0x436   : > { %v5044_v21 = vpop.eup %5043  ;;  %v2009_v63 = vpop.xlane.xlu1 %2008  ;;  %2324 = vadd.xlane.f32.xlu0 %v6635_v24 }
 0x437   : > { %v5046_v49 = vpop.eup %5045  ;;  %v2076_v58 = vsub.f32 %v6420_v51, %v2009_v63  ;;  %v2233_v35 = vpop.xlane.xlu0 %2232  ;;  %v2409_v26 = vmul.f32 %v5044_v21, %v6383_v18 }
 0x438   : > { %5055 = vrcp.f32 %v2233_v35  ;;  %v2408_v28 = vmul.f32 %v5046_v49, %v6391_v9  ;;  %v5048_v13 = vpop.eup %5047 }
 0x439   : > { %v2200_v48 = vmul.f32 1.442695, %v2076_v58  ;;  %v2411_v9 = vmul.f32 %v5048_v13, %v6369_v12 }
 0x43a   : > { %v5050_v59 = vpop.eup %5049  ;;  %4649 = vmatprep.mubr.f32.mxu1 %v2408_v28  ;;  %v6641_v41 = vpop.xlane.xlu1 %2254 }
 0x43b   : > { %5057 = vpow2.f32 %v2200_v48  ;;  %4650 = vmatmul.mubr.f32.gmra.mrb[44].mxu1 %v2409_v26  ;;  %v2237_v14 = vpop.xlane.xlu0 %2236  ;;  %v2410_v17 = vmul.f32 %v5050_v59, %v6403_v46 }
 0x43c   : > { %5059 = vrcp.f32 %v2239_v53 }
 0x43d   : > { %v6644_v56 = vpop.eup %5051  ;;  %5061 = vrcp.f32 %v2237_v14  ;;  %4652 = vmatprep.mubr.f32.mxu1 %v2410_v17 }
 0x43e   : > { %2326 = vadd.xlane.f32.xlu1 %v6644_v56  ;;  %v2011_v51 = vpop.xlane.xlu1 %2010  ;;  %v5054_v39 = vpop.eup %5053 }
 0x43f   : > { %4653 = vmatmul.mubr.f32.gmra.mrb[46].mxu1 %v2411_v9  ;;  %v2077_v18 = vsub.f32 %v6442_v55, %v2011_v51  ;;  %v2243_v5 = vpop.xlane.xlu0 %2242  ;;  %v2413_v30 = vmul.f32 %v5054_v39, %v6413_v1 }
 0x441   : > { %v2202_v47 = vmul.f32 1.442695, %v2077_v18 }
 0x442   : > { %v5056_v29 = vpop.eup %5055  ;;  %v6649_v45 = vpop.xlane.xlu1 %2262 }
 0x443   : > { %5063 = vpow2.f32 %v2202_v47  ;;  %v2241_v46 = vpop.xlane.xlu0 %2240  ;;  %v2412_v53 = vmul.f32 %v5056_v29, %v6425_v37 }
 0x444   : > { %5065 = vrcp.f32 %v2243_v5 }
 0x445   : > { %v6653_v12 = vpop.eup %5057  ;;  %5067 = vrcp.f32 %v2241_v46  ;;  %4655 = vmatprep.mubr.f32.mxu1 %v2412_v53 }
 0x446   : > { %v5060_v62 = vpop.eup %5059  ;;  %4656 = vmatmul.mubr.f32.gmra.mrb[48].mxu1 %v2413_v30  ;;  %v2013_v55 = vpop.xlane.xlu1 %2012  ;;  %2328 = vadd.xlane.f32.xlu0 %v6653_v12  ;;  %5069 = vrcp.f32 %v2247_v0 }
 0x447   : > { %v5062_v6 = vpop.eup %5061  ;;  %v2078_v21 = vsub.f32 %v6465_v38, %v2013_v55  ;;  %v2245_v63 = vpop.xlane.xlu0 %2244  ;;  %v2415_v1 = vmul.f32 %v5060_v62, %v6389_v54 }
 0x448   : > { %5071 = vrcp.f32 %v2245_v63  ;;  %v2414_v37 = vmul.f32 %v5062_v6, %v6435_v11 }
 0x449   : > { %v2204_v49 = vmul.f32 1.442695, %v2078_v21 }
 0x44a   : > { %4658 = vmatprep.mubr.f32.mxu1 %v2414_v37  ;;  %v6659_v58 = vpop.xlane.xlu1 %2270 }
 0x44b   : > { %5073 = vpow2.f32 %v2204_v49  ;;  %4659 = vmatmul.mubr.f32.gmra.mrb[50].mxu1 %v2415_v1  ;;  %v2251_v35 = vpop.xlane.xlu0 %2250 }
 0x44c   : > { %5075 = vrcp.f32 %v2251_v35 }
 0x44d   : > { %v6661_v28 = vpop.eup %5063 }
 0x44e   : > { %v5066_v13 = vpop.eup %5065  ;;  %2330 = vadd.xlane.f32.xlu1 %v6661_v28  ;;  %v2015_v0 = vpop.xlane.xlu1 %2014 }
 0x44f   : > { %v5068_v38 = vpop.eup %5067  ;;  %v2079_v48 = vsub.f32 %v6486_v3, %v2015_v0  ;;  %v2249_v11 = vpop.xlane.xlu0 %2248  ;;  %v2417_v14 = vmul.f32 %v5066_v13, %v6447_v36 }
 0x450   : > { %5077 = vrcp.f32 %v2249_v11  ;;  %v2416_v54 = vmul.f32 %v5068_v38, %v6457_v10  ;;  %v5070_v26 = vpop.eup %5069 }
 0x451   : > { %v2206_v59 = vmul.f32 1.442695, %v2079_v48  ;;  %v2419_v3 = vmul.f32 %v5070_v26, %v6411_v16 }
 0x452   : > { %v5072_v17 = vpop.eup %5071  ;;  %4661 = vmatprep.mubr.f32.mxu1 %v2416_v54  ;;  %v2279_v37 = vpop.xlane.xlu1 %2278 }
 0x453   : > { %5079 = vpow2.f32 %v2206_v59  ;;  %4662 = vmatmul.mubr.f32.gmra.mrb[52].mxu1 %v2417_v14  ;;  %v2253_v9 = vpop.xlane.xlu0 %2252  ;;  %v2418_v51 = vmul.f32 %v5072_v17, %v6470_v34 }
 0x454   : > { %5081 = vrcp.f32 %v6641_v41 }
 0x455   : > { %v6669_v18 = vpop.eup %5073  ;;  %5083 = vrcp.f32 %v2253_v9  ;;  %4664 = vmatprep.mubr.f32.mxu1 %v2418_v51 }
 0x456   : > { %2332 = vadd.xlane.f32.xlu0 %v6669_v18  ;;  %v5076_v36 = vpop.eup %5075 }
 0x457   : > { %4665 = vmatmul.mubr.f32.gmra.mrb[54].mxu1 %v2419_v3  ;;  %v2259_v10 = vpop.xlane.xlu0 %2258  ;;  %v2421_v34 = vmul.f32 %v5076_v36, %v6479_v40 }
 0x458   : > { %5085 = vrcp.f32 %v2259_v10 }
 0x45a   : > { %v5078_v5 = vpop.eup %5077 }
 0x45b   : > { %v2257_v39 = vpop.xlane.xlu0 %2256  ;;  %v2420_v47 = vmul.f32 %v5078_v5, %v6488_v23 }
 0x45c   : > { %5087 = vrcp.f32 %v2257_v39 }
 0x45d   : > { %v6675_v41 = vpop.eup %5079  ;;  %4667 = vmatprep.mubr.f32.mxu1 %v2420_v47  ;;  %5089 = vrcp.f32 %v6649_v45 }
 0x45e   : > { %v5082_v29 = vpop.eup %5081  ;;  %4668 = vmatmul.mubr.f32.gmra.mrb[56].mxu1 %v2421_v34  ;;  %2334 = vadd.xlane.f32.xlu1 %v6675_v41 }
 0x45f   : > { %v5084_v16 = vpop.eup %5083  ;;  %v2261_v46 = vpop.xlane.xlu0 %2260  ;;  %v2423_v30 = vmul.f32 %v5082_v29, %v6433_v44 }
 0x460   : > { %5091 = vrcp.f32 %v2261_v46  ;;  %v2422_v53 = vmul.f32 %v5084_v16, %v6497_v52 }
 0x462   : > { %4670 = vmatprep.mubr.f32.mxu1 %v2422_v53  ;;  %v5086_v40 = vpop.eup %5085  ;;  %v7483_v53 = vld [vmem:[#allocation18_spill] sm:$0xff] }
 0x463   : > { %4671 = vmatmul.mubr.f32.gmra.mrb[58].mxu1 %v2423_v30  ;;  %v2267_v23 = vpop.xlane.xlu0 %2266  ;;  %v2425_v21 = vmul.f32 %v5086_v40, %v6505_v8 }
 0x464   : > { %5093 = vrcp.f32 %v2267_v23 }
 0x466   : > { %v5088_v62 = vpop.eup %5087 }
 0x467   : > { %v2265_v55 = vpop.xlane.xlu0 %2264  ;;  %v2424_v6 = vmul.f32 %v5088_v62, %v6513_v20  ;;  %v5090_v63 = vpop.eup %5089 }
 0x468   : > { %5095 = vrcp.f32 %v2265_v55  ;;  %v2427_v49 = vmul.f32 %v5090_v63, %v6455_v32  ;;  %v2283_v20 = vpop.xlane.xlu1 %2282  ;;  %v7484_v55 = vld [vmem:[#allocation19_spill] sm:$0xff] }
 0x469   : > { %4673 = vmatprep.mubr.f32.mxu1 %v2424_v6  ;;  %5097 = vrcp.f32 %v6659_v58 }
 0x46a   : > { %v5092_v45 = vpop.eup %5091  ;;  %4674 = vmatmul.mubr.f32.gmra.mrb[60].mxu1 %v2425_v21 }
 0x46b   : > { %v2269_v44 = vpop.xlane.xlu0 %2268  ;;  %v2426_v52 = vmul.f32 %v5092_v45, %v6523_v31 }
 0x46c   : > { %5099 = vrcp.f32 %v2269_v44  ;;  %v2287_v31 = vpop.xlane.xlu1 %2286  ;;  %v7485_v44 = vld [vmem:[#allocation20_spill] sm:$0xff] }
 0x46d   : > { %4676 = vmatprep.mubr.f32.mxu1 %v2426_v52 }
 0x46e   : > { %4677 = vmatmul.mubr.f32.gmra.mrb[62].mxu1 %v2427_v49  ;;  %v5094_v35 = vpop.eup %5093 }
 0x46f   : > { %v2275_v1 = vpop.xlane.xlu0 %2274  ;;  %v2429_v38 = vmul.f32 %v5094_v35, %v6531_v57 }
 0x470   : > { %5101 = vrcp.f32 %v2275_v1 }
 0x472   : > { %v5096_v13 = vpop.eup %5095 }
 0x473   : > { %v2273_v8 = vpop.xlane.xlu0 %2272  ;;  %v2428_v0 = vmul.f32 %v5096_v13, %v6540_v43  ;;  %v5098_v58 = vpop.eup %5097  ;;  %v7486_v13 = vld [vmem:[#allocation2_spill] sm:$0xff] }
 0x474   : > { %5103 = vrcp.f32 %v2273_v8  ;;  %v2431_v54 = vmul.f32 %v5098_v58, %v6477_v50  ;;  %v2291_v43 = vpop.xlane.xlu1 %2290  ;;  %v7487_v58 = vld [vmem:[#allocation6_spill] sm:$0xff] }
 0x475   : > { %4679 = vmatprep.mubr.f32.mxu1 %v2428_v0  ;;  %5105 = vrcp.f32 %v2279_v37 }
 0x476   : > { %v5100_v48 = vpop.eup %5099  ;;  %4680 = vmatmul.mubr.f32.gmra.mrb[64].mxu1 %v2429_v38 }
 0x477   : > { %v2277_v32 = vpop.xlane.xlu0 %2276  ;;  %v2430_v11 = vmul.f32 %v5100_v48, %v6546_v15 }
 0x478   : > { %5107 = vrcp.f32 %v2277_v32  ;;  %v2295_v3 = vpop.xlane.xlu1 %2294  ;;  %v2963_v32 = vld [vmem:[%s7401_s3 + $0x10] sm:$0xff] }
 0x479   : > { %4682 = vmatprep.mubr.f32.mxu1 %v2430_v11  ;;  %5109 = vrcp.f32 %v2283_v20 }
 0x47a   : > { %4683 = vmatmul.mubr.f32.gmra.mrb[66].mxu1 %v2431_v54  ;;  %v5102_v59 = vpop.eup %5101  ;;  %v7488_v54 = vld [vmem:[#allocation9_spill] sm:$0xff] }
 0x47b   : > { %v2281_v26 = vpop.xlane.xlu0 %2280  ;;  %v2433_v9 = vmul.f32 %v5102_v59, %v6552_v27  ;;  %v2971_v59 = vld [vmem:[%s7401_s3 + $0x50] sm:$0xff] }
 0x47c   : > { %5111 = vrcp.f32 %v2281_v26  ;;  %v2299_v47 = vpop.xlane.xlu1 %2298 }
 0x47d   : > { %5113 = vrcp.f32 %v2287_v31  ;;  %v2964_v31 = vld [vmem:[%s7401_s3 + $0x18] sm:$0xff] }
 0x47e   : > { %v5104_v57 = vpop.eup %5103 }
 0x47f   : > { %v2285_v14 = vpop.xlane.xlu0 %2284  ;;  %v2432_v17 = vmul.f32 %v5104_v57, %v6558_v22  ;;  %v5106_v51 = vpop.eup %5105 }
 0x480   : > { %5115 = vrcp.f32 %v2285_v14  ;;  %v2435_v36 = vmul.f32 %v5106_v51, %v6495_v25  ;;  %v2303_v46 = vpop.xlane.xlu1 %2302  ;;  %v4863_v14 = vpack.c.bf16 %v2971_v59, %v2963_v32  ;;  %v7489_v51 = vld [vmem:[#allocation13_spill] sm:$0xff]  ;;  %v2978_v32 = vld [vmem:[%s7401_s3 + $0x88] sm:$0xf] }
 0x481   : > { %4685 = vmatprep.mubr.f32.mxu1 %v2432_v17  ;;  %5117 = vrcp.f32 %v2291_v43 }
 0x482   : > { %v5108_v15 = vpop.eup %5107  ;;  %4686 = vmatmul.mubr.f32.gmra.mrb[68].mxu1 %v2433_v9 }
 0x483   : > { %v2289_v50 = vpop.xlane.xlu0 %2288  ;;  %v2434_v10 = vmul.f32 %v5108_v15, %v6564_v33  ;;  %v5110_v5 = vpop.eup %5109 }
 0x484   : > { %5119 = vrcp.f32 %v2289_v50  ;;  %v2437_v34 = vmul.f32 %v5110_v5, %v6503_v4  ;;  %v2307_v62 = vpop.xlane.xlu1 %2306 }
 0x485   : > { %4688 = vmatprep.mubr.f32.mxu1 %v2434_v10  ;;  %5121 = vrcp.f32 %v2295_v3  ;;  %v7490_v3 = vld [vmem:[#allocation3_spill] sm:$0xff] }
 0x486   : > { %v5112_v39 = vpop.eup %5111  ;;  %4689 = vmatmul.mubr.f32.gmra.mrb[70].mxu1 %v2435_v36 }
 0x487   : > { %v2293_v22 = vpop.xlane.xlu0 %2292  ;;  %v2436_v27 = vmul.f32 %v5112_v39, %v6571_v19  ;;  %v5114_v29 = vpop.eup %5113  ;;  %v7491_v39 = vld [vmem:[#allocation7_spill] sm:$0xff] }
 0x488   : > { %5123 = vrcp.f32 %v2293_v22  ;;  %v2439_v30 = vmul.f32 %v5114_v29, %v7483_v53  ;;  %v2311_v37 = vpop.xlane.xlu1 %2310 }
 0x489   : > { %4691 = vmatprep.mubr.f32.mxu1 %v2436_v27  ;;  %5125 = vrcp.f32 %v2299_v47  ;;  %v7492_v27 = vld [vmem:[#allocation4_spill] sm:$0xff] }
 0x48a   : > { %v5116_v16 = vpop.eup %5115  ;;  %4692 = vmatmul.mubr.f32.gmra.mrb[72].mxu1 %v2437_v34 }
 0x48b   : > { %v2297_v33 = vpop.xlane.xlu0 %2296  ;;  %v2438_v25 = vmul.f32 %v5116_v16, %v6578_v42  ;;  %v5118_v23 = vpop.eup %5117  ;;  %v7493_v16 = vld [vmem:[#allocation8_spill] sm:$0xff] }
 0x48c   : > { %5127 = vrcp.f32 %v2297_v33  ;;  %v2441_v6 = vmul.f32 %v5118_v23, %v7484_v55  ;;  %v2315_v35 = vpop.xlane.xlu1 %2314  ;;  %v2962_v23 = vld [vmem:[%s7401_s3 + $0x8] sm:$0xff] }
 0x48d   : > { %4694 = vmatprep.mubr.f32.mxu1 %v2438_v25  ;;  %5129 = vrcp.f32 %v2303_v46  ;;  %v7494_v25 = vld [vmem:[#allocation11_spill] sm:$0xff] }
 0x48e   : > { %v5120_v40 = vpop.eup %5119  ;;  %4695 = vmatmul.mubr.f32.gmra.mrb[74].mxu1 %v2439_v30 }
 0x48f   : > { %v2301_v19 = vpop.xlane.xlu0 %2300  ;;  %v2440_v4 = vmul.f32 %v5120_v40, %v6584_v2  ;;  %v5122_v21 = vpop.eup %5121  ;;  %v2970_v40 = vld [vmem:[%s7401_s3 + $0x48] sm:$0xff] }
 0x490   : > { %5131 = vrcp.f32 %v2301_v19  ;;  %v2443_v52 = vmul.f32 %v5122_v21, %v7485_v44  ;;  %v2319_v11 = vpop.xlane.xlu1 %2318  ;;  %v2961_v19 = vld [vmem:[%s7401_s3] sm:$0xff]  ;;  %v4857_v55 = vpack.c.bf16 %v2970_v40, %v2962_v23  ;;  %v7496_v21 = vld [vmem:[#allocation5_spill] sm:$0xff] }
 0x491   : > { %4697 = vmatprep.mubr.f32.mxu1 %v2440_v4  ;;  %5133 = vrcp.f32 %v2307_v62  ;;  %v7495_v4 = vld [vmem:[#allocation15_spill] sm:$0xff]  ;;  %v5166_v23 = vld [vmem:[%s7400_s2 + $0x1f8] sm:$0xff] }
 0x492   : > { %v5124_v63 = vpop.eup %5123  ;;  %4698 = vmatmul.mubr.f32.gmra.mrb[76].mxu1 %v2441_v6  ;;  %v2969_v6 = vld [vmem:[%s7401_s3 + $0x40] sm:$0xff]  ;;  %4858 = vmatprep.subr.bf16.mxu1 %v4857_v55  ;;  %v5168_v55 = vld [vmem:[%s7400_s2 + $0x1f0] sm:$0xff] }
 0x493   : > { %v2305_v42 = vpop.xlane.xlu0 %2304  ;;  %v2442_v45 = vmul.f32 %v5124_v63, %v6590_v7  ;;  %v5126_v49 = vpop.eup %5125 }
 0x494   : > { %5135 = vrcp.f32 %v2305_v42  ;;  %v2445_v8 = vmul.f32 %v5126_v49, %v7486_v13  ;;  %v4859_v42 = vpack.c.bf16 %v2969_v6, %v2961_v19 }
 0x495   : > { %4700 = vmatprep.mubr.f32.mxu1 %v2442_v45  ;;  %5137 = vrcp.f32 %v2311_v37  ;;  %v7497_v37 = vld [vmem:[#allocation10_spill] sm:$0xff] }
 0x496   : > { %v5128_v1 = vpop.eup %5127  ;;  %4701 = vmatmul.mubr.f32.gmra.mrb[78].mxu1 %v2443_v52 }
 0x497   : > { %v2309_v2 = vpop.xlane.xlu0 %2308  ;;  %v2444_v20 = vmul.f32 %v5128_v1, %v6595_v60  ;;  %v5130_v0 = vpop.eup %5129  ;;  %v2972_v60 = vld [vmem:[%s7401_s3 + $0x58] sm:$0xff]  ;;  %4860 = vmatpush1.bf16.msra.mxu1 %v4859_v42 }
 0x498   : > { %5139 = vrcp.f32 %v2309_v2  ;;  %v2447_v26 = vmul.f32 %v5130_v0, %v7488_v54  ;;  %v4861_v43 = vpack.c.bf16 %v2972_v60, %v2964_v31  ;;  %4023 = vmatprep.subr.msk.mxu1 %vm477_vm0, %v2978_v32 }
 0x499   : > { %4703 = vmatprep.mubr.f32.mxu1 %v2444_v20  ;;  %5141 = vrcp.f32 %v2315_v35 }
 0x49a   : > { %v5132_v38 = vpop.eup %5131  ;;  %4704 = vmatmul.mubr.f32.gmra.mrb[80].mxu1 %v2445_v8  ;;  %4862 = vmatprep.subr.bf16.mxu0 %v4861_v43 }
 0x49b   : > { %v2313_v7 = vpop.xlane.xlu0 %2312  ;;  %v2446_v48 = vmul.f32 %v5132_v38, %v7487_v58  ;;  %v5134_v57 = vpop.eup %5133  ;;  %4864 = vmatpush1.bf16.msra.mxu0 %v4863_v14  ;;  %v2980_v58 = vld [vmem:[%s7401_s3 + $0x98] sm:$0xf] }
 0x49c   : > { %5143 = vrcp.f32 %v2313_v7  ;;  %v2449_v50 = vmul.f32 %v5134_v57, %v7490_v3  ;;  %4041 = vmatprep.subr.msk.mxu0 %vm477_vm0, %v2980_v58  ;;  %v5174_v58 = vld [vmem:[%s7400_s2 + $0x218] sm:$0xff] }
 0x49d   : > { %4706 = vmatprep.mubr.f32.mxu1 %v2446_v48  ;;  %5145 = vrcp.f32 %v2319_v11  ;;  %v2977_v11 = vld [vmem:[%s7401_s3 + $0x80] sm:$0xf] }
 0x49e   : > { %v5136_v17 = vpop.eup %5135  ;;  %4707 = vmatmul.mubr.f32.gmra.mrb[82].mxu1 %v2447_v26 }
 0x49f   : > { %v2317_v9 = vpop.xlane.xlu0 %2316  ;;  %v2448_v15 = vmul.f32 %v5136_v17, %v7489_v51  ;;  %v5138_v10 = vpop.eup %5137  ;;  %4024 = vmatpush1.msk.msra.mxu1 %vm477_vm0, %v2977_v11 }
 0x4a0   : > { %5147 = vrcp.f32 %v2317_v9  ;;  %v2451_v47 = vmul.f32 %v5138_v10, %v7492_v27  ;;  %v5237_v9 = vmov 0.0  }
 0x4a1   : > { %4709 = vmatprep.mubr.f32.mxu1 %v2448_v15  ;;  %3254 = vmatprep.mubr.f32.mxu0 %v5237_v9 }
 0x4a2   : > { %v5140_v36 = vpop.eup %5139  ;;  %4710 = vmatmul.mubr.f32.gmra.mrb[84].mxu1 %v2449_v50 }
 0x4a3   : > { %v2321_v5 = vpop.xlane.xlu0 %2320  ;;  %v2450_v22 = vmul.f32 %v5140_v36, %v7491_v39  ;;  %v5142_v34 = vpop.eup %5141  ;;  %v2976_v39 = vld [vmem:[%s7401_s3 + $0x78] sm:$0xff] }
 0x4a4   : > { %5149 = vrcp.f32 %v2321_v5  ;;  %v2453_v46 = vmul.f32 %v5142_v34, %v7494_v25 }
 0x4a5   : > { %4712 = vmatprep.mubr.f32.mxu1 %v2450_v22 }
 0x4a6   : > { %v5144_v29 = vpop.eup %5143  ;;  %4713 = vmatmul.mubr.f32.gmra.mrb[86].mxu1 %v2451_v47 }
 0x4a7   : > { %v2452_v33 = vmul.f32 %v5144_v29, %v7493_v16  ;;  %v5146_v53 = vpop.eup %5145  ;;  %v2966_v16 = vld [vmem:[%s7401_s3 + $0x28] sm:$0xff] }
 0x4a8   : > { %v2455_v63 = vmul.f32 %v5146_v53, %v7496_v21  ;;  %v5165_v53 = vld [vmem:[%s7400_s2 + $0x178] sm:$0xff] }
 0x4a9   : > { %4715 = vmatprep.mubr.f32.mxu1 %v2452_v33  ;;  %v2974_v33 = vld [vmem:[%s7401_s3 + $0x68] sm:$0xff] }
 0x4aa   : > { %v5148_v30 = vpop.eup %5147  ;;  %4716 = vmatmul.mubr.f32.gmra.mrb[88].mxu1 %v2453_v46  ;;  %v4865_v25 = vpack.c.bf16 %v2974_v33, %v2966_v16 }
 0x4ab   : > { %v2454_v62 = vmul.f32 %v5148_v30, %v7495_v4  ;;  %v5167_v4 = vld [vmem:[%s7400_s2 + $0x170] sm:$0xff] }
 0x4ac   : > { %4866 = vmatprep.subr.bf16.mxu1 %v4865_v25  ;;  %v5183_v25 = vld [vmem:[%s7400_s2 + $0x1b0] sm:$0xff] }
 0x4ad   : > { %4718 = vmatprep.mubr.f32.mxu1 %v2454_v62 }
 0x4ae   : > { %v5150_v45 = vpop.eup %5149  ;;  %4719 = vmatmul.mubr.f32.gmra.mrb[90].mxu1 %v2455_v63 }
 0x4af   : > { %v2456_v44 = vmul.f32 %v5150_v45, %v7497_v37  ;;  %v5169_v45 = vld [vmem:[%s7400_s2 + $0x188] sm:$0xff] }
 0x4b1   : > { %4721 = vmatprep.mubr.f32.mxu1 %v2456_v44  ;;  %v5170_v44 = vld [vmem:[%s7400_s2 + $0x208] sm:$0xff] }
 0x4bb   : > { %v2323_v52 = vpop.xlane.xlu1 %2322 }
 0x4bc   : > { %5151 = vrcp.f32 %v2323_v52 }
 0x4c3   : > { %v2325_v49 = vpop.xlane.xlu0 %2324 }
 0x4c4   : > { %5153 = vrcp.f32 %v2325_v49 }
 0x4c6   : > { %v5152_v1 = vpop.eup %5151 }
 0x4c7   : > { %v2457_v2 = vmul.f32 %v5152_v1, %v6629_v61  ;;  %v2979_v61 = vld [vmem:[%s7401_s3 + $0x90] sm:$0xf]  ;;  %v5171_v1 = vld [vmem:[%s7400_s2 + $0x180] sm:$0xff] }
 0x4c8   : > { %4042 = vmatpush1.msk.msra.mxu0 %vm477_vm0, %v2979_v61 }
 0x4c9   : > { %4722 = vmatmul.mubr.f32.gmra.mrb[92].mxu1 %v2457_v2 }
 0x4cb   : > { %v2327_v20 = vpop.xlane.xlu1 %2326 }
 0x4cc   : > { %5155 = vrcp.f32 %v2327_v20  ;;  %v5172_v20 = vld [vmem:[%s7400_s2 + $0x200] sm:$0xff] }
 0x4ce   : > { %v5154_v35 = vpop.eup %5153 }
 0x4cf   : > { %v2458_v13 = vmul.f32 %v5154_v35, %v6635_v24 }
 0x4d1   : > { %4724 = vmatprep.mubr.f32.mxu1 %v2458_v13 }
 0x4d3   : > { %v2329_v8 = vpop.xlane.xlu0 %2328 }
 0x4d4   : > { %5157 = vrcp.f32 %v2329_v8 }
 0x4d6   : > { %v5156_v0 = vpop.eup %5155 }
 0x4d7   : > { %v2459_v38 = vmul.f32 %v5156_v0, %v6644_v56 }
 0x4d9   : > { %4725 = vmatmul.mubr.f32.gmra.mrb[94].mxu1 %v2459_v38  ;;  %v5173_v38 = vld [vmem:[%s7400_s2 + $0x198] sm:$0xff] }
 0x4db   : > { %v2331_v7 = vpop.xlane.xlu1 %2330 }
 0x4dc   : > { %5159 = vrcp.f32 %v2331_v7 }
 0x4de   : > { %v5158_v48 = vpop.eup %5157 }
 0x4df   : > { %v2460_v24 = vmul.f32 %v5158_v48, %v6653_v12 }
 0x4e1   : > { %4727 = vmatprep.mubr.f32.mxu1 %v2460_v24  ;;  %v5175_v24 = vld [vmem:[%s7400_s2 + $0x190] sm:$0xff] }
 0x4e3   : > { %v2333_v56 = vpop.xlane.xlu0 %2332 }
 0x4e4   : > { %5161 = vrcp.f32 %v2333_v56 }
 0x4e6   : > { %v5160_v31 = vpop.eup %5159 }
 0x4e7   : > { %v2461_v60 = vmul.f32 %v5160_v31, %v6661_v28  ;;  %v5176_v31 = vld [vmem:[%s7400_s2 + $0x210] sm:$0xff] }
 0x4e9   : > { %4728 = vmatmul.mubr.f32.gmra.mrb[96].mxu1 %v2461_v60 }
 0x4eb   : > { %v2335_v12 = vpop.xlane.xlu1 %2334 }
 0x4ec   : > { %5163 = vrcp.f32 %v2335_v12 }
 0x4ee   : > { %v5162_v54 = vpop.eup %5161 }
 0x4ef   : > { %v2462_v26 = vmul.f32 %v5162_v54, %v6669_v18  ;;  %v5177_v54 = vld [vmem:[%s7400_s2 + $0x1a8] sm:$0xff] }
 0x4f0   : > { %v4639_v43 = vpop.f32.mrb[36].mxu1 }
 0x4f1   : > { %4730 = vmatprep.mubr.f32.mxu1 %v2462_v26  ;;  %v2530_v28 = vpop.f32.mrb[37].mxu1  ;;  %v2850_v30 = vmul.f32 %v5165_v53, %v4639_v43  ;;  %v5178_v43 = vld [vmem:[%s7400_s2 + $0x228] sm:$0xff]  ;;  %v5184_v53 = vld [vmem:[%s7400_s2 + $0x230] sm:$0xff] }
 0x4f2   : > { %v2849_v62 = vmul.f32 %v5167_v4, %v2530_v28 }
 0x4f6   : > { %v5164_v59 = vpop.eup %5163 }
 0x4f7   : > { %v2463_v57 = vmul.f32 %v5164_v59, %v6675_v41  ;;  %v2968_v41 = vld [vmem:[%s7401_s3 + $0x38] sm:$0xff] }
 0x4f8   : > { %v4642_v14 = vpop.f32.mrb[38].mxu1  ;;  %v4869_v22 = vpack.c.bf16 %v2976_v39, %v2968_v41  ;;  %v5181_v39 = vld [vmem:[%s7400_s2 + $0x1b8] sm:$0xff] }
 0x4f9   : > { %4731 = vmatmul.mubr.f32.gmra.mrb[98].mxu1 %v2463_v57  ;;  %v2540_v17 = vpop.f32.mrb[39].mxu1  ;;  %v2852_v37 = vmul.f32 %v5169_v45, %v4642_v14  ;;  %v5179_v57 = vld [vmem:[%s7400_s2 + $0x1a0] sm:$0xff] }
 0x4fa   : > { %3121 = vmatprep.mubr.f32.mxu1 %v5237_v9  ;;  %4870 = vmatprep.subr.bf16.mxu0 %v4869_v22  ;;  %v2851_v2 = vmul.f32 %v5171_v1, %v2540_v17  ;;  %v5180_v17 = vld [vmem:[%s7400_s2 + $0x220] sm:$0xff] }
 0x4fb   : > { %v5188_v45 = vld [vmem:[%s7400_s2 + $0x240] sm:$0xff] }
 0x501   : > { %v4645_v51 = vpop.f32.mrb[40].mxu1 }
 0x502   : > { %v2550_v15 = vpop.f32.mrb[41].mxu1  ;;  %v2854_v7 = vmul.f32 %v5173_v38, %v4645_v51  ;;  %v5192_v38 = vld [vmem:[%s7400_s2 + $0x250] sm:$0xff] }
 0x503   : > { %v2853_v56 = vmul.f32 %v5175_v24, %v2550_v15 }
 0x506   : > { %v4648_v3 = vpop.f32.mrb[42].mxu1 }
 0x507   : > { %v2560_v50 = vpop.f32.mrb[43].mxu1  ;;  %v2856_v26 = vmul.f32 %v5177_v54, %v4648_v3  ;;  %v5196_v54 = vld [vmem:[%s7400_s2 + $0x260] sm:$0xff] }
 0x508   : > { %v2855_v14 = vmul.f32 %v5179_v57, %v2560_v50  ;;  %v5182_v50 = vld [vmem:[%s7400_s2 + $0x238] sm:$0xff] }
 0x50e   : > { %v6764_v10 = vpop.f32.mrb[44].mxu1 }
 0x50f   : > { %v6766_v18 = vpop.f32.mrb[45].mxu1  ;;  %v2858_v22 = vmul.f32 %v5181_v39, %v6764_v10 }
 0x512   : > { %v6768_v36 = vpop.f32.mrb[46].mxu1 }
 0x513   : > { %v6770_v5 = vpop.f32.mrb[47].mxu1 }
 0x519   : > { %v6778_v27 = vpop.f32.mrb[48].mxu1 }
 0x51a   : > { %v6780_v47 = vpop.f32.mrb[49].mxu1 }
 0x51e   : > { %v6782_v34 = vpop.f32.mrb[50].mxu1 }
 0x51f   : > { %v6784_v29 = vpop.f32.mrb[51].mxu1 }
 0x526   : > { %v4663_v46 = vpop.f32.mrb[52].mxu1 }
 0x527   : > { %v2866_v40 = vmul.f32 %v5166_v23, %v4663_v46  ;;  %v2610_v19 = vpop.f32.mrb[53].mxu1  ;;  %v2857_v46 = vmul.f32 %v5183_v25, %v6766_v18  ;;  %v5186_v18 = vld [vmem:[%s7400_s2 + $0x248] sm:$0xff] }
 0x528   : > { %v2865_v6 = vmul.f32 %v5168_v55, %v2610_v19  ;;  %v5185_v19 = vld [vmem:[%s7400_s2 + $0x1c8] sm:$0xff] }
 0x529   : > { %v6804_v21 = vadd.f32 %v2866_v40, %v2850_v30  ;;  %v2860_v4 = vmul.f32 %v5185_v19, %v6768_v36  ;;  %v5202_v19 = vld [vmem:[%s7400_s2 + $0x290] sm:$0xff] }
 0x52a   : > { %v6806_v63 = vadd.f32 %v2865_v6, %v2849_v62  ;;  %v4666_v42 = vpop.f32.mrb[54].mxu1  ;;  %v5187_v6 = vld [vmem:[%s7400_s2 + $0x1c0] sm:$0xff] }
 0x52b   : > { %v2868_v52 = vmul.f32 %v5170_v44, %v4666_v42  ;;  %v2620_v49 = vpop.f32.mrb[55].mxu1  ;;  %v2859_v42 = vmul.f32 %v5187_v6, %v6770_v5  ;;  %v5190_v5 = vld [vmem:[%s7400_s2 + $0x258] sm:$0xff] }
 0x52c   : > { %v2867_v35 = vmul.f32 %v5172_v20, %v2620_v49  ;;  %v5189_v49 = vld [vmem:[%s7400_s2 + $0x1d8] sm:$0xff] }
 0x52d   : > { %v6820_v13 = vadd.f32 %v2868_v52, %v2852_v37  ;;  %v2862_v1 = vmul.f32 %v5189_v49, %v6778_v27 }
 0x52e   : > { %v6822_v8 = vadd.f32 %v2867_v35, %v2851_v2  ;;  %v5191_v35 = vld [vmem:[%s7400_s2 + $0x1d0] sm:$0xff] }
 0x531   : > { %v4669_v0 = vpop.f32.mrb[56].mxu1 }
 0x532   : > { %v2870_v61 = vmul.f32 %v5174_v58, %v4669_v0  ;;  %v2630_v48 = vpop.f32.mrb[57].mxu1  ;;  %v2861_v0 = vmul.f32 %v5191_v35, %v6780_v47  ;;  %v5194_v47 = vld [vmem:[%s7400_s2 + $0x268] sm:$0xff] }
 0x533   : > { %v2869_v60 = vmul.f32 %v5176_v31, %v2630_v48  ;;  %v5193_v48 = vld [vmem:[%s7400_s2 + $0x1e8] sm:$0xff] }
 0x534   : > { %v6836_v32 = vadd.f32 %v2870_v61, %v2854_v7  ;;  %v2864_v24 = vmul.f32 %v5193_v48, %v6782_v34  ;;  %v5207_v35 = vld [vmem:[%s7400_s2 + $0x2c8] sm:$0xff] }
 0x535   : > { %v6838_v11 = vadd.f32 %v2869_v60, %v2853_v56  ;;  %v5195_v60 = vld [vmem:[%s7400_s2 + $0x1e0] sm:$0xff] }
 0x536   : > { %v4672_v12 = vpop.f32.mrb[58].mxu1 }
 0x537   : > { %v2872_v28 = vmul.f32 %v5178_v43, %v4672_v12  ;;  %v2640_v59 = vpop.f32.mrb[59].mxu1  ;;  %v2863_v12 = vmul.f32 %v5195_v60, %v6784_v29  ;;  %v5198_v29 = vld [vmem:[%s7400_s2 + $0x270] sm:$0xff] }
 0x538   : > { %v2871_v51 = vmul.f32 %v5180_v17, %v2640_v59  ;;  %v5197_v59 = vld [vmem:[%s7400_s2 + $0x278] sm:$0xff] }
 0x539   : > { %v6852_v15 = vadd.f32 %v2872_v28, %v2856_v26 }
 0x53a   : > { %v6854_v41 = vadd.f32 %v2871_v51, %v2855_v14 }
 0x53d   : > { %v4675_v3 = vpop.f32.mrb[60].mxu1 }
 0x53e   : > { %v2874_v16 = vmul.f32 %v5182_v50, %v4675_v3  ;;  %v2650_v33 = vpop.f32.mrb[61].mxu1 }
 0x53f   : > { %v2873_v30 = vmul.f32 %v5184_v53, %v2650_v33  ;;  %v5200_v33 = vld [vmem:[%s7400_s2 + $0x280] sm:$0xff]  ;;  %v5201_v53 = vld [vmem:[%s7400_s2 + $0x298] sm:$0xff] }
 0x540   : > { %v6870_v23 = vadd.f32 %v2874_v16, %v2858_v22  ;;  %v5199_v22 = vld [vmem:[%s7400_s2 + $0x288] sm:$0xff] }
 0x541   : > { %v6872_v10 = vadd.f32 %v2873_v30, %v2857_v46  ;;  %v4678_v40 = vpop.f32.mrb[62].mxu1 }
 0x542   : > { %v2876_v62 = vmul.f32 %v5186_v18, %v4678_v40  ;;  %v2660_v55 = vpop.f32.mrb[63].mxu1 }
 0x543   : > { %v2875_v37 = vmul.f32 %v5188_v45, %v2660_v55 }
 0x544   : > { %v6888_v44 = vadd.f32 %v2876_v62, %v2860_v4  ;;  %v5203_v62 = vld [vmem:[%s7400_s2 + $0x2a8] sm:$0xff] }
 0x545   : > { %v6890_v36 = vadd.f32 %v2875_v37, %v2859_v42  ;;  %v5204_v42 = vld [vmem:[%s7400_s2 + $0x2a0] sm:$0xff] }
 0x549   : > { %v4681_v52 = vpop.f32.mrb[64].mxu1 }
 0x54a   : > { %v2878_v2 = vmul.f32 %v5190_v5, %v4681_v52  ;;  %v2670_v20 = vpop.f32.mrb[65].mxu1  ;;  %v5205_v52 = vld [vmem:[%s7400_s2 + $0x2b8] sm:$0xff]  ;;  %v5206_v5 = vld [vmem:[%s7400_s2 + $0x2b0] sm:$0xff] }
 0x54b   : > { %v2877_v7 = vmul.f32 %v5192_v38, %v2670_v20 }
 0x54c   : > { %v6906_v58 = vadd.f32 %v2878_v2, %v2862_v1 }
 0x54d   : > { %v6908_v27 = vadd.f32 %v2877_v7, %v2861_v0  ;;  %v4684_v61 = vpop.f32.mrb[66].mxu1  ;;  %v5208_v7 = vld [vmem:[%s7400_s2 + $0x2c0] sm:$0xff] }
 0x54e   : > { %v2880_v56 = vmul.f32 %v5194_v47, %v4684_v61  ;;  %v2680_v31 = vpop.f32.mrb[67].mxu1 }
 0x54f   : > { %v2879_v26 = vmul.f32 %v5196_v54, %v2680_v31  ;;  %v5210_v31 = vld [vmem:[%s7400_s2 + $0x2d0] sm:$0xff]  ;;  %v5211_v54 = vld [vmem:[%s7400_s2 + $0x2e8] sm:$0xff] }
 0x550   : > { %v6924_v43 = vadd.f32 %v2880_v56, %v2864_v24  ;;  %v5209_v24 = vld [vmem:[%s7400_s2 + $0x2d8] sm:$0xff] }
 0x551   : > { %v6926_v34 = vadd.f32 %v2879_v26, %v2863_v12 }
 0x555   : > { %v4687_v28 = vpop.f32.mrb[68].mxu1 }
 0x556   : > { %v2882_v57 = vmul.f32 %v5197_v59, %v4687_v28  ;;  %v2690_v14 = vpop.f32.mrb[69].mxu1  ;;  %v5212_v59 = vld [vmem:[%s7400_s2 + $0x2e0] sm:$0xff] }
 0x557   : > { %v2881_v17 = vmul.f32 %v5198_v29, %v2690_v14  ;;  %v2967_v29 = vld [vmem:[%s7401_s3 + $0x30] sm:$0xff] }
 0x558   : > { %v6935_v51 = vadd.f32 %v6804_v21, %v2882_v57 }
 0x559   : > { %v6938_v3 = vadd.f32 %v6806_v63, %v2881_v17  ;;  %v4690_v39 = vpop.f32.mrb[70].mxu1  ;;  %v5213_v17 = vld [vmem:[%s7400_s2 + $0x2f8] sm:$0xff] }
 0x55a   : > { %v2884_v50 = vmul.f32 %v5199_v22, %v4690_v39  ;;  %v2700_v16 = vpop.f32.mrb[71].mxu1 }
 0x55b   : > { %v2883_v25 = vmul.f32 %v5200_v33, %v2700_v16  ;;  %v5214_v16 = vld [vmem:[%s7400_s2 + $0x2f0] sm:$0xff] }
 0x55c   : > { %v6947_v46 = vadd.f32 %v6820_v13, %v2884_v50  ;;  %v2975_v50 = vld [vmem:[%s7401_s3 + $0x70] sm:$0xff] }
 0x55d   : > { %v6950_v21 = vadd.f32 %v6822_v8, %v2883_v25  ;;  %v4693_v63 = vpop.f32.mrb[72].mxu1 }
 0x55e   : > { %v2886_v30 = vmul.f32 %v5201_v53, %v4693_v63  ;;  %v2710_v40 = vpop.f32.mrb[73].mxu1 }
 0x55f   : > { %v2885_v4 = vmul.f32 %v5202_v19, %v2710_v40  ;;  %v5215_v19 = vld [vmem:[%s7400_s2 + $0x308] sm:$0xff] }
 0x560   : > { %v6959_v18 = vadd.f32 %v6836_v32, %v2886_v30  ;;  %v4871_v30 = vpack.c.bf16 %v2975_v50, %v2967_v29 }
 0x561   : > { %v6962_v13 = vadd.f32 %v6838_v11, %v2885_v4  ;;  %v4696_v8 = vpop.f32.mrb[74].mxu1 }
 0x562   : > { %v2888_v55 = vmul.f32 %v5203_v62, %v4696_v8  ;;  %v2720_v6 = vpop.f32.mrb[75].mxu1  ;;  %v5216_v62 = vld [vmem:[%s7400_s2 + $0x300] sm:$0xff] }
 0x563   : > { %v2887_v45 = vmul.f32 %v5204_v42, %v2720_v6 }
 0x564   : > { %v6971_v37 = vadd.f32 %v6852_v15, %v2888_v55 }
 0x565   : > { %v6974_v32 = vadd.f32 %v6854_v41, %v2887_v45  ;;  %v4699_v11 = vpop.f32.mrb[76].mxu1 }
 0x566   : > { %v2890_v49 = vmul.f32 %v5205_v52, %v4699_v11  ;;  %v2730_v1 = vpop.f32.mrb[77].mxu1  ;;  %v5217_v11 = vld [vmem:[%s7400_s2 + $0x318] sm:$0xff] }
 0x567   : > { %v2889_v2 = vmul.f32 %v5206_v5, %v2730_v1  ;;  %v5218_v1 = vld [vmem:[%s7400_s2 + $0x310] sm:$0xff] }
 0x568   : > { %v6983_v20 = vadd.f32 %v6870_v23, %v2890_v49 }
 0x569   : > { %v6986_v15 = vadd.f32 %v6872_v10, %v2889_v2  ;;  %v4702_v41 = vpop.f32.mrb[78].mxu1 }
 0x56a   : > { %v2892_v0 = vmul.f32 %v5207_v35, %v4702_v41  ;;  %v2740_v38 = vpop.f32.mrb[79].mxu1 }
 0x56b   : > { %v2891_v61 = vmul.f32 %v5208_v7, %v2740_v38 }
 0x56c   : > { %v6995_v48 = vadd.f32 %v6888_v44, %v2892_v0  ;;  %v5219_v0 = vld [vmem:[%s7400_s2 + $0x328] sm:$0xff] }
 0x56d   : > { %v6998_v23 = vadd.f32 %v6890_v36, %v2891_v61  ;;  %v4705_v10 = vpop.f32.mrb[80].mxu1 }
 0x56e   : > { %v2894_v47 = vmul.f32 %v5209_v24, %v4705_v10  ;;  %v2750_v56 = vpop.f32.mrb[81].mxu1 }
 0x56f   : > { %v2893_v60 = vmul.f32 %v5210_v31, %v2750_v56  ;;  %v5222_v56 = vld [vmem:[%s7400_s2 + $0x330] sm:$0xff] }
 0x570   : > { %v7007_v12 = vadd.f32 %v6906_v58, %v2894_v47 }
 0x571   : > { %v7010_v44 = vadd.f32 %v6908_v27, %v2893_v60  ;;  %v4708_v36 = vpop.f32.mrb[82].mxu1 }
 0x572   : > { %v2896_v26 = vmul.f32 %v5211_v54, %v4708_v36  ;;  %v2760_v28 = vpop.f32.mrb[83].mxu1 }
 0x573   : > { %v2895_v57 = vmul.f32 %v5212_v59, %v2760_v28  ;;  %v5224_v28 = vld [vmem:[%s7400_s2 + $0x340] sm:$0xff] }
 0x574   : > { %v7019_v14 = vadd.f32 %v6924_v43, %v2896_v26  ;;  %v2965_v43 = vld [vmem:[%s7401_s3 + $0x20] sm:$0xff] }
 0x575   : > { %v7022_v58 = vadd.f32 %v6926_v34, %v2895_v57  ;;  %v4711_v27 = vpop.f32.mrb[84].mxu1  ;;  %v2973_v34 = vld [vmem:[%s7401_s3 + $0x60] sm:$0xff] }
 0x576   : > { %v2898_v39 = vmul.f32 %v5213_v17, %v4711_v27  ;;  %v2770_v22 = vpop.f32.mrb[85].mxu1  ;;  %v4867_v40 = vpack.c.bf16 %v2973_v34, %v2965_v43 }
 0x577   : > { %v2897_v33 = vmul.f32 %v5214_v16, %v2770_v22 }
 0x578   : > { %v7043_v25 = vadd.f32 %v6935_v51, %v2898_v39  ;;  %v2984_v51 = vld [vmem:[%s7401_s3 + $0xb8] sm:$0xf]  ;;  %v5226_v39 = vld [vmem:[%s7400_s2 + $0x350] sm:$0xff] }
 0x579   : > { %v7046_v63 = vadd.f32 %v6938_v3, %v2897_v33  ;;  %v4714_v53 = vpop.f32.mrb[86].mxu1  ;;  %v2982_v3 = vld [vmem:[%s7401_s3 + $0xa8] sm:$0xf]  ;;  %v5228_v33 = vld [vmem:[%s7400_s2 + $0x360] sm:$0xff] }
 0x57a   : > { %v2900_v4 = vmul.f32 %v5215_v19, %v4714_v53  ;;  %v2780_v8 = vpop.f32.mrb[87].mxu1 }
 0x57b   : > { %v2899_v55 = vmul.f32 %v5216_v62, %v2780_v8  ;;  %4025 = vmatmul.mubr.msk.f32.vlgmr.msra.gmra.mrb[100].mxu1 %vm428_vm1, %v7046_v63  ;;  %4043 = vmatmul.mubr.msk.f32.vlgmr.msra.gmra.mrb[92].mxu0 %vm428_vm1, %v7046_v63  ;;  %v234_v62 = vld [vmem:[%s7400_s2 + $0x80] sm:$0xff] }
 0x57c   : > { %v7065_v6 = vadd.f32 %v6947_v46, %v2900_v4  ;;  %3126 = vmatprep.mubr.f32.mxu1 %v5237_v9  ;;  %3258 = vmatprep.mubr.f32.mxu0 %v5237_v9  ;;  %v2983_v46 = vld [vmem:[%s7401_s3 + $0xb0] sm:$0xf] }
 0x57d   : > { %v7070_v42 = vadd.f32 %v6950_v21, %v2899_v55  ;;  %v4717_v45 = vpop.f32.mrb[88].mxu1  ;;  %4872 = vmatpush1.bf16.msra.mxu0 %v4871_v30  ;;  %4868 = vmatpush1.bf16.msra.mxu1 %v4867_v40  ;;  %v2981_v21 = vld [vmem:[%s7401_s3 + $0xa0] sm:$0xf]  ;;  %v235_v55 = vld [vmem:[%s7400_s2 + $0x88] sm:$0xff] }
 0x57e   : > { %v2902_v52 = vmul.f32 %v5217_v11, %v4717_v45  ;;  %v2790_v49 = vpop.f32.mrb[89].mxu1  ;;  %4077 = vmatprep.subr.msk.mxu0 %vm477_vm0, %v2984_v51  ;;  %4059 = vmatprep.subr.msk.mxu1 %vm477_vm0, %v2982_v3 }
 0x57f   : > { %v2901_v5 = vmul.f32 %v5218_v1, %v2790_v49  ;;  %4026 = vmatmul.mubr.msk.f32.gmra.mrb[102].mxu1 %vm428_vm1, %v7043_v25  ;;  %4044 = vmatmul.mubr.msk.f32.gmra.mrb[94].mxu0 %vm428_vm1, %v7043_v25 }
 0x580   : > { %v7091_v2 = vadd.f32 %v6959_v18, %v2902_v52  ;;  %3131 = vmatprep.mubr.f32.mxu1 %v5237_v9  ;;  %3262 = vmatprep.mubr.f32.mxu0 %v5237_v9  ;;  %v5220_v18 = vld [vmem:[%s7400_s2 + $0x320] sm:$0xff] }
 0x581   : > { %v7096_v41 = vadd.f32 %v6962_v13, %v2901_v5  ;;  %v4720_v35 = vpop.f32.mrb[90].mxu1  ;;  %4078 = vmatpush1.msk.msra.mxu0 %vm477_vm0, %v2983_v46  ;;  %4060 = vmatpush1.msk.msra.mxu1 %vm477_vm0, %v2981_v21 }
 0x582   : > { %v2904_v38 = vmul.f32 %v5219_v0, %v4720_v35  ;;  %v2800_v7 = vpop.f32.mrb[91].mxu1 }
 0x583   : > { %v2903_v61 = vmul.f32 %v5220_v18, %v2800_v7  ;;  %4027 = vmatmul.mubr.msk.f32.gmra.mrb[104].mxu1 %vm428_vm1, %v7070_v42  ;;  %4045 = vmatmul.mubr.msk.f32.gmra.mrb[96].mxu0 %vm428_vm1, %v7070_v42 }
 0x584   : > { %v7111_v13 = vadd.f32 %v6971_v37, %v2904_v38  ;;  %3136 = vmatprep.mubr.f32.mxu1 %v5237_v9  ;;  %3266 = vmatprep.mubr.f32.mxu0 %v5237_v9 }
 0x585   : > { %v7116_v10 = vadd.f32 %v6974_v32, %v2903_v61  ;;  %v5221_v32 = vld [vmem:[%s7400_s2 + $0x338] sm:$0xff]  ;;  %v236_v61 = vld [vmem:[%s7400_s2 + $0x90] sm:$0xff] }
 0x587   : > { %4028 = vmatmul.mubr.msk.f32.gmra.mrb[106].mxu1 %vm428_vm1, %v7065_v6  ;;  %4046 = vmatmul.mubr.msk.f32.gmra.mrb[98].mxu0 %vm428_vm1, %v7065_v6 }
 0x588   : > { %3141 = vmatprep.mubr.f32.mxu1 %v5237_v9  ;;  %3270 = vmatprep.mubr.f32.mxu0 %v5237_v9 }
 0x58b   : > { %4029 = vmatmul.mubr.msk.f32.gmra.mrb[108].mxu1 %vm428_vm1, %v7096_v41  ;;  %4047 = vmatmul.mubr.msk.f32.gmra.mrb[100].mxu0 %vm428_vm1, %v7096_v41 }
 0x58c   : > { %3145 = vmatprep.mubr.f32.mxu1 %v5237_v9  ;;  %3275 = vmatprep.mubr.f32.mxu0 %v5237_v9 }
 0x58f   : > { %4030 = vmatmul.mubr.msk.f32.gmra.mrb[110].mxu1 %vm428_vm1, %v7091_v2  ;;  %4048 = vmatmul.mubr.msk.f32.gmra.mrb[102].mxu0 %vm428_vm1, %v7091_v2 }
 0x590   : > { %3149 = vmatprep.mubr.f32.mxu1 %v5237_v9  ;;  %3280 = vmatprep.mubr.f32.mxu0 %v5237_v9 }
 0x593   : > { %4031 = vmatmul.mubr.msk.f32.gmra.mrb[112].mxu1 %vm428_vm1, %v7116_v10  ;;  %4049 = vmatmul.mubr.msk.f32.gmra.mrb[104].mxu0 %vm428_vm1, %v7116_v10 }
 0x594   : > { %3153 = vmatprep.mubr.f32.mxu1 %v5237_v9  ;;  %3285 = vmatprep.mubr.f32.mxu0 %v5237_v9 }
 0x597   : > { %4032 = vmatmul.mubr.msk.f32.gmra.mrb[114].mxu1 %vm428_vm1, %v7111_v13  ;;  %4050 = vmatmul.mubr.msk.f32.gmra.mrb[106].mxu0 %vm428_vm1, %v7111_v13 }
 0x598   : > { %3157 = vmatprep.mubr.f32.mxu1 %v5237_v9  ;;  %3290 = vmatprep.mubr.f32.mxu0 %v5237_v9 }
 0x59c   : > { %v4723_v37 = vpop.f32.mrb[92].mxu1 }
 0x59d   : > { %v2906_v24 = vmul.f32 %v5221_v32, %v4723_v37  ;;  %v2810_v47 = vpop.f32.mrb[93].mxu1 }
 0x59e   : > { %v2905_v31 = vmul.f32 %v5222_v56, %v2810_v47 }
 0x59f   : > { %v7155_v60 = vadd.f32 %v6983_v20, %v2906_v24 }
 0x5a0   : > { %v7158_v36 = vadd.f32 %v6986_v15, %v2905_v31  ;;  %v5223_v15 = vld [vmem:[%s7400_s2 + $0x348] sm:$0xff] }
 0x5a2   : > { %4033 = vmatmul.mubr.msk.f32.gmra.mrb[116].mxu1 %vm428_vm1, %v7158_v36  ;;  %4051 = vmatmul.mubr.msk.f32.gmra.mrb[108].mxu0 %vm428_vm1, %v7158_v36 }
 0x5a3   : > { %3161 = vmatprep.mubr.f32.mxu1 %v5237_v9  ;;  %3294 = vmatprep.mubr.f32.mxu0 %v5237_v9 }
 0x5a6   : > { %4034 = vmatmul.mubr.msk.f32.gmra.mrb[118].mxu1 %vm428_vm1, %v7155_v60  ;;  %4052 = vmatmul.mubr.msk.f32.gmra.mrb[110].mxu0 %vm428_vm1, %v7155_v60 }
 0x5a7   : > { %3165 = vmatprep.mubr.f32.mxu1 %v5237_v9  ;;  %3298 = vmatprep.mubr.f32.mxu0 %v5237_v9 }
 0x5ac   : > { %v4726_v20 = vpop.f32.mrb[94].mxu1 }
 0x5ad   : > { %v2908_v54 = vmul.f32 %v5223_v15, %v4726_v20  ;;  %v2820_v26 = vpop.f32.mrb[95].mxu1 }
 0x5ae   : > { %v2907_v59 = vmul.f32 %v5224_v28, %v2820_v26 }
 0x5af   : > { %v7179_v57 = vadd.f32 %v6995_v48, %v2908_v54 }
 0x5b0   : > { %v7182_v27 = vadd.f32 %v6998_v23, %v2907_v59  ;;  %v5225_v23 = vld [vmem:[%s7400_s2 + $0x358] sm:$0xff] }
 0x5b2   : > { %4035 = vmatmul.mubr.msk.f32.gmra.mrb[120].mxu1 %vm428_vm1, %v7182_v27  ;;  %4053 = vmatmul.mubr.msk.f32.gmra.mrb[112].mxu0 %vm428_vm1, %v7182_v27 }
 0x5b3   : > { %3169 = vmatprep.mubr.f32.mxu1 %v5237_v9  ;;  %3302 = vmatprep.mubr.f32.mxu0 %v5237_v9 }
 0x5b6   : > { %4036 = vmatmul.mubr.msk.f32.gmra.mrb[122].mxu1 %vm428_vm1, %v7179_v57  ;;  %4054 = vmatmul.mubr.msk.f32.gmra.mrb[114].mxu0 %vm428_vm1, %v7179_v57 }
 0x5b7   : > { %3173 = vmatprep.mubr.f32.mxu1 %v5237_v9  ;;  %3306 = vmatprep.mubr.f32.mxu0 %v5237_v9 }
 0x5bc   : > { %v4729_v48 = vpop.f32.mrb[96].mxu1 }
 0x5bd   : > { %v2910_v29 = vmul.f32 %v5225_v23, %v4729_v48  ;;  %v2830_v17 = vpop.f32.mrb[97].mxu1 }
 0x5be   : > { %v2909_v22 = vmul.f32 %v5226_v39, %v2830_v17 }
 0x5bf   : > { %v7203_v50 = vadd.f32 %v7007_v12, %v2910_v29 }
 0x5c0   : > { %v7206_v43 = vadd.f32 %v7010_v44, %v2909_v22  ;;  %v5227_v44 = vld [vmem:[%s7400_s2 + $0x368] sm:$0xff] }
 0x5c2   : > { %4037 = vmatmul.mubr.msk.f32.gmra.mrb[124].mxu1 %vm428_vm1, %v7206_v43  ;;  %4055 = vmatmul.mubr.msk.f32.gmra.mrb[116].mxu0 %vm428_vm1, %v7206_v43 }
 0x5c3   : > { %3177 = vmatprep.mubr.f32.mxu1 %v5237_v9  ;;  %3310 = vmatprep.mubr.f32.mxu0 %v5237_v9 }
 0x5c6   : > { %4038 = vmatmul.mubr.msk.f32.gmra.mrb[126].mxu1 %vm428_vm1, %v7203_v50  ;;  %4056 = vmatmul.mubr.msk.f32.gmra.mrb[118].mxu0 %vm428_vm1, %v7203_v50 }
 0x5c7   : > { %3181 = vmatprep.mubr.f32.mxu1 %v5237_v9  ;;  %3314 = vmatprep.mubr.f32.mxu0 %v5237_v9 }
 0x5cc   : > { %v4732_v12 = vpop.f32.mrb[98].mxu1 }
 0x5cd   : > { %v2912_v34 = vmul.f32 %v5227_v44, %v4732_v12  ;;  %v2840_v16 = vpop.f32.mrb[99].mxu1 }
 0x5ce   : > { %v2911_v53 = vmul.f32 %v5228_v33, %v2840_v16 }
 0x5cf   : > { %v7227_v30 = vadd.f32 %v7019_v14, %v2912_v34  ;;  %v230_v14 = vld [vmem:[%s7400_s2 + $0x60] sm:$0xff] }
 0x5d0   : > { %v7230_v40 = vadd.f32 %v7022_v58, %v2911_v53  ;;  %v231_v58 = vld [vmem:[%s7400_s2 + $0x68] sm:$0xff] }
 0x5d2   : > { %4039 = vmatmul.mubr.msk.f32.gmra.mrb[128].mxu1 %vm428_vm1, %v7230_v40  ;;  %4057 = vmatmul.mubr.msk.f32.gmra.mrb[120].mxu0 %vm428_vm1, %v7230_v40 }
 0x5d3   : > { %3185 = vmatprep.mubr.f32.mxu1 %v5237_v9  ;;  %3318 = vmatprep.mubr.f32.mxu0 %v5237_v9 }
 0x5d6   : > { %4040 = vmatmul.mubr.msk.f32.gmra.mrb[130].mxu1 %vm428_vm1, %v7227_v30  ;;  %4058 = vmatmul.mubr.msk.f32.gmra.mrb[122].mxu0 %vm428_vm1, %v7227_v30 }
 0x5d7   : > { %3387 = vmatprep.mubr.f32.mxu1 %v5237_v9  ;;  %3520 = vmatprep.mubr.f32.mxu0 %v5237_v9 }
 0x5da   : > { %4061 = vmatmul.mubr.msk.f32.vlgmr.msra.gmra.mrb[132].mxu1 %vm428_vm1, %v7046_v63  ;;  %4079 = vmatmul.mubr.msk.f32.vlgmr.msra.gmra.mrb[124].mxu0 %vm428_vm1, %v7046_v63  ;;  %v233_v63 = vld [vmem:[%s7400_s2 + $0x78] sm:$0xff] }
 0x5db   : > { %3391 = vmatprep.mubr.f32.mxu1 %v5237_v9  ;;  %3524 = vmatprep.mubr.f32.mxu0 %v5237_v9 }
 0x5de   : > { %4062 = vmatmul.mubr.msk.f32.gmra.mrb[134].mxu1 %vm428_vm1, %v7043_v25  ;;  %4080 = vmatmul.mubr.msk.f32.gmra.mrb[126].mxu0 %vm428_vm1, %v7043_v25  ;;  %v4873_v25 = vpack.c.bf16 %v231_v58, %v230_v14 }
 0x5df   : > { %3395 = vmatprep.mubr.f32.mxu1 %v5237_v9  ;;  %3528 = vmatprep.mubr.f32.mxu0 %v5237_v9 }
 0x5e0   : > { %4874 = vmatprep.subr.bf16.mxu1 %v4873_v25 }
 0x5e1   : > { %4876 = vmatpush3.bf16.msra.mxu1 %v4873_v25 }
 0x5e2   : > { %4063 = vmatmul.mubr.msk.f32.gmra.mrb[136].mxu1 %vm428_vm1, %v7070_v42  ;;  %4081 = vmatmul.mubr.msk.f32.gmra.mrb[128].mxu0 %vm428_vm1, %v7070_v42 }
 0x5e3   : > { %3399 = vmatprep.mubr.f32.mxu1 %v5237_v9  ;;  %3532 = vmatprep.mubr.f32.mxu0 %v5237_v9 }
 0x5e6   : > { %4064 = vmatmul.mubr.msk.f32.gmra.mrb[138].mxu1 %vm428_vm1, %v7065_v6  ;;  %4082 = vmatmul.mubr.msk.f32.gmra.mrb[130].mxu0 %vm428_vm1, %v7065_v6  ;;  %v4881_v6 = vpack.c.bf16 %v235_v55, %v234_v62 }
 0x5e7   : > { %3403 = vmatprep.mubr.f32.mxu1 %v5237_v9  ;;  %3536 = vmatprep.mubr.f32.mxu0 %v5237_v9 }
 0x5ea   : > { %4065 = vmatmul.mubr.msk.f32.gmra.mrb[140].mxu1 %vm428_vm1, %v7096_v41  ;;  %4083 = vmatmul.mubr.msk.f32.gmra.mrb[132].mxu0 %vm428_vm1, %v7096_v41 }
 0x5eb   : > { %3407 = vmatprep.mubr.f32.mxu1 %v5237_v9  ;;  %3540 = vmatprep.mubr.f32.mxu0 %v5237_v9 }
 0x5ee   : > { %4066 = vmatmul.mubr.msk.f32.gmra.mrb[142].mxu1 %vm428_vm1, %v7091_v2  ;;  %4084 = vmatmul.mubr.msk.f32.gmra.mrb[134].mxu0 %vm428_vm1, %v7091_v2 }
 0x5ef   : > { %3411 = vmatprep.mubr.f32.mxu1 %v5237_v9  ;;  %3544 = vmatprep.mubr.f32.mxu0 %v5237_v9 }
 0x5f2   : > { %4067 = vmatmul.mubr.msk.f32.gmra.mrb[144].mxu1 %vm428_vm1, %v7116_v10  ;;  %4085 = vmatmul.mubr.msk.f32.gmra.mrb[136].mxu0 %vm428_vm1, %v7116_v10 }
 0x5f3   : > { %3415 = vmatprep.mubr.f32.mxu1 %v5237_v9  ;;  %3548 = vmatprep.mubr.f32.mxu0 %v5237_v9 }
 0x5f6   : > { %4068 = vmatmul.mubr.msk.f32.gmra.mrb[146].mxu1 %vm428_vm1, %v7111_v13  ;;  %4086 = vmatmul.mubr.msk.f32.gmra.mrb[138].mxu0 %vm428_vm1, %v7111_v13  ;;  %v237_v13 = vld [vmem:[%s7400_s2 + $0x98] sm:$0xf] }
 0x5f7   : > { %3419 = vmatprep.mubr.f32.mxu1 %v5237_v9  ;;  %3552 = vmatprep.mubr.f32.mxu0 %v5237_v9  ;;  %v4885_v24 = vpack.c.bf16 %v237_v13, %v236_v61 }
 0x5fa   : > { %4069 = vmatmul.mubr.msk.f32.gmra.mrb[148].mxu1 %vm428_vm1, %v7158_v36  ;;  %4087 = vmatmul.mubr.msk.f32.gmra.mrb[140].mxu0 %vm428_vm1, %v7158_v36 }
 0x5fb   : > { %3424 = vmatprep.mubr.f32.mxu1 %v5237_v9  ;;  %3556 = vmatprep.mubr.f32.mxu0 %v5237_v9 }
 0x5fe   : > { %4070 = vmatmul.mubr.msk.f32.gmra.mrb[150].mxu1 %vm428_vm1, %v7155_v60  ;;  %4088 = vmatmul.mubr.msk.f32.gmra.mrb[142].mxu0 %vm428_vm1, %v7155_v60 }
 0x5ff   : > { %3429 = vmatprep.mubr.f32.mxu1 %v5237_v9  ;;  %3560 = vmatprep.mubr.f32.mxu0 %v5237_v9 }
 0x602   : > { %4071 = vmatmul.mubr.msk.f32.gmra.mrb[152].mxu1 %vm428_vm1, %v7182_v27  ;;  %4089 = vmatmul.mubr.msk.f32.gmra.mrb[144].mxu0 %vm428_vm1, %v7182_v27 }
 0x603   : > { %3434 = vmatprep.mubr.f32.mxu1 %v5237_v9  ;;  %3564 = vmatprep.mubr.f32.mxu0 %v5237_v9 }
 0x606   : > { %4072 = vmatmul.mubr.msk.f32.gmra.mrb[154].mxu1 %vm428_vm1, %v7179_v57  ;;  %4090 = vmatmul.mubr.msk.f32.gmra.mrb[146].mxu0 %vm428_vm1, %v7179_v57 }
 0x607   : > { %3439 = vmatprep.mubr.f32.mxu1 %v5237_v9  ;;  %3568 = vmatprep.mubr.f32.mxu0 %v5237_v9 }
 0x60a   : > { %4073 = vmatmul.mubr.msk.f32.gmra.mrb[156].mxu1 %vm428_vm1, %v7206_v43  ;;  %4091 = vmatmul.mubr.msk.f32.gmra.mrb[148].mxu0 %vm428_vm1, %v7206_v43 }
 0x60b   : > { %3443 = vmatprep.mubr.f32.mxu1 %v5237_v9  ;;  %3573 = vmatprep.mubr.f32.mxu0 %v5237_v9 }
 0x60e   : > { %4074 = vmatmul.mubr.msk.f32.gmra.mrb[158].mxu1 %vm428_vm1, %v7203_v50  ;;  %4092 = vmatmul.mubr.msk.f32.gmra.mrb[150].mxu0 %vm428_vm1, %v7203_v50 }
 0x60f   : > { %3447 = vmatprep.mubr.f32.mxu1 %v5237_v9  ;;  %3578 = vmatprep.mubr.f32.mxu0 %v5237_v9 }
 0x612   : > { %4075 = vmatmul.mubr.msk.f32.gmra.mrb[160].mxu1 %vm428_vm1, %v7230_v40  ;;  %4093 = vmatmul.mubr.msk.f32.gmra.mrb[152].mxu0 %vm428_vm1, %v7230_v40 }
 0x613   : > { %3451 = vmatprep.mubr.f32.mxu1 %v5237_v9  ;;  %3583 = vmatprep.mubr.f32.mxu0 %v5237_v9  ;;  %v232_v9 = vld [vmem:[%s7400_s2 + $0x70] sm:$0xff] }
 0x614   : > { %v4877_v19 = vpack.c.bf16 %v233_v63, %v232_v9 }
 0x616   : > { %4076 = vmatmul.mubr.msk.f32.gmra.mrb[162].mxu1 %vm428_vm1, %v7227_v30  ;;  %4094 = vmatmul.mubr.msk.f32.gmra.mrb[154].mxu0 %vm428_vm1, %v7227_v30 }
 0x617   : > { %4878 = vmatprep.subr.bf16.mxu1 %v4877_v19 }
 0x618   : > { %4880 = vmatpush3.bf16.msra.mxu1 %v4877_v19 }
 0x619   : > { %4882 = vmatprep.subr.bf16.mxu1 %v4881_v6 }
 0x61c   : > { %4884 = vmatpush3.bf16.msra.mxu1 %v4881_v6 }
 0x61d   : > { %4887 = vmatprep.subr.msk.bf16.mxu1 %vm4886_vm4, %v4885_v24 }
 0x620   : > { %4890 = vmatpush3.bf16.msk.msra.mxu1 %vm4886_vm4, %v4885_v24 }
 0x64e   : > { %v3123_v4 = vpop.f32.mrb[100].mxu1  ;;  %v3256_v8 = vpop.f32.mrb[92].mxu0 }
 0x64f   : > { %v3125_v51 = vpop.f32.mrb[101].mxu1  ;;  %v3257_v3 = vpop.f32.mrb[93].mxu0 }
 0x652   : > { %v3128_v42 = vpop.f32.mrb[102].mxu1  ;;  %v3260_v45 = vpop.f32.mrb[94].mxu0 }
 0x653   : > { %v3130_v11 = vpop.f32.mrb[103].mxu1  ;;  %v3261_v52 = vpop.f32.mrb[95].mxu0 }
 0x656   : > { %v3133_v49 = vpop.f32.mrb[104].mxu1  ;;  %v3264_v46 = vpop.f32.mrb[96].mxu0 }
 0x657   : > { %v3134_v21 = vpop.f32.mrb[105].mxu1  ;;  %v3265_v1 = vpop.f32.mrb[97].mxu0 }
 0x658   : > { %v3589_v5 = vadd.f32 %v3134_v21, %v3123_v4 }
 0x65a   : > { %v3138_v2 = vpop.f32.mrb[106].mxu1  ;;  %v3268_v41 = vpop.f32.mrb[98].mxu0 }
 0x65b   : > { %v3139_v35 = vpop.f32.mrb[107].mxu1  ;;  %v3269_v0 = vpop.f32.mrb[99].mxu0 }
 0x65c   : > { %v3590_v38 = vadd.f32 %v3139_v35, %v3128_v42 }
 0x65e   : > { %v3143_v7 = vpop.f32.mrb[108].mxu1  ;;  %v3272_v18 = vpop.f32.mrb[100].mxu0 }
 0x65f   : > { %v3591_v10 = vadd.f32 %v3589_v5, %v3272_v18  ;;  %v3144_v37 = vpop.f32.mrb[109].mxu1  ;;  %v3274_v32 = vpop.f32.mrb[101].mxu0 }
 0x662   : > { %v3147_v47 = vpop.f32.mrb[110].mxu1  ;;  %v3277_v56 = vpop.f32.mrb[102].mxu0 }
 0x663   : > { %v3592_v31 = vadd.f32 %v3590_v38, %v3277_v56  ;;  %v3148_v60 = vpop.f32.mrb[111].mxu1  ;;  %v3279_v36 = vpop.f32.mrb[103].mxu0 }
 0x666   : > { %v3151_v20 = vpop.f32.mrb[112].mxu1  ;;  %v3282_v15 = vpop.f32.mrb[104].mxu0 }
 0x667   : > { %v3152_v54 = vpop.f32.mrb[113].mxu1  ;;  %v3283_v26 = vpop.f32.mrb[105].mxu0 }
 0x668   : > { %v7363_v28 = vadd.f32 %v3591_v10, %v3283_v26 }
 0x66a   : > { %v3155_v59 = vpop.f32.mrb[114].mxu1  ;;  %v3287_v57 = vpop.f32.mrb[106].mxu0 }
 0x66b   : > { %v3156_v27 = vpop.f32.mrb[115].mxu1  ;;  %v3288_v48 = vpop.f32.mrb[107].mxu0 }
 0x66c   : > { %v7365_v23 = vadd.f32 %v3592_v31, %v3288_v48 }
 0x675   : > { %v3159_v29 = vpop.f32.mrb[116].mxu1  ;;  %v3292_v17 = vpop.f32.mrb[108].mxu0 }
 0x676   : > { %v3160_v39 = vpop.f32.mrb[117].mxu1  ;;  %v3293_v22 = vpop.f32.mrb[109].mxu0 }
 0x679   : > { %v3163_v50 = vpop.f32.mrb[118].mxu1  ;;  %v3296_v43 = vpop.f32.mrb[110].mxu0 }
 0x67a   : > { %v3164_v12 = vpop.f32.mrb[119].mxu1  ;;  %v3297_v44 = vpop.f32.mrb[111].mxu0 }
 0x685   : > { %v3167_v34 = vpop.f32.mrb[120].mxu1  ;;  %v3300_v16 = vpop.f32.mrb[112].mxu0 }
 0x686   : > { %v3168_v33 = vpop.f32.mrb[121].mxu1  ;;  %v3301_v53 = vpop.f32.mrb[113].mxu0 }
 0x689   : > { %v3171_v30 = vpop.f32.mrb[122].mxu1  ;;  %v3304_v40 = vpop.f32.mrb[114].mxu0 }
 0x68a   : > { %v3172_v14 = vpop.f32.mrb[123].mxu1  ;;  %v3305_v58 = vpop.f32.mrb[115].mxu0 }
 0x695   : > { %v3175_v25 = vpop.f32.mrb[124].mxu1  ;;  %v3308_v9 = vpop.f32.mrb[116].mxu0 }
 0x696   : > { %v3176_v63 = vpop.f32.mrb[125].mxu1  ;;  %v3309_v19 = vpop.f32.mrb[117].mxu0 }
 0x699   : > { %v3179_v4 = vpop.f32.mrb[126].mxu1  ;;  %v3312_v8 = vpop.f32.mrb[118].mxu0 }
 0x69a   : > { %v3180_v62 = vpop.f32.mrb[127].mxu1  ;;  %v3313_v55 = vpop.f32.mrb[119].mxu0 }
 0x6a5   : > { %v3183_v51 = vpop.f32.mrb[128].mxu1  ;;  %v3316_v3 = vpop.f32.mrb[120].mxu0 }
 0x6a6   : > { %v3184_v6 = vpop.f32.mrb[129].mxu1  ;;  %v3317_v42 = vpop.f32.mrb[121].mxu0 }
 0x6a9   : > { %v3187_v45 = vpop.f32.mrb[130].mxu1  ;;  %v3320_v11 = vpop.f32.mrb[122].mxu0 }
 0x6aa   : > { %v3188_v52 = vpop.f32.mrb[131].mxu1  ;;  %v3321_v49 = vpop.f32.mrb[123].mxu0 }
 0x6ad   : > { %v3389_v46 = vpop.f32.mrb[132].mxu1  ;;  %v3522_v21 = vpop.f32.mrb[124].mxu0 }
 0x6ae   : > { %v3390_v1 = vpop.f32.mrb[133].mxu1  ;;  %v3523_v5 = vpop.f32.mrb[125].mxu0  ;;  %v4095_v21 = vld [vmem:[%s7400_s2 + $0xd8] ss:$0 sm:$0xff] }
 0x6b1   : > { %v3393_v2 = vpop.f32.mrb[134].mxu1  ;;  %v3526_v41 = vpop.f32.mrb[126].mxu0 }
 0x6b2   : > { %v3394_v35 = vpop.f32.mrb[135].mxu1  ;;  %v3527_v0 = vpop.f32.mrb[127].mxu0 }
 0x6b5   : > { %v3397_v38 = vpop.f32.mrb[136].mxu1  ;;  %v3530_v7 = vpop.f32.mrb[128].mxu0 }
 0x6b6   : > { %v3398_v18 = vpop.f32.mrb[137].mxu1  ;;  %v3531_v61 = vpop.f32.mrb[129].mxu0 }
 0x6b9   : > { %v3401_v13 = vpop.f32.mrb[138].mxu1  ;;  %v3534_v10 = vpop.f32.mrb[130].mxu0 }
 0x6ba   : > { %v3402_v37 = vpop.f32.mrb[139].mxu1  ;;  %v3535_v32 = vpop.f32.mrb[131].mxu0  ;;  %v238_v10 = vld [vmem:[%s7400_s2 + $0xa0] sm:$0xff] }
 0x6bb   : > { %v239_v37 = vld [vmem:[%s7400_s2 + $0xa8] sm:$0xff] }
 0x6bc   : > { %v4891_v32 = vpack.c.bf16 %v239_v37, %v238_v10 }
 0x6bd   : > { %v3405_v24 = vpop.f32.mrb[140].mxu1  ;;  %v3538_v47 = vpop.f32.mrb[132].mxu0 }
 0x6be   : > { %v3406_v56 = vpop.f32.mrb[141].mxu1  ;;  %v3539_v31 = vpop.f32.mrb[133].mxu0  ;;  %4892 = vmatprep.subr.bf16.mxu1 %v4891_v32  ;;  %v240_v24 = vld [vmem:[%s7400_s2 + $0xb0] sm:$0xf]  ;;  %v4096_v47 = vld [vmem:[%s7400_s2 + $0xe0] ss:$0 sm:$0xff] }
 0x6c1   : > { %v3409_v60 = vpop.f32.mrb[142].mxu1  ;;  %v3542_v36 = vpop.f32.mrb[134].mxu0 }
 0x6c2   : > { %v3410_v20 = vpop.f32.mrb[143].mxu1  ;;  %v3543_v15 = vpop.f32.mrb[135].mxu0 }
 0x6c5   : > { %v3413_v54 = vpop.f32.mrb[144].mxu1  ;;  %v3546_v26 = vpop.f32.mrb[136].mxu0 }
 0x6c6   : > { %v3414_v59 = vpop.f32.mrb[145].mxu1  ;;  %v3547_v57 = vpop.f32.mrb[137].mxu0  ;;  %v4100_v54 = vld [vmem:[%s7400_s2 + $0xe8] ss:$0 sm:$0xff] }
 0x6c9   : > { %v3417_v27 = vpop.f32.mrb[146].mxu1  ;;  %v3550_v48 = vpop.f32.mrb[138].mxu0 }
 0x6ca   : > { %v3418_v29 = vpop.f32.mrb[147].mxu1  ;;  %v3551_v17 = vpop.f32.mrb[139].mxu0 }
 0x6cd   : > { %v3421_v39 = vpop.f32.mrb[148].mxu1  ;;  %v3554_v22 = vpop.f32.mrb[140].mxu0 }
 0x6ce   : > { %v3595_v50 = vadd.f32 %v7363_v28, %v3421_v39  ;;  %v3423_v43 = vpop.f32.mrb[149].mxu1  ;;  %v3555_v12 = vpop.f32.mrb[141].mxu0 }
 0x6d1   : > { %v3426_v44 = vpop.f32.mrb[150].mxu1  ;;  %v3558_v34 = vpop.f32.mrb[142].mxu0 }
 0x6d2   : > { %v3596_v16 = vadd.f32 %v7365_v23, %v3426_v44  ;;  %v3428_v33 = vpop.f32.mrb[151].mxu1  ;;  %v3559_v53 = vpop.f32.mrb[143].mxu0 }
 0x6d5   : > { %v3431_v30 = vpop.f32.mrb[152].mxu1  ;;  %v3562_v40 = vpop.f32.mrb[144].mxu0 }
 0x6d6   : > { %v3432_v14 = vpop.f32.mrb[153].mxu1  ;;  %v3563_v58 = vpop.f32.mrb[145].mxu0 }
 0x6d7   : > { %v3597_v25 = vadd.f32 %v3595_v50, %v3432_v14 }
 0x6d9   : > { %v3436_v9 = vpop.f32.mrb[154].mxu1  ;;  %v3566_v63 = vpop.f32.mrb[146].mxu0 }
 0x6da   : > { %v3437_v19 = vpop.f32.mrb[155].mxu1  ;;  %v3567_v4 = vpop.f32.mrb[147].mxu0 }
 0x6db   : > { %v3598_v8 = vadd.f32 %v3596_v16, %v3437_v19 }
 0x6dd   : > { %v3441_v62 = vpop.f32.mrb[156].mxu1  ;;  %v3570_v28 = vpop.f32.mrb[148].mxu0 }
 0x6de   : > { %v3599_v55 = vadd.f32 %v3597_v25, %v3570_v28  ;;  %v3442_v51 = vpop.f32.mrb[157].mxu1  ;;  %v3572_v3 = vpop.f32.mrb[149].mxu0 }
 0x6e1   : > { %v3445_v6 = vpop.f32.mrb[158].mxu1  ;;  %v3575_v42 = vpop.f32.mrb[150].mxu0 }
 0x6e2   : > { %v3600_v23 = vadd.f32 %v3598_v8, %v3575_v42  ;;  %v3446_v45 = vpop.f32.mrb[159].mxu1  ;;  %v3577_v11 = vpop.f32.mrb[151].mxu0 }
 0x6e5   : > { %v3449_v52 = vpop.f32.mrb[160].mxu1  ;;  %v3580_v49 = vpop.f32.mrb[152].mxu0 }
 0x6e6   : > { %v3450_v46 = vpop.f32.mrb[161].mxu1  ;;  %v3581_v1 = vpop.f32.mrb[153].mxu0 }
 0x6e7   : > { %v3601_v5 = vadd.f32 %v3599_v55, %v3581_v1 }
 0x6e9   : > { %v3607_v2 = vadd.f32 %v4095_v21, %v3601_v5  ;;  %v3453_v41 = vpop.f32.mrb[162].mxu1  ;;  %v3585_v35 = vpop.f32.mrb[154].mxu0 }
 0x6ea   : > { %v3454_v0 = vpop.f32.mrb[163].mxu1  ;;  %v3586_v38 = vpop.f32.mrb[155].mxu0 }
 0x6eb   : > { %v3609_v7 = vmax.f32 %v3607_v2, 0.0  ;;  %v3602_v18 = vadd.f32 %v3600_v23, %v3586_v38 }
 0x6ed   : > { %v3608_v61 = vadd.f32 %v4095_v21, %v3602_v18  ;;  %4749 = vmatprep.mubr.msk.f32.mxu1 %vm3615_vm5, %v3609_v7 }
 0x6ef   : > { %v3610_v13 = vmax.f32 %v3608_v61, 0.0 }
 0x6f1   : > { %4750 = vmatmul.mubr.msk.f32.vlgmr.msra.gmra.mrb[164].mxu1 %vm3615_vm5, %v3610_v13 }
 0x6f2   : > { %4894 = vmatpush3.bf16.msra.mxu1 %v4891_v32 }
 0x6f3   : > { %4756 = vmatprep.subr.msk.mxu1 %vm477_vm0, %v240_v24 }
 0x6f6   : > { %4757 = vmatpush3.msk.msra.mxu1 %vm477_vm0, %v240_v24 }
 0x7c4   : > { %v4751_v56 = vpop.f32.mrb[164].mxu1 }
 0x7c5   : > { %v3697_v31 = vadd.f32 %v4751_v56, %v4096_v47  ;;  %v3691_v60 = vpop.f32.mrb[165].mxu1 }
 0x7c6   : > { %v3692_v36 = vadd.f32 %v4096_v47, %v3691_v60 }
 0x7c7   : > { %v3701_v15 = vmax.f32 %v3697_v31, 0.0 }
 0x7c8   : > { %v3700_v20 = vmax.f32 %v3692_v36, 0.0 }
 0x7ca   : > { %4758 = vmatprep.mubr.msk.f32.mxu1 %vm428_vm1, %v3700_v20 }
 0x7cb   : > { %4759 = vmatmul.mubr.msk.f32.vlgmr.msra.gmra.mrb[166].mxu1 %vm428_vm1, %v3701_v15 }
 0x89e   : > { %v4760_v26 = vpop.f32.mrb[166].mxu1 }
 0x89f   : > { %v3787_v59 = vadd.f32 %v4760_v26, %v4100_v54  ;;  %v3781_v57 = vpop.f32.mrb[167].mxu1 }
 0x8a0   : > { %v3782_v27 = vadd.f32 %v4100_v54, %v3781_v57 }
 0x8a1   : > { %3791 = vst [vmem:[%s216_s27 + $0x8] sm:$0xff] %v3787_v59 }
 0x8a2   : > { %3790 = vst [vmem:[%s216_s27] sm:$0xff] %v3782_v27 }
 0x8a3 PF: > { %s14_s15 = sadd.s32 1, %s5235_s15  }
 0x8a4   : > { %p11_p6 = scmp.ge.s32.totalorder %s14_s15, 10  }
 0x8a6   :  { %13 = sbr.rel (!%p11_p6) target bundleno = 1 (0x1), region = 69 }

</bundles_post_ra>
